<compile_context>
chip_gen: v7x
topology: tpu7x:2x2x1
jax: 0.10.0
libtpu: 0.0.40
codegen_flags: <defaults>
</compile_context>

<pallas_src>
import numpy as np
import jax
import jax.numpy as jnp
from jax import lax
from jax.experimental import pallas as pl
from jax.experimental.pallas import tpu as pltpu

NEG_SLOPE = 0.01                      # F.leaky_relu default negative_slope
RES_DILATIONS = (1, 1, 3, 1, 9, 1)    # ResidualStack conv1..conv6
CT_KERNEL = 16                        # ConvTranspose1d kernel_size
CT_PADDING = 6                        # ConvTranspose1d padding


def _leaky(x):
    return jnp.where(x > 0, x, NEG_SLOPE * x)


def _round_up(x, m):
    return ((x + m - 1) // m) * m


# -----------------------------------------------------------------------------
# Wrapper-side weight plumbing: polyphase block matrices (host-side, done once)
# -----------------------------------------------------------------------------
def _polyphase_conv_transpose_weights(w_eff, bias, stride, padding):
    """ConvTranspose1d -> polyphase-wide matmul weight.

    w_eff: (C_in, C_out, k) effective (weight-normalized) ConvTranspose1d weight.
    Output time t = stride*q + c lives at wide row q, lane block c:
      out_wide[q, c*C+co] = sum_m x[q + e_c - m] @ w_eff[:, co, r_c + stride*m]
    Returns (deltas, W_wide (len(deltas)*C_in, stride*C_out), b_wide (1, stride*C_out)).
    """
    w_eff = np.asarray(w_eff, np.float32)
    c_in, c_out, k = w_eff.shape
    s, p = stride, padding
    entries, deltas = [], set()
    for c in range(s):
        r_c = (c + p) % s
        e_c = (c + p - r_c) // s
        m = 0
        while r_c + s * m < k:
            tap = r_c + s * m
            entries.append((c, tap, e_c - m))
            deltas.add(e_c - m)
            m += 1
    deltas = tuple(sorted(deltas))
    w_wide = np.zeros((len(deltas) * c_in, s * c_out), np.float32)
    for c, tap, delta in entries:
        di = deltas.index(delta)
        w_wide[di * c_in:(di + 1) * c_in, c * c_out:(c + 1) * c_out] = w_eff[:, :, tap]
    b_wide = np.tile(np.asarray(bias, np.float32), s)[None, :]
    return deltas, w_wide, b_wide


def _polyphase_conv1d_weights(w_eff, bias, dilation, stride):
    """'same'-padded k=3 dilated Conv1d -> polyphase-wide matmul weight.

    w_eff: (C_out, C_in, 3).  For output lane block c and tap u in {-1,0,1}:
      source row shift = floor((c+u*d)/s), source lane block = (c+u*d) mod s.
    Returns (deltas, W_wide (len(deltas)*stride*C_in, stride*C_out), b_wide (1, stride*C_out)).
    """
    w_eff = np.asarray(w_eff, np.float32)
    c_out, c_in, kk = w_eff.shape
    s = stride
    entries, deltas = [], set()
    for c in range(s):
        for ui, u in enumerate(range(-(kk // 2), kk // 2 + 1)):
            tshift = c + u * dilation
            entries.append((c, ui, tshift // s, tshift % s))
            deltas.add(tshift // s)
    deltas = tuple(sorted(deltas))
    w_wide = np.zeros((len(deltas) * s * c_in, s * c_out), np.float32)
    for c, ui, delta, cp in entries:
        row0 = deltas.index(delta) * s * c_in + cp * c_in
        w_wide[row0:row0 + c_in, c * c_out:(c + 1) * c_out] = w_eff[:, :, ui].T
    b_wide = np.tile(np.asarray(bias, np.float32), s)[None, :]
    return deltas, w_wide, b_wide


# -----------------------------------------------------------------------------
# Pallas kernel
# -----------------------------------------------------------------------------
def _make_conv_block_kernel(*, lq, tile_rows, halo, n_ch, stride,
                            ct_off, ct_deltas, res_offs, res_deltas,
                            fuse_taps, mm_dtype):
    """One grid step = one batch element x one row tile (with `halo` recompute rows each side)."""
    R = tile_rows + 2 * halo
    wide = stride * n_ch
    ct_union = sorted({d for d in ct_deltas if d != 0})
    res_union = sorted({d for dl in res_deltas for d in dl if d != 0})

    def kernel(xprev_ref, xcur_ref, xnext_ref, w_ref, b_ref, o_ref):
        t = pl.program_id(1)
        row0 = t * tile_rows - halo                       # global row index of padded-tile row 0

        # Halo'd activation tile; activations never round-trip HBM inside the block.
        x = jnp.concatenate([xprev_ref[0], xcur_ref[0], xnext_ref[0]], axis=0)   # (R, C)

        # Hoisted halo masks: ONE iota + ONE mask per distinct delta, reused by every conv.
        # (JAX does not CSE broadcast_in_dim; do not re-emit this per shift.)
        def build_masks(union, width):
            g = lax.broadcasted_iota(jnp.int32, (R, width), 0) + row0
            return {d: jnp.logical_and(g + d >= 0, g + d < lq) for d in union}

        ct_masks = build_masks(ct_union, n_ch)
        res_masks = build_masks(res_union, wide)

        def shifted(a, d, masks):
            # a[p] -> a[p + d] within the segment; zero outside (conv zero padding / tile halo).
            if d == 0:
                return a
            rolled = pltpu.roll(a, shift=(-d) % R, axis=0)        # XLU, no VMEM traffic
            return jnp.where(masks[d], rolled, 0.0)

        def conv(a, masks, deltas, w_off, blk, bias):
            if fuse_taps:
                # One MXU matmul per conv: all taps x phases fused along the contraction axis.
                cat = jnp.concatenate([shifted(a, d, masks) for d in deltas], axis=-1)
                acc = jnp.dot(cat.astype(mm_dtype),
                              w_ref[w_off:w_off + blk * len(deltas), :],
                              preferred_element_type=jnp.float32)
            else:
                # Per-delta accumulation (each block one MXU pass) -- preferred on v7x's MRB.
                acc = None
                for i, d in enumerate(deltas):
                    p = jnp.dot(shifted(a, d, masks).astype(mm_dtype),
                                w_ref[w_off + i * blk:w_off + (i + 1) * blk, :],
                                preferred_element_type=jnp.float32)
                    acc = p if acc is None else acc + p
            return acc + bias

        # ConvBlock: ConvTranspose1d (polyphase-wide) -> leaky_relu
        h = _leaky(conv(x, ct_masks, ct_deltas, ct_off, n_ch, b_ref[0]))

        # ResidualStack
        c1 = conv(h, res_masks, res_deltas[0], res_offs[0], wide, b_ref[1])
        c2 = conv(_leaky(c1), res_masks, res_deltas[1], res_offs[1], wide, b_ref[2])
        add1 = c2 + h
        c3 = conv(_leaky(add1), res_masks, res_deltas[2], res_offs[2], wide, b_ref[3])
        c4 = conv(_leaky(c3), res_masks, res_deltas[3], res_offs[3], wide, b_ref[4])
        add2 = c4 + add1
        c5 = conv(_leaky(add2), res_masks, res_deltas[4], res_offs[4], wide, b_ref[5])
        c6 = conv(_leaky(c5), res_masks, res_deltas[5], res_offs[5], wide, b_ref[6])
        add3 = c6 + add2

        # Final leaky_relu; lane-dense store of the center rows only (halo is recompute overlap).
        o_ref[0] = _leaky(add3[halo:halo + tile_rows, :]).astype(o_ref.dtype)

    return kernel


def conv_block_pallas(x_ncl, ct_w, ct_b, res_ws, res_bs, *, stride,
                      padding=CT_PADDING, max_tile_rows=512,
                      fuse_taps=True, matmul_dtype=jnp.float32,
                      return_wide=False):
    """ConvBlock forward.  x_ncl: (N, C, L_in) f32 (PyTorch NCL layout).

    ct_w: (C, C, 16) effective ConvTranspose1d weight, ct_b: (C,).
    res_ws[i]: (C, C, 3) effective Conv1d weight, res_bs[i]: (C,).
    max_tile_rows: rows (= output_time/stride) per grid step; ~512 for v5e/v6e, use ~half on
                   v7x (64 MiB VMEM).  fuse_taps=False -> per-delta MXU accumulation (v7x MRB).
    matmul_dtype=jnp.bfloat16 casts only MXU operands (f32 accumulate + f32 elementwise math).
    return_wide=True returns the lane-dense (N, L_out/stride, stride*C) layout (skips un-fold).
    """
    n, c, l_in = x_ncl.shape
    k = np.asarray(ct_w).shape[2]
    s = stride
    l_out = (l_in - 1) * s + k - 2 * padding
    assert l_out % s == 0
    lq = l_out // s
    # TODO(synk): generalize the polyphase batch fold to strides with kernel - 2*padding != stride.
    assert lq == l_in, "polyphase fold assumes kernel_size - 2*padding == stride"

    # ---- wrapper-side weight plumbing: polyphase block weights, concatenated into ONE array ----
    ct_deltas, ct_wide, ct_bw = _polyphase_conv_transpose_weights(ct_w, ct_b, s, padding)
    res_deltas, res_wides, res_bws = [], [], []
    for w, b, d in zip(res_ws, res_bs, RES_DILATIONS):
        dl, ww, bw = _polyphase_conv1d_weights(w, b, d, s)
        res_deltas.append(dl)
        res_wides.append(ww)
        res_bws.append(bw)
    res_deltas = tuple(res_deltas)

    segs = [ct_wide] + res_wides
    offs, off = [], 0
    for seg in segs:
        offs.append(off)
        off += seg.shape[0]
    ct_off, res_offs = offs[0], tuple(offs[1:])
    w_all = jnp.asarray(np.concatenate(segs, axis=0), dtype=matmul_dtype)       # (~2720, s*C)
    biases = jnp.asarray(np.stack([ct_bw] + res_bws, axis=0), jnp.float32)      # (7, 1, s*C)
    wide = s * c

    # ---- row tiling: recompute halo sized from the per-layer shifts ----
    needed_halo = (max(abs(d) for d in ct_deltas)
                   + sum(max(abs(d) for d in dl) for dl in res_deltas))          # = 10
    halo = _round_up(max(needed_halo, 8), 8)                                     # = 16
    tile_rows = max(halo, min(max_tile_rows, _round_up(lq, halo)))
    tile_rows = _round_up(tile_rows, halo)
    lq_pad = _round_up(lq, tile_rows)
    num_tiles = lq_pad // tile_rows
    hb = tile_rows // halo                # halo blocks per tile
    nhb = lq_pad // halo                  # halo blocks along the row axis

    # NCL -> NLC fold (wrapper glue); pad rows so every row tile is full.
    x_nlc = jnp.transpose(x_ncl, (0, 2, 1))
    if lq_pad > lq:
        x_nlc = jnp.pad(x_nlc, ((0, 0), (0, lq_pad - lq), (0, 0)))

    kernel = _make_conv_block_kernel(
        lq=lq, tile_rows=tile_rows, halo=halo, n_ch=c, stride=s,
        ct_off=ct_off, ct_deltas=ct_deltas, res_offs=res_offs, res_deltas=res_deltas,
        fuse_taps=fuse_taps, mm_dtype=matmul_dtype)

    # Explicit VMEM budget (v7x physical VMEM is 64 MiB; avoid silent double-buffer overshoot).
    w_item = 2 if matmul_dtype == jnp.bfloat16 else 4
    r_pad = tile_rows + 2 * halo
    max_cat_k = max(len(ct_deltas) * c, max(len(dl) for dl in res_deltas) * wide)
    est = (2 * w_all.size * w_item + biases.size * 4
           + 2 * r_pad * c * 4                      # input blocks (double buffered)
           + 2 * tile_rows * wide * 4               # output block (double buffered)
           + 18 * r_pad * wide * 4                  # live f32 activations + masks
           + r_pad * max_cat_k * w_item)            # widest fused concat operand
    vmem_limit = int(min(max(2 * est, 32 * 1024 * 1024), 64 * 1024 * 1024))

    out_wide = pl.pallas_call(
        kernel,
        out_shape=jax.ShapeDtypeStruct((n, lq_pad, wide), jnp.float32),
        grid_spec=pltpu.PrefetchScalarGridSpec(
            num_scalar_prefetch=0,
            grid=(n, num_tiles),
            in_specs=[
                # left halo / current tile / right halo blocks of the SAME folded input
                pl.BlockSpec((1, halo, c),
                             lambda b, t: (b, jnp.maximum(t * hb - 1, 0), 0)),
                pl.BlockSpec((1, tile_rows, c), lambda b, t: (b, t, 0)),
                pl.BlockSpec((1, halo, c),
                             lambda b, t: (b, jnp.minimum((t + 1) * hb, nhb - 1), 0)),
                # fused weight table + per-phase biases stay resident (constant index_map)
                pl.BlockSpec(w_all.shape, lambda b, t: (0, 0)),
                pl.BlockSpec(biases.shape, lambda b, t: (0, 0, 0)),
            ],
            out_specs=pl.BlockSpec((1, tile_rows, wide), lambda b, t: (b, t, 0)),
        ),
        compiler_params=pltpu.CompilerParams(
            dimension_semantics=("parallel", "parallel"),
            vmem_limit_bytes=vmem_limit),
    )(x_nlc, x_nlc, x_nlc, w_all, biases)

    out_wide = out_wide[:, :lq, :]
    if return_wide:
        return out_wide   # (N, L_out/stride, stride*C): lane-dense layout for fused consumers
    # Wide layout (row=q, lane=(phase c, channel)) -> PyTorch NCL (t = s*q + c): XLA glue.
    return (out_wide.reshape(n, lq, s, c)
            .transpose(0, 3, 1, 2)
            .reshape(n, c, l_out))


# -----------------------------------------------------------------------------
# Deterministic parameters + pure-JAX reference (mirrors the PyTorch module)
# -----------------------------------------------------------------------------
def make_params(key, c):
    """weight_norm(dim=0) effective weights materialized host-side (glue)."""
    k_ct, k_res = jax.random.split(key)

    # ConvTranspose1d weight: (C_in, C_out, k); dim=0 normalizes over (C_out, k).
    kv, kg, kb = jax.random.split(k_ct, 3)
    v = jax.random.normal(kv, (c, c, CT_KERNEL), jnp.float32) * 0.1
    g = jax.random.normal(kg, (c,), jnp.float32) * 0.1 + 1.0
    ct_b = jax.random.normal(kb, (c,), jnp.float32) * 0.1
    ct_w = g[:, None, None] * v / jnp.sqrt(jnp.sum(v * v, axis=(1, 2), keepdims=True))

    # Conv1d weights: (C_out, C_in, 3); dim=0 normalizes over (C_in, 3).
    res_ws, res_bs = [], []
    for _ in range(6):
        kv, kg, kb, k_res = jax.random.split(k_res, 4)
        v = jax.random.normal(kv, (c, c, 3), jnp.float32) * 0.1
        g = jax.random.normal(kg, (c,), jnp.float32) * 0.1 + 1.0
        b = jax.random.normal(kb, (c,), jnp.float32) * 0.1
        res_ws.append(g[:, None, None] * v / jnp.sqrt(jnp.sum(v * v, axis=(1, 2), keepdims=True)))
        res_bs.append(b)
    return ct_w, ct_b, res_ws, res_bs


def _conv_transpose1d_ref(x, w, b, stride, padding):
    # x: (N, C_in, L); w: (C_in, C_out, k).  Matches torch.nn.ConvTranspose1d.
    k = w.shape[2]
    w_oih = jnp.transpose(jnp.flip(w, axis=2), (1, 0, 2))
    y = lax.conv_general_dilated(
        x, w_oih, window_strides=(1,), padding=[(k - 1 - padding, k - 1 - padding)],
        lhs_dilation=(stride,), dimension_numbers=("NCH", "OIH", "NCH"))
    return y + b[None, :, None]


def _conv1d_ref(x, w, b, d):
    y = lax.conv_general_dilated(
        x, w, window_strides=(1,), padding=[(d, d)], rhs_dilation=(d,),
        dimension_numbers=("NCH", "OIH", "NCH"))
    return y + b[None, :, None]


def conv_block_reference(x_ncl, ct_w, ct_b, res_ws, res_bs, stride, padding=CT_PADDING):
    h = _leaky(_conv_transpose1d_ref(x_ncl, ct_w, ct_b, stride, padding))
    c1 = _conv1d_ref(h, res_ws[0], res_bs[0], 1)
    c2 = _conv1d_ref(_leaky(c1), res_ws[1], res_bs[1], 1)
    add1 = c2 + h
    c3 = _conv1d_ref(_leaky(add1), res_ws[2], res_bs[2], 3)
    c4 = _conv1d_ref(_leaky(c3), res_ws[3], res_bs[3], 1)
    add2 = c4 + add1
    c5 = _conv1d_ref(_leaky(add2), res_ws[4], res_bs[4], 9)
    c6 = _conv1d_ref(_leaky(c5), res_ws[5], res_bs[5], 1)
    add3 = c6 + add2
    return _leaky(add3)


if __name__ == "__main__":
    key = jax.random.PRNGKey(0)
    N, C, L_IN = 2, 32, 64        # batch, conv_dim (filters), input length
    UPSAMPLING = 4                # ConvTranspose1d stride  ->  L_out = 256

    k_x, k_p = jax.random.split(key)
    x_ncl = jax.random.normal(k_x, (N, C, L_IN), jnp.float32)
    ct_w, ct_b, res_ws, res_bs = make_params(k_p, C)

    l_out = (L_IN - 1) * UPSAMPLING + CT_KERNEL - 2 * CT_PADDING
    ref = conv_block_reference(x_ncl, ct_w, ct_b, res_ws, res_bs, UPSAMPLING)
    assert ref.shape == (N, C, l_out)

    # 1) default config (one row tile per batch element at this size), fused-K matmuls, f32
    out = conv_block_pallas(x_ncl, ct_w, ct_b, res_ws, res_bs, stride=UPSAMPLING)
    jax.block_until_ready(out)
    assert out.shape == ref.shape
    assert jnp.allclose(out, ref, atol=1e-3, rtol=1e-3), \
        f"fused/f32 max abs err {float(jnp.max(jnp.abs(out - ref)))}"

    # 2) multi-tile pipelined path (2 row tiles per batch element -> exercises halo handling)
    out2 = conv_block_pallas(x_ncl, ct_w, ct_b, res_ws, res_bs, stride=UPSAMPLING,
                             max_tile_rows=32)
    jax.block_until_ready(out2)
    assert jnp.allclose(out2, ref, atol=1e-3, rtol=1e-3), \
        f"tiled/f32 max abs err {float(jnp.max(jnp.abs(out2 - ref)))}"

    # 3) per-delta MXU accumulation path (preferred on v7x's MRB)
    out3 = conv_block_pallas(x_ncl, ct_w, ct_b, res_ws, res_bs, stride=UPSAMPLING,
                             max_tile_rows=32, fuse_taps=False)
    jax.block_until_ready(out3)
    assert jnp.allclose(out3, ref, atol=1e-3, rtol=1e-3), \
        f"per-delta/f32 max abs err {float(jnp.max(jnp.abs(out3 - ref)))}"

    # 4) bf16 MXU operands (v6e/v7x native-rate path); f32 accumulate + f32 elementwise math
    out4 = conv_block_pallas(x_ncl, ct_w, ct_b, res_ws, res_bs, stride=UPSAMPLING,
                             matmul_dtype=jnp.bfloat16)
    jax.block_until_ready(out4)
    assert jnp.allclose(out4, ref, atol=1e-1, rtol=1e-1), \
        f"bf16 max abs err {float(jnp.max(jnp.abs(out4 - ref)))}"

    print("KERNEL_OK")
</pallas_src>

<mosaic_0001>
module attributes {stable_mosaic.version = 11 : i64} {
  func.func @kernel(%arg0: i32, %arg1: i32, %arg2: memref<1x16x32xf32, #tpu.memory_space<vmem>>, %arg3: memref<1x64x32xf32, #tpu.memory_space<vmem>>, %arg4: memref<1x16x32xf32, #tpu.memory_space<vmem>>, %arg5: memref<2720x128xf32, #tpu.memory_space<vmem>>, %arg6: memref<7x1x128xf32, #tpu.memory_space<vmem>>, %arg7: memref<1x64x128xf32, #tpu.memory_space<vmem>>) attributes {dimension_semantics = [#tpu.dimension_semantics<parallel>, #tpu.dimension_semantics<parallel>], iteration_bounds = array<i64: 2, 1>, scalar_prefetch = 0 : i64, scratch_operands = 0 : i64, tpu.core_type = #tpu.core_type<tc>, window_params = [{transform_indices = @transform_0, window_bounds = array<i64: 1, 16, 32>}, {transform_indices = @transform_1, window_bounds = array<i64: 1, 64, 32>}, {transform_indices = @transform_2, window_bounds = array<i64: 1, 16, 32>}, {pipeline_mode = #tpu.pipeline_mode<synchronous>, transform_indices = @transform_3, window_bounds = array<i64: 2720, 128>}, {pipeline_mode = #tpu.pipeline_mode<synchronous>, transform_indices = @transform_4, window_bounds = array<i64: 7, 1, 128>}, {transform_indices = @transform_5, window_bounds = array<i64: 1, 64, 128>}]} {
    %c64_i32 = arith.constant 64 : i32
    %0 = arith.muli %arg1, %c64_i32 : i32
    %c16_i32 = arith.constant 16 : i32
    %1 = arith.subi %0, %c16_i32 : i32
    %c0 = arith.constant 0 : index
    %c0_0 = arith.constant 0 : index
    %c0_1 = arith.constant 0 : index
    %2 = vector.load %arg2[%c0, %c0_0, %c0_1] : memref<1x16x32xf32, #tpu.memory_space<vmem>>, vector<1x16x32xf32>
    %3 = vector.shape_cast %2 : vector<1x16x32xf32> to vector<16x32xf32>
    %c0_2 = arith.constant 0 : index
    %c0_3 = arith.constant 0 : index
    %c0_4 = arith.constant 0 : index
    %4 = vector.load %arg3[%c0_2, %c0_3, %c0_4] : memref<1x64x32xf32, #tpu.memory_space<vmem>>, vector<1x64x32xf32>
    %5 = vector.shape_cast %4 : vector<1x64x32xf32> to vector<64x32xf32>
    %c0_5 = arith.constant 0 : index
    %c0_6 = arith.constant 0 : index
    %c0_7 = arith.constant 0 : index
    %6 = vector.load %arg4[%c0_5, %c0_6, %c0_7] : memref<1x16x32xf32, #tpu.memory_space<vmem>>, vector<1x16x32xf32>
    %7 = vector.shape_cast %6 : vector<1x16x32xf32> to vector<16x32xf32>
    %8 = tpu.concatenate %3, %5, %7 in 0 : vector<16x32xf32>, vector<64x32xf32>, vector<16x32xf32> -> vector<96x32xf32>
    %9 = tpu.iota {dimensions = array<i32: 0>} : vector<96x32xi32>
    %10 = vector.broadcast %1 : i32 to vector<96x32xi32>
    %11 = arith.addi %9, %10 : vector<96x32xi32>
    %c-2_i32 = arith.constant -2 : i32
    %12 = vector.broadcast %c-2_i32 : i32 to vector<96x32xi32>
    %13 = arith.addi %11, %12 : vector<96x32xi32>
    %c0_i32 = arith.constant 0 : i32
    %14 = vector.broadcast %c0_i32 : i32 to vector<96x32xi32>
    %15 = arith.cmpi sge, %13, %14 : vector<96x32xi32>
    %c-2_i32_8 = arith.constant -2 : i32
    %16 = vector.broadcast %c-2_i32_8 : i32 to vector<96x32xi32>
    %17 = arith.addi %11, %16 : vector<96x32xi32>
    %c64_i32_9 = arith.constant 64 : i32
    %18 = vector.broadcast %c64_i32_9 : i32 to vector<96x32xi32>
    %19 = arith.cmpi slt, %17, %18 : vector<96x32xi32>
    %20 = arith.andi %15, %19 : vector<96x32xi1>
    %c-1_i32 = arith.constant -1 : i32
    %21 = vector.broadcast %c-1_i32 : i32 to vector<96x32xi32>
    %22 = arith.addi %11, %21 : vector<96x32xi32>
    %c0_i32_10 = arith.constant 0 : i32
    %23 = vector.broadcast %c0_i32_10 : i32 to vector<96x32xi32>
    %24 = arith.cmpi sge, %22, %23 : vector<96x32xi32>
    %c-1_i32_11 = arith.constant -1 : i32
    %25 = vector.broadcast %c-1_i32_11 : i32 to vector<96x32xi32>
    %26 = arith.addi %11, %25 : vector<96x32xi32>
    %c64_i32_12 = arith.constant 64 : i32
    %27 = vector.broadcast %c64_i32_12 : i32 to vector<96x32xi32>
    %28 = arith.cmpi slt, %26, %27 : vector<96x32xi32>
    %29 = arith.andi %24, %28 : vector<96x32xi1>
    %c1_i32 = arith.constant 1 : i32
    %30 = vector.broadcast %c1_i32 : i32 to vector<96x32xi32>
    %31 = arith.addi %11, %30 : vector<96x32xi32>
    %c0_i32_13 = arith.constant 0 : i32
    %32 = vector.broadcast %c0_i32_13 : i32 to vector<96x32xi32>
    %33 = arith.cmpi sge, %31, %32 : vector<96x32xi32>
    %c1_i32_14 = arith.constant 1 : i32
    %34 = vector.broadcast %c1_i32_14 : i32 to vector<96x32xi32>
    %35 = arith.addi %11, %34 : vector<96x32xi32>
    %c64_i32_15 = arith.constant 64 : i32
    %36 = vector.broadcast %c64_i32_15 : i32 to vector<96x32xi32>
    %37 = arith.cmpi slt, %35, %36 : vector<96x32xi32>
    %38 = arith.andi %33, %37 : vector<96x32xi1>
    %c2_i32 = arith.constant 2 : i32
    %39 = vector.broadcast %c2_i32 : i32 to vector<96x32xi32>
    %40 = arith.addi %11, %39 : vector<96x32xi32>
    %c0_i32_16 = arith.constant 0 : i32
    %41 = vector.broadcast %c0_i32_16 : i32 to vector<96x32xi32>
    %42 = arith.cmpi sge, %40, %41 : vector<96x32xi32>
    %c2_i32_17 = arith.constant 2 : i32
    %43 = vector.broadcast %c2_i32_17 : i32 to vector<96x32xi32>
    %44 = arith.addi %11, %43 : vector<96x32xi32>
    %c64_i32_18 = arith.constant 64 : i32
    %45 = vector.broadcast %c64_i32_18 : i32 to vector<96x32xi32>
    %46 = arith.cmpi slt, %44, %45 : vector<96x32xi32>
    %47 = arith.andi %42, %46 : vector<96x32xi1>
    %48 = tpu.iota {dimensions = array<i32: 0>} : vector<96x128xi32>
    %49 = vector.broadcast %1 : i32 to vector<96x128xi32>
    %50 = arith.addi %48, %49 : vector<96x128xi32>
    %c-3_i32 = arith.constant -3 : i32
    %51 = vector.broadcast %c-3_i32 : i32 to vector<96x128xi32>
    %52 = arith.addi %50, %51 : vector<96x128xi32>
    %c0_i32_19 = arith.constant 0 : i32
    %53 = vector.broadcast %c0_i32_19 : i32 to vector<96x128xi32>
    %54 = arith.cmpi sge, %52, %53 : vector<96x128xi32>
    %c-3_i32_20 = arith.constant -3 : i32
    %55 = vector.broadcast %c-3_i32_20 : i32 to vector<96x128xi32>
    %56 = arith.addi %50, %55 : vector<96x128xi32>
    %c64_i32_21 = arith.constant 64 : i32
    %57 = vector.broadcast %c64_i32_21 : i32 to vector<96x128xi32>
    %58 = arith.cmpi slt, %56, %57 : vector<96x128xi32>
    %59 = arith.andi %54, %58 : vector<96x128xi1>
    %c-2_i32_22 = arith.constant -2 : i32
    %60 = vector.broadcast %c-2_i32_22 : i32 to vector<96x128xi32>
    %61 = arith.addi %50, %60 : vector<96x128xi32>
    %c0_i32_23 = arith.constant 0 : i32
    %62 = vector.broadcast %c0_i32_23 : i32 to vector<96x128xi32>
    %63 = arith.cmpi sge, %61, %62 : vector<96x128xi32>
    %c-2_i32_24 = arith.constant -2 : i32
    %64 = vector.broadcast %c-2_i32_24 : i32 to vector<96x128xi32>
    %65 = arith.addi %50, %64 : vector<96x128xi32>
    %c64_i32_25 = arith.constant 64 : i32
    %66 = vector.broadcast %c64_i32_25 : i32 to vector<96x128xi32>
    %67 = arith.cmpi slt, %65, %66 : vector<96x128xi32>
    %68 = arith.andi %63, %67 : vector<96x128xi1>
    %c-1_i32_26 = arith.constant -1 : i32
    %69 = vector.broadcast %c-1_i32_26 : i32 to vector<96x128xi32>
    %70 = arith.addi %50, %69 : vector<96x128xi32>
    %c0_i32_27 = arith.constant 0 : i32
    %71 = vector.broadcast %c0_i32_27 : i32 to vector<96x128xi32>
    %72 = arith.cmpi sge, %70, %71 : vector<96x128xi32>
    %c-1_i32_28 = arith.constant -1 : i32
    %73 = vector.broadcast %c-1_i32_28 : i32 to vector<96x128xi32>
    %74 = arith.addi %50, %73 : vector<96x128xi32>
    %c64_i32_29 = arith.constant 64 : i32
    %75 = vector.broadcast %c64_i32_29 : i32 to vector<96x128xi32>
    %76 = arith.cmpi slt, %74, %75 : vector<96x128xi32>
    %77 = arith.andi %72, %76 : vector<96x128xi1>
    %c1_i32_30 = arith.constant 1 : i32
    %78 = vector.broadcast %c1_i32_30 : i32 to vector<96x128xi32>
    %79 = arith.addi %50, %78 : vector<96x128xi32>
    %c0_i32_31 = arith.constant 0 : i32
    %80 = vector.broadcast %c0_i32_31 : i32 to vector<96x128xi32>
    %81 = arith.cmpi sge, %79, %80 : vector<96x128xi32>
    %c1_i32_32 = arith.constant 1 : i32
    %82 = vector.broadcast %c1_i32_32 : i32 to vector<96x128xi32>
    %83 = arith.addi %50, %82 : vector<96x128xi32>
    %c64_i32_33 = arith.constant 64 : i32
    %84 = vector.broadcast %c64_i32_33 : i32 to vector<96x128xi32>
    %85 = arith.cmpi slt, %83, %84 : vector<96x128xi32>
    %86 = arith.andi %81, %85 : vector<96x128xi1>
    %c2_i32_34 = arith.constant 2 : i32
    %87 = vector.broadcast %c2_i32_34 : i32 to vector<96x128xi32>
    %88 = arith.addi %50, %87 : vector<96x128xi32>
    %c0_i32_35 = arith.constant 0 : i32
    %89 = vector.broadcast %c0_i32_35 : i32 to vector<96x128xi32>
    %90 = arith.cmpi sge, %88, %89 : vector<96x128xi32>
    %c2_i32_36 = arith.constant 2 : i32
    %91 = vector.broadcast %c2_i32_36 : i32 to vector<96x128xi32>
    %92 = arith.addi %50, %91 : vector<96x128xi32>
    %c64_i32_37 = arith.constant 64 : i32
    %93 = vector.broadcast %c64_i32_37 : i32 to vector<96x128xi32>
    %94 = arith.cmpi slt, %92, %93 : vector<96x128xi32>
    %95 = arith.andi %90, %94 : vector<96x128xi1>
    %c3_i32 = arith.constant 3 : i32
    %96 = vector.broadcast %c3_i32 : i32 to vector<96x128xi32>
    %97 = arith.addi %50, %96 : vector<96x128xi32>
    %c0_i32_38 = arith.constant 0 : i32
    %98 = vector.broadcast %c0_i32_38 : i32 to vector<96x128xi32>
    %99 = arith.cmpi sge, %97, %98 : vector<96x128xi32>
    %c3_i32_39 = arith.constant 3 : i32
    %100 = vector.broadcast %c3_i32_39 : i32 to vector<96x128xi32>
    %101 = arith.addi %50, %100 : vector<96x128xi32>
    %c64_i32_40 = arith.constant 64 : i32
    %102 = vector.broadcast %c64_i32_40 : i32 to vector<96x128xi32>
    %103 = arith.cmpi slt, %101, %102 : vector<96x128xi32>
    %104 = arith.andi %99, %103 : vector<96x128xi1>
    %c0_41 = arith.constant 0 : index
    %c0_42 = arith.constant 0 : index
    %c0_43 = arith.constant 0 : index
    %105 = vector.load %arg6[%c0_41, %c0_42, %c0_43] : memref<7x1x128xf32, #tpu.memory_space<vmem>>, vector<1x1x128xf32>
    %106 = vector.shape_cast %105 : vector<1x1x128xf32> to vector<1x128xf32>
    %c2_i32_44 = arith.constant 2 : i32
    %107 = tpu.dynamic_rotate %8 by %c2_i32_44 dim 0 : vector<96x32xf32>, i32 -> vector<96x32xf32>
    %cst = arith.constant 0.000000e+00 : f32
    %108 = vector.broadcast %cst : f32 to vector<96x32xf32>
    %109 = arith.select %20, %107, %108 : vector<96x32xi1>, vector<96x32xf32>
    %c1_i32_45 = arith.constant 1 : i32
    %110 = tpu.dynamic_rotate %8 by %c1_i32_45 dim 0 : vector<96x32xf32>, i32 -> vector<96x32xf32>
    %cst_46 = arith.constant 0.000000e+00 : f32
    %111 = vector.broadcast %cst_46 : f32 to vector<96x32xf32>
    %112 = arith.select %29, %110, %111 : vector<96x32xi1>, vector<96x32xf32>
    %c95_i32 = arith.constant 95 : i32
    %113 = tpu.dynamic_rotate %8 by %c95_i32 dim 0 : vector<96x32xf32>, i32 -> vector<96x32xf32>
    %cst_47 = arith.constant 0.000000e+00 : f32
    %114 = vector.broadcast %cst_47 : f32 to vector<96x32xf32>
    %115 = arith.select %38, %113, %114 : vector<96x32xi1>, vector<96x32xf32>
    %c94_i32 = arith.constant 94 : i32
    %116 = tpu.dynamic_rotate %8 by %c94_i32 dim 0 : vector<96x32xf32>, i32 -> vector<96x32xf32>
    %cst_48 = arith.constant 0.000000e+00 : f32
    %117 = vector.broadcast %cst_48 : f32 to vector<96x32xf32>
    %118 = arith.select %47, %116, %117 : vector<96x32xi1>, vector<96x32xf32>
    %119 = tpu.concatenate %109, %112, %8, %115, %118 in 1 : vector<96x32xf32>, vector<96x32xf32>, vector<96x32xf32>, vector<96x32xf32>, vector<96x32xf32> -> vector<96x160xf32>
    %c0_49 = arith.constant 0 : index
    %c0_50 = arith.constant 0 : index
    %120 = vector.load %arg5[%c0_49, %c0_50] : memref<2720x128xf32, #tpu.memory_space<vmem>>, vector<160x128xf32>
    %cst_51 = arith.constant dense<0.000000e+00> : vector<96x128xf32>
    %121 = tpu.matmul %119, %120, %cst_51 {dimension_numbers = #tpu.dot_dimension_numbers<[1], [0], [0], [1], [0, 0, 1, 1], [], []>} : vector<96x160xf32>, vector<160x128xf32>, vector<96x128xf32> -> vector<96x128xf32>
    %122 = vector.broadcast %106 : vector<1x128xf32> to vector<96x128xf32>
    %123 = arith.addf %121, %122 : vector<96x128xf32>
    %cst_52 = arith.constant 0.000000e+00 : f32
    %124 = vector.broadcast %cst_52 : f32 to vector<96x128xf32>
    %125 = arith.cmpf ogt, %123, %124 : vector<96x128xf32>
    %cst_53 = arith.constant 0.00999999977 : f32
    %126 = vector.broadcast %cst_53 : f32 to vector<96x128xf32>
    %127 = arith.mulf %126, %123 : vector<96x128xf32>
    %128 = arith.select %125, %123, %127 : vector<96x128xi1>, vector<96x128xf32>
    %c1 = arith.constant 1 : index
    %c0_54 = arith.constant 0 : index
    %c0_55 = arith.constant 0 : index
    %129 = vector.load %arg6[%c1, %c0_54, %c0_55] : memref<7x1x128xf32, #tpu.memory_space<vmem>>, vector<1x1x128xf32>
    %130 = vector.shape_cast %129 : vector<1x1x128xf32> to vector<1x128xf32>
    %c1_i32_56 = arith.constant 1 : i32
    %131 = tpu.dynamic_rotate %128 by %c1_i32_56 dim 0 : vector<96x128xf32>, i32 -> vector<96x128xf32>
    %cst_57 = arith.constant 0.000000e+00 : f32
    %132 = vector.broadcast %cst_57 : f32 to vector<96x128xf32>
    %133 = arith.select %77, %131, %132 : vector<96x128xi1>, vector<96x128xf32>
    %c95_i32_58 = arith.constant 95 : i32
    %134 = tpu.dynamic_rotate %128 by %c95_i32_58 dim 0 : vector<96x128xf32>, i32 -> vector<96x128xf32>
    %cst_59 = arith.constant 0.000000e+00 : f32
    %135 = vector.broadcast %cst_59 : f32 to vector<96x128xf32>
    %136 = arith.select %86, %134, %135 : vector<96x128xi1>, vector<96x128xf32>
    %137 = tpu.concatenate %133, %128, %136 in 1 : vector<96x128xf32>, vector<96x128xf32>, vector<96x128xf32> -> vector<96x384xf32>
    %c160 = arith.constant 160 : index
    %c0_60 = arith.constant 0 : index
    %138 = vector.load %arg5[%c160, %c0_60] : memref<2720x128xf32, #tpu.memory_space<vmem>>, vector<384x128xf32>
    %cst_61 = arith.constant dense<0.000000e+00> : vector<96x128xf32>
    %139 = tpu.matmul %137, %138, %cst_61 {dimension_numbers = #tpu.dot_dimension_numbers<[1], [0], [0], [1], [0, 0, 1, 1], [], []>} : vector<96x384xf32>, vector<384x128xf32>, vector<96x128xf32> -> vector<96x128xf32>
    %140 = vector.broadcast %130 : vector<1x128xf32> to vector<96x128xf32>
    %141 = arith.addf %139, %140 : vector<96x128xf32>
    %cst_62 = arith.constant 0.000000e+00 : f32
    %142 = vector.broadcast %cst_62 : f32 to vector<96x128xf32>
    %143 = arith.cmpf ogt, %141, %142 : vector<96x128xf32>
    %cst_63 = arith.constant 0.00999999977 : f32
    %144 = vector.broadcast %cst_63 : f32 to vector<96x128xf32>
    %145 = arith.mulf %144, %141 : vector<96x128xf32>
    %146 = arith.select %143, %141, %145 : vector<96x128xi1>, vector<96x128xf32>
    %c2 = arith.constant 2 : index
    %c0_64 = arith.constant 0 : index
    %c0_65 = arith.constant 0 : index
    %147 = vector.load %arg6[%c2, %c0_64, %c0_65] : memref<7x1x128xf32, #tpu.memory_space<vmem>>, vector<1x1x128xf32>
    %148 = vector.shape_cast %147 : vector<1x1x128xf32> to vector<1x128xf32>
    %c1_i32_66 = arith.constant 1 : i32
    %149 = tpu.dynamic_rotate %146 by %c1_i32_66 dim 0 : vector<96x128xf32>, i32 -> vector<96x128xf32>
    %cst_67 = arith.constant 0.000000e+00 : f32
    %150 = vector.broadcast %cst_67 : f32 to vector<96x128xf32>
    %151 = arith.select %77, %149, %150 : vector<96x128xi1>, vector<96x128xf32>
    %c95_i32_68 = arith.constant 95 : i32
    %152 = tpu.dynamic_rotate %146 by %c95_i32_68 dim 0 : vector<96x128xf32>, i32 -> vector<96x128xf32>
    %cst_69 = arith.constant 0.000000e+00 : f32
    %153 = vector.broadcast %cst_69 : f32 to vector<96x128xf32>
    %154 = arith.select %86, %152, %153 : vector<96x128xi1>, vector<96x128xf32>
    %155 = tpu.concatenate %151, %146, %154 in 1 : vector<96x128xf32>, vector<96x128xf32>, vector<96x128xf32> -> vector<96x384xf32>
    %c544 = arith.constant 544 : index
    %c0_70 = arith.constant 0 : index
    %156 = vector.load %arg5[%c544, %c0_70] : memref<2720x128xf32, #tpu.memory_space<vmem>>, vector<384x128xf32>
    %cst_71 = arith.constant dense<0.000000e+00> : vector<96x128xf32>
    %157 = tpu.matmul %155, %156, %cst_71 {dimension_numbers = #tpu.dot_dimension_numbers<[1], [0], [0], [1], [0, 0, 1, 1], [], []>} : vector<96x384xf32>, vector<384x128xf32>, vector<96x128xf32> -> vector<96x128xf32>
    %158 = vector.broadcast %148 : vector<1x128xf32> to vector<96x128xf32>
    %159 = arith.addf %157, %158 : vector<96x128xf32>
    %160 = arith.addf %159, %128 : vector<96x128xf32>
    %cst_72 = arith.constant 0.000000e+00 : f32
    %161 = vector.broadcast %cst_72 : f32 to vector<96x128xf32>
    %162 = arith.cmpf ogt, %160, %161 : vector<96x128xf32>
    %cst_73 = arith.constant 0.00999999977 : f32
    %163 = vector.broadcast %cst_73 : f32 to vector<96x128xf32>
    %164 = arith.mulf %163, %160 : vector<96x128xf32>
    %165 = arith.select %162, %160, %164 : vector<96x128xi1>, vector<96x128xf32>
    %c3 = arith.constant 3 : index
    %c0_74 = arith.constant 0 : index
    %c0_75 = arith.constant 0 : index
    %166 = vector.load %arg6[%c3, %c0_74, %c0_75] : memref<7x1x128xf32, #tpu.memory_space<vmem>>, vector<1x1x128xf32>
    %167 = vector.shape_cast %166 : vector<1x1x128xf32> to vector<1x128xf32>
    %c1_i32_76 = arith.constant 1 : i32
    %168 = tpu.dynamic_rotate %165 by %c1_i32_76 dim 0 : vector<96x128xf32>, i32 -> vector<96x128xf32>
    %cst_77 = arith.constant 0.000000e+00 : f32
    %169 = vector.broadcast %cst_77 : f32 to vector<96x128xf32>
    %170 = arith.select %77, %168, %169 : vector<96x128xi1>, vector<96x128xf32>
    %c95_i32_78 = arith.constant 95 : i32
    %171 = tpu.dynamic_rotate %165 by %c95_i32_78 dim 0 : vector<96x128xf32>, i32 -> vector<96x128xf32>
    %cst_79 = arith.constant 0.000000e+00 : f32
    %172 = vector.broadcast %cst_79 : f32 to vector<96x128xf32>
    %173 = arith.select %86, %171, %172 : vector<96x128xi1>, vector<96x128xf32>
    %174 = tpu.concatenate %170, %165, %173 in 1 : vector<96x128xf32>, vector<96x128xf32>, vector<96x128xf32> -> vector<96x384xf32>
    %c928 = arith.constant 928 : index
    %c0_80 = arith.constant 0 : index
    %175 = vector.load %arg5[%c928, %c0_80] : memref<2720x128xf32, #tpu.memory_space<vmem>>, vector<384x128xf32>
    %cst_81 = arith.constant dense<0.000000e+00> : vector<96x128xf32>
    %176 = tpu.matmul %174, %175, %cst_81 {dimension_numbers = #tpu.dot_dimension_numbers<[1], [0], [0], [1], [0, 0, 1, 1], [], []>} : vector<96x384xf32>, vector<384x128xf32>, vector<96x128xf32> -> vector<96x128xf32>
    %177 = vector.broadcast %167 : vector<1x128xf32> to vector<96x128xf32>
    %178 = arith.addf %176, %177 : vector<96x128xf32>
    %cst_82 = arith.constant 0.000000e+00 : f32
    %179 = vector.broadcast %cst_82 : f32 to vector<96x128xf32>
    %180 = arith.cmpf ogt, %178, %179 : vector<96x128xf32>
    %cst_83 = arith.constant 0.00999999977 : f32
    %181 = vector.broadcast %cst_83 : f32 to vector<96x128xf32>
    %182 = arith.mulf %181, %178 : vector<96x128xf32>
    %183 = arith.select %180, %178, %182 : vector<96x128xi1>, vector<96x128xf32>
    %c4 = arith.constant 4 : index
    %c0_84 = arith.constant 0 : index
    %c0_85 = arith.constant 0 : index
    %184 = vector.load %arg6[%c4, %c0_84, %c0_85] : memref<7x1x128xf32, #tpu.memory_space<vmem>>, vector<1x1x128xf32>
    %185 = vector.shape_cast %184 : vector<1x1x128xf32> to vector<1x128xf32>
    %c1_i32_86 = arith.constant 1 : i32
    %186 = tpu.dynamic_rotate %183 by %c1_i32_86 dim 0 : vector<96x128xf32>, i32 -> vector<96x128xf32>
    %cst_87 = arith.constant 0.000000e+00 : f32
    %187 = vector.broadcast %cst_87 : f32 to vector<96x128xf32>
    %188 = arith.select %77, %186, %187 : vector<96x128xi1>, vector<96x128xf32>
    %c95_i32_88 = arith.constant 95 : i32
    %189 = tpu.dynamic_rotate %183 by %c95_i32_88 dim 0 : vector<96x128xf32>, i32 -> vector<96x128xf32>
    %cst_89 = arith.constant 0.000000e+00 : f32
    %190 = vector.broadcast %cst_89 : f32 to vector<96x128xf32>
    %191 = arith.select %86, %189, %190 : vector<96x128xi1>, vector<96x128xf32>
    %192 = tpu.concatenate %188, %183, %191 in 1 : vector<96x128xf32>, vector<96x128xf32>, vector<96x128xf32> -> vector<96x384xf32>
    %c1312 = arith.constant 1312 : index
    %c0_90 = arith.constant 0 : index
    %193 = vector.load %arg5[%c1312, %c0_90] : memref<2720x128xf32, #tpu.memory_space<vmem>>, vector<384x128xf32>
    %cst_91 = arith.constant dense<0.000000e+00> : vector<96x128xf32>
    %194 = tpu.matmul %192, %193, %cst_91 {dimension_numbers = #tpu.dot_dimension_numbers<[1], [0], [0], [1], [0, 0, 1, 1], [], []>} : vector<96x384xf32>, vector<384x128xf32>, vector<96x128xf32> -> vector<96x128xf32>
    %195 = vector.broadcast %185 : vector<1x128xf32> to vector<96x128xf32>
    %196 = arith.addf %194, %195 : vector<96x128xf32>
    %197 = arith.addf %196, %160 : vector<96x128xf32>
    %cst_92 = arith.constant 0.000000e+00 : f32
    %198 = vector.broadcast %cst_92 : f32 to vector<96x128xf32>
    %199 = arith.cmpf ogt, %197, %198 : vector<96x128xf32>
    %cst_93 = arith.constant 0.00999999977 : f32
    %200 = vector.broadcast %cst_93 : f32 to vector<96x128xf32>
    %201 = arith.mulf %200, %197 : vector<96x128xf32>
    %202 = arith.select %199, %197, %201 : vector<96x128xi1>, vector<96x128xf32>
    %c5 = arith.constant 5 : index
    %c0_94 = arith.constant 0 : index
    %c0_95 = arith.constant 0 : index
    %203 = vector.load %arg6[%c5, %c0_94, %c0_95] : memref<7x1x128xf32, #tpu.memory_space<vmem>>, vector<1x1x128xf32>
    %204 = vector.shape_cast %203 : vector<1x1x128xf32> to vector<1x128xf32>
    %c3_i32_96 = arith.constant 3 : i32
    %205 = tpu.dynamic_rotate %202 by %c3_i32_96 dim 0 : vector<96x128xf32>, i32 -> vector<96x128xf32>
    %cst_97 = arith.constant 0.000000e+00 : f32
    %206 = vector.broadcast %cst_97 : f32 to vector<96x128xf32>
    %207 = arith.select %59, %205, %206 : vector<96x128xi1>, vector<96x128xf32>
    %c2_i32_98 = arith.constant 2 : i32
    %208 = tpu.dynamic_rotate %202 by %c2_i32_98 dim 0 : vector<96x128xf32>, i32 -> vector<96x128xf32>
    %cst_99 = arith.constant 0.000000e+00 : f32
    %209 = vector.broadcast %cst_99 : f32 to vector<96x128xf32>
    %210 = arith.select %68, %208, %209 : vector<96x128xi1>, vector<96x128xf32>
    %c94_i32_100 = arith.constant 94 : i32
    %211 = tpu.dynamic_rotate %202 by %c94_i32_100 dim 0 : vector<96x128xf32>, i32 -> vector<96x128xf32>
    %cst_101 = arith.constant 0.000000e+00 : f32
    %212 = vector.broadcast %cst_101 : f32 to vector<96x128xf32>
    %213 = arith.select %95, %211, %212 : vector<96x128xi1>, vector<96x128xf32>
    %c93_i32 = arith.constant 93 : i32
    %214 = tpu.dynamic_rotate %202 by %c93_i32 dim 0 : vector<96x128xf32>, i32 -> vector<96x128xf32>
    %cst_102 = arith.constant 0.000000e+00 : f32
    %215 = vector.broadcast %cst_102 : f32 to vector<96x128xf32>
    %216 = arith.select %104, %214, %215 : vector<96x128xi1>, vector<96x128xf32>
    %217 = tpu.concatenate %207, %210, %202, %213, %216 in 1 : vector<96x128xf32>, vector<96x128xf32>, vector<96x128xf32>, vector<96x128xf32>, vector<96x128xf32> -> vector<96x640xf32>
    %c1696 = arith.constant 1696 : index
    %c0_103 = arith.constant 0 : index
    %218 = vector.load %arg5[%c1696, %c0_103] : memref<2720x128xf32, #tpu.memory_space<vmem>>, vector<640x128xf32>
    %cst_104 = arith.constant dense<0.000000e+00> : vector<96x128xf32>
    %219 = tpu.matmul %217, %218, %cst_104 {dimension_numbers = #tpu.dot_dimension_numbers<[1], [0], [0], [1], [0, 0, 1, 1], [], []>} : vector<96x640xf32>, vector<640x128xf32>, vector<96x128xf32> -> vector<96x128xf32>
    %220 = vector.broadcast %204 : vector<1x128xf32> to vector<96x128xf32>
    %221 = arith.addf %219, %220 : vector<96x128xf32>
    %cst_105 = arith.constant 0.000000e+00 : f32
    %222 = vector.broadcast %cst_105 : f32 to vector<96x128xf32>
    %223 = arith.cmpf ogt, %221, %222 : vector<96x128xf32>
    %cst_106 = arith.constant 0.00999999977 : f32
    %224 = vector.broadcast %cst_106 : f32 to vector<96x128xf32>
    %225 = arith.mulf %224, %221 : vector<96x128xf32>
    %226 = arith.select %223, %221, %225 : vector<96x128xi1>, vector<96x128xf32>
    %c6 = arith.constant 6 : index
    %c0_107 = arith.constant 0 : index
    %c0_108 = arith.constant 0 : index
    %227 = vector.load %arg6[%c6, %c0_107, %c0_108] : memref<7x1x128xf32, #tpu.memory_space<vmem>>, vector<1x1x128xf32>
    %228 = vector.shape_cast %227 : vector<1x1x128xf32> to vector<1x128xf32>
    %c1_i32_109 = arith.constant 1 : i32
    %229 = tpu.dynamic_rotate %226 by %c1_i32_109 dim 0 : vector<96x128xf32>, i32 -> vector<96x128xf32>
    %cst_110 = arith.constant 0.000000e+00 : f32
    %230 = vector.broadcast %cst_110 : f32 to vector<96x128xf32>
    %231 = arith.select %77, %229, %230 : vector<96x128xi1>, vector<96x128xf32>
    %c95_i32_111 = arith.constant 95 : i32
    %232 = tpu.dynamic_rotate %226 by %c95_i32_111 dim 0 : vector<96x128xf32>, i32 -> vector<96x128xf32>
    %cst_112 = arith.constant 0.000000e+00 : f32
    %233 = vector.broadcast %cst_112 : f32 to vector<96x128xf32>
    %234 = arith.select %86, %232, %233 : vector<96x128xi1>, vector<96x128xf32>
    %235 = tpu.concatenate %231, %226, %234 in 1 : vector<96x128xf32>, vector<96x128xf32>, vector<96x128xf32> -> vector<96x384xf32>
    %c2336 = arith.constant 2336 : index
    %c0_113 = arith.constant 0 : index
    %236 = vector.load %arg5[%c2336, %c0_113] : memref<2720x128xf32, #tpu.memory_space<vmem>>, vector<384x128xf32>
    %cst_114 = arith.constant dense<0.000000e+00> : vector<96x128xf32>
    %237 = tpu.matmul %235, %236, %cst_114 {dimension_numbers = #tpu.dot_dimension_numbers<[1], [0], [0], [1], [0, 0, 1, 1], [], []>} : vector<96x384xf32>, vector<384x128xf32>, vector<96x128xf32> -> vector<96x128xf32>
    %238 = vector.broadcast %228 : vector<1x128xf32> to vector<96x128xf32>
    %239 = arith.addf %237, %238 : vector<96x128xf32>
    %240 = arith.addf %239, %197 : vector<96x128xf32>
    %241 = vector.extract_strided_slice %240 {offsets = [16, 0], sizes = [64, 128], strides = [1, 1]} : vector<96x128xf32> to vector<64x128xf32>
    %cst_115 = arith.constant 0.000000e+00 : f32
    %242 = vector.broadcast %cst_115 : f32 to vector<64x128xf32>
    %243 = arith.cmpf ogt, %241, %242 : vector<64x128xf32>
    %cst_116 = arith.constant 0.00999999977 : f32
    %244 = vector.broadcast %cst_116 : f32 to vector<64x128xf32>
    %245 = arith.mulf %244, %241 : vector<64x128xf32>
    %246 = arith.select %243, %241, %245 : vector<64x128xi1>, vector<64x128xf32>
    %c0_117 = arith.constant 0 : index
    %c0_118 = arith.constant 0 : index
    %c0_119 = arith.constant 0 : index
    %247 = vector.load %arg7[%c0_117, %c0_118, %c0_119] : memref<1x64x128xf32, #tpu.memory_space<vmem>>, vector<1x64x128xf32>
    %248 = vector.shape_cast %247 : vector<1x64x128xf32> to vector<64x128xf32>
    %249 = vector.shape_cast %246 : vector<64x128xf32> to vector<1x64x128xf32>
    tpu.vector_store %arg7[%c0_117, %c0_118, %c0_119], %249 {strides = array<i32>} : memref<1x64x128xf32, #tpu.memory_space<vmem>>, vector<1x64x128xf32>,
    return
  }
  func.func @transform_0(%arg0: i32, %arg1: i32) -> (i32, i32, i32) {
    %c4_i32 = arith.constant 4 : i32
    %0 = arith.muli %arg1, %c4_i32 : i32
    %c1_i32 = arith.constant 1 : i32
    %1 = arith.subi %0, %c1_i32 : i32
    %c0_i32 = arith.constant 0 : i32
    %2 = arith.maxsi %1, %c0_i32 : i32
    %c0_i32_0 = arith.constant 0 : i32
    %c0_i32_1 = arith.constant 0 : i32
    return %arg0, %2, %c0_i32_0 : i32, i32, i32
  }
  func.func @transform_1(%arg0: i32, %arg1: i32) -> (i32, i32, i32) {
    %c0_i32 = arith.constant 0 : i32
    %c0_i32_0 = arith.constant 0 : i32
    return %arg0, %arg1, %c0_i32 : i32, i32, i32
  }
  func.func @transform_2(%arg0: i32, %arg1: i32) -> (i32, i32, i32) {
    %c1_i32 = arith.constant 1 : i32
    %0 = arith.addi %arg1, %c1_i32 : i32
    %c4_i32 = arith.constant 4 : i32
    %1 = arith.muli %0, %c4_i32 : i32
    %c3_i32 = arith.constant 3 : i32
    %2 = arith.minsi %1, %c3_i32 : i32
    %c0_i32 = arith.constant 0 : i32
    %c0_i32_0 = arith.constant 0 : i32
    return %arg0, %2, %c0_i32 : i32, i32, i32
  }
  func.func @transform_3(%arg0: i32, %arg1: i32) -> (i32, i32) {
    %c0_i32 = arith.constant 0 : i32
    %c0_i32_0 = arith.constant 0 : i32
    %c0_i32_1 = arith.constant 0 : i32
    return %c0_i32, %c0_i32_0 : i32, i32
  }
  func.func @transform_4(%arg0: i32, %arg1: i32) -> (i32, i32, i32) {
    %c0_i32 = arith.constant 0 : i32
    %c0_i32_0 = arith.constant 0 : i32
    %c0_i32_1 = arith.constant 0 : i32
    %c0_i32_2 = arith.constant 0 : i32
    return %c0_i32, %c0_i32_0, %c0_i32_1 : i32, i32, i32
  }
  func.func @transform_5(%arg0: i32, %arg1: i32) -> (i32, i32, i32) {
    %c0_i32 = arith.constant 0 : i32
    %c0_i32_0 = arith.constant 0 : i32
    return %arg0, %arg1, %c0_i32 : i32, i32, i32
  }
}

</mosaic_0001>

<bundles_post_ra>
// kernel: tpu_custom_call.1
= control target key start
LH: loop header
LB: loop body
LE: loop exit
PB: predicated region body
PF: predicated region fallthrough
CT: control target
= control target key end

     0   :  { %10 = vsyncpa [#allocation3], 0  ;;  %s7490_s0 = inlined_call_operand.vmem [shape: f32[2,64,32], index: 0, kind: input, shape index: {}]   ;;  %s7491_s1 = inlined_call_operand.vmem [shape: f32[2,64,32], index: 1, kind: input, shape index: {}]   ;;  %s7492_s2 = inlined_call_operand.vmem [shape: f32[2,64,32], index: 2, kind: input, shape index: {}]   ;;  %s7493_s3 = inlined_call_operand.hbm [shape: f32[2720,128], index: 3, kind: input, shape index: {}]   ;;  %s7494_s4 = inlined_call_operand.hbm [shape: f32[7,1,128], index: 4, kind: input, shape index: {}]   ;;  %s7495_s5 = inlined_call_operand.hbm [shape: f32[2,64,128], index: 5, kind: output, shape index: {}]  }
   0x1   :  { %11 = vsyncpa [#allocation6], 0 }
   0x2   :  { %12 = vsyncpa [#allocation4], 0 }
   0x3   :  { %14 = vsyncpa [#allocation4 + $0x1], 0  ;;  %s5989_s18 = smov 0   ;;  %s5991_s19 = smov 0  }
   0x4   :  { %s5993_s20 = smov 0   ;;  %s5995_s21 = smov 0  }
   0x5   :  { %s5997_s22 = smov 0   ;;  %s5999_s23 = smov 0  }
   0x6 LB: > { %s4183_s24 = sadd.s32 4294967295, %s5943_s23   ;;  %s4184_s25 = sadd.s32 4294967294, %s5943_s23   ;;  %s5943_s23 = sphi %s5999_s23, %s20_s23   ;;  %s5939_s22 = sphi %s5997_s22, %s7550_s22   ;;  %s5935_s21 = sphi %s5995_s21, %s7549_s21   ;;  %s5931_s20 = sphi %s5993_s20, %s7548_s20   ;;  %s5927_s19 = sphi %s5991_s19, %s7547_s19   ;;  %s5923_s18 = sphi %s5989_s18, %s7546_s18  }
   0x7   : > { %s32_s26 = sadd.s32 1, %s5939_s22  ;;  %s183_s27 = sadd.s32 1, %s5931_s20 }
   0x8   : > { %p34_p0 = scmp.ge.s32.totalorder %s32_s26, 2  ;;  %p193_p1 = scmp.ne.s32.totalorder %s5931_s20, %s5927_s19 }
   0x9   : > { %p194_p2 = scmp.eq.s32.totalorder %s4183_s24, 1  ;;  %p199_p3 = scmp.ne.s32.totalorder %s5927_s19, %s5923_s18 }
   0xa   : > { %s7552_s26 = smov (%p34_p0, %s32_s26), 0  ;;  %p200_p5 = scmp.eq.s32.totalorder %s4184_s25, 1 }
   0xb   : > { %7511 = sst [smem:[#allocation11_spill]] %s7552_s26  ;;  %p6029_p4 = por %p194_p2, %p193_p1 }
   0xc   : > { %s178_s29 = ssub.s32 %s5939_s22, %s7552_s26  ;;  %p4185_p6 = scmp.ge.s32.totalorder %s5943_s23, 1 }
   0xd   : > { %s7512_s28 = scalar_select %p6029_p4, 1, 0 }
   0xe   : > { %p181_p7 = scmp.eq.s32.totalorder %s178_s29, 0  ;;  %p6036_p8 = por %p200_p5, %p199_p3 }
   0xf   : > { %p207_p9 = scmp.lt.s32.totalorder %s5943_s23, 3  ;;  %p6048_p11 = scmp.eq.s32.totalorder %s4183_s24, 0 }
  0x10   : > { %s7513_s30 = scalar_select %p6036_p8, 1, 0 }
  0x11   : > { %s6042_s6 = scalar_select %p181_p7, %s5931_s20, %s183_s27  }
  0x12   : > { %p6044_p10 = pnand %p4185_p6, %p207_p9  ;;  %s5945_s9 = smov [#allocation2]  }
  0x13   : > { %s7515_s8 = scalar_select %p6048_p11, 1, 0 }
  0x14   : > { %s7514_s7 = scalar_select %p6044_p10, 1, 0 }
  0x15   : > { %p5654_p12 = pneg %p6044_p10  ;;  %s219_s10 = sshll.u32 %s5945_s9, 4  ;;  %s220_s10 = int_to_ptr.vmem [resolvable:$true] %s219_s10 }
  0x16   : > { %s5946_s12 = smov [#allocation5]   ;;  %s5801_s16 = scalar_lea.hbm %s7493_s3, 43520 }
  0x17   : > { %p6056_p13 = pnand %p6048_p11, %p5654_p12  ;;  %s232_s13 = sshll.u32 %s5946_s12, 4  ;;  %s6060_s13 = int_to_ptr.vmem [resolvable:$true] %s232_s13 }
  0x18   : > { %p5802_p0 = scmp.ne.s32.totalorder %s7493_s3, %s5801_s16  ;;  %p5808_p5 = scmp.lt.u32.totalorder %s5801_s16, %s7493_s3 }
  0x19   : > { %p5803_p1 = pneg %p6056_p13 }
  0x1b   : > { %p5804_p2 = pnand %p5803_p1, %p5802_p0 }
  0x1d   : > { %p5805_p3 = pneg %p5804_p2 }
  0x1f   : > { %p5810_p6 = pnand %p5808_p5, %p5805_p3 }
  0x21   : > { %5813 = shalt.err (!%p5810_p6)
}
  0x22   : > { %s5814_s29 = scalar_lea.vmem %s220_s10, 43520  ;;  %p5822_p8 = scmp.lt.s32.totalorder %s220_s10, %s220_s10 }
  0x23   : > { %p5815_p7 = scmp.ne.s32.totalorder %s220_s10, %s5814_s29  ;;  %p5823_p4 = scmp.lt.s32.totalorder %s5814_s29, %s5814_s29 }
  0x25   : > { %p5817_p9 = pnand %p5815_p7, %p5803_p1  ;;  %p5824_p11 = por %p5823_p4, %p5822_p8 }
  0x27   : > { %p5818_p12 = pneg %p5817_p9 }
  0x29   : > { %p5825_p10 = pnand %p5824_p11, %p5818_p12 }
  0x2b   : > { %5828 = shalt.err (!%p5825_p10)
}
  0x2c   : > { %s5947_s9 = smov 128   ;;  %s5948_s12 = smov 8  }
  0x2d   : > { %5657 = dma.hbm_to_vmem [thread:$0]  (!%p6056_p13), %s7493_s3, 43520, %s220_s10, [#allocation3], %s5947_s9, %s5947_s9, %s5948_s12  }
  0x2e   : > { %s5829_s24 = scalar_lea.hbm %s7494_s4, 112 }
  0x2f   : > { %p5830_p0 = scmp.ne.s32.totalorder %s7494_s4, %s5829_s24  ;;  %p5836_p10 = scmp.lt.u32.totalorder %s5829_s24, %s7494_s4 }
  0x31   : > { %p5832_p4 = pnand %p5830_p0, %p5803_p1 }
  0x33   : > { %p5833_p8 = pneg %p5832_p4 }
  0x35   : > { %p5838_p11 = pnand %p5836_p10, %p5833_p8 }
  0x37   : > { %5841 = shalt.err (!%p5838_p11)
}
  0x38   : > { %s5842_s10 = scalar_lea.vmem %s6060_s13, 112  ;;  %s5849_s9 = scalar_lea.vmem %s6060_s13, 128 }
  0x39   : > { %p5843_p2 = scmp.ne.s32.totalorder %s6060_s13, %s5842_s10  ;;  %p5850_p6 = scmp.lt.s32.totalorder %s6060_s13, %s6060_s13 }
  0x3a   : > { %p5851_p7 = scmp.lt.s32.totalorder %s5849_s9, %s5842_s10 }
  0x3b   : > { %p5845_p3 = pnand %p5843_p2, %p5803_p1 }
  0x3c   : > { %p5852_p9 = por %p5851_p7, %p5850_p6 }
  0x3d   : > { %p5846_p5 = pneg %p5845_p3 }
  0x3f   : > { %p5853_p12 = pnand %p5852_p9, %p5846_p5 }
  0x41   : > { %5856 = shalt.err (!%p5853_p12)
}
  0x42   : > { %s5949_s26 = smov 16   ;;  %s5950_s12 = smov 1  }
  0x43   : > { %5660 = dma.hbm_to_vmem [thread:$0]  (!%p6056_p13), %s7494_s4, 112, %s6060_s13, [#allocation6], %s5949_s26, %s5949_s26, %s5950_s12  }
  0x44   : > { %p7517_p0 = scmp.ne.s32.totalorder %s7514_s7, 0 }
  0x46   : > { %303 = sbr.rel (%p7517_p0) target bundleno = 1931 (0x78b), region = 40 }
  0x4d   : > { %p7518_p1 = scmp.ne.s32.totalorder %s7515_s8, 0 }
  0x4f   : > { %5910 = dma.done.wait (%p7518_p1), [#allocation3], 43520  }
  0x50   : > { %5912 = vsyncadd (%p7518_p1), [#allocation3], 4294923776 }
  0x51   : > { %5914 = dma.done.wait (%p7518_p1), [#allocation6], 112  }
  0x52   : > { %5916 = vsyncadd (%p7518_p1), [#allocation6], 4294967184  ;;  %p370_p4 = scmp.lt.s32.totalorder %s5935_s21, 1  ;;  %v426_v0 = vlaneseq  ;;  %v5951_v1 = vmov 0.0|0.0   ;;  %v7501_v2 = vmov 0.0   ;;  %s5953_s11 = smov 32  }
  0x53   : > { %5198 = vmatprep.subr.bf16.mxu0 %v5951_v1  ;;  %1198 = vmatprep.mubr.f32.mxu0 %v7501_v2  ;;  %s5954_s29 = smov 64   ;;  %s5955_s10 = smov 96   ;;  %v1072_v58 = vld [vmem:[#allocation2] sm:$0xff]  ;;  %v1073_v59 = vld [vmem:[#allocation2 + $0x8] sm:$0xff]  ;;  %vm1033_vm8 = vcmask 261120   ;;  %vm1046_vm9 = vcmask 523264  }
  0x54   : > { %s371_s7 = scalar_select %p370_p4, %s5935_s21, 1  ;;  %v6124_v3 = vshrl.u32 %v426_v0, 7  ;;  %5732 = vrot.lane.b32.xlu0 %v7501_v2, %s5953_s11  ;;  %vm1059_vm11 = vcmask 785408  }
  0x55   : > { %s362_s15 = sand.u32 1, %s5927_s19   ;;  %p7543_p8 = scmp.ne.s32.totalorder %s7512_s28, 0 }
  0x56   : > { %s6128_s13 = sshll.u32 %s371_s7, 6  ;;  %v428_v4 = vadd.s32 8, %v6124_v3  ;;  %v429_v5 = vadd.s32 16, %v6124_v3  ;;  %vm790_vm0 = vcmp.lt.s32.totalorder %v6124_v3, 1  ;;  %vm827_vm1 = vcmp.lt.s32.totalorder %v6124_v3, 7  ;;  %s4192_s7 = sshll.u32 %s362_s15, 6 }
  0x57   : > { %s377_s17 = scalar_lea.vmem %s7490_s0, %s6128_s13  ;;  %s6140_s27 = scalar_lea.vmem %s7491_s1, %s6128_s13  ;;  %v437_v39 = vadd.s32 80, %v6124_v3  ;;  %v436_v48 = vadd.s32 72, %v6124_v3  ;;  %vm864_vm4 = vcmp.lt.s32.totalorder %v6124_v3, 6  ;;  %vm753_vm5 = vcmp.lt.s32.totalorder %v6124_v3, 2 }
  0x58   : > { %v6142_v6 = vadd.s32 4294967280, %v428_v4  ;;  %v6144_v7 = vadd.s32 4294967280, %v429_v5  ;;  %v414_v8 = vld [vmem:[%s377_s17] sm:$0xff]  ;;  %v6146_v9 = vld [vmem:[%s377_s17 + $0x8] sm:$0xff]  ;;  %v6168_v19 = vld [vmem:[%s6140_s27 + $0x10] sm:$0xff]  ;;  %s4251_s9 = sadd.s32 48, %s6128_s13 }
  0x59   : > { %v6149_v10 = vld [vmem:[%s6140_s27] sm:$0xff]  ;;  %v5736_v11 = vpack.i.bf16 %v6146_v9, %v414_v8  ;;  %v816_v13 = vrot.slane %v6146_v9, 1  ;;  %v6159_v14 = vld [vmem:[%s6140_s27 + $0x8] sm:$0xff]  ;;  %v779_v17 = vrot.slane %v6146_v9, 7  ;;  %v6182_v25 = vld [vmem:[%s6140_s27 + $0x18] sm:$0xff]  ;;  %v819_v29 = vrot.slane %v6168_v19, 1  ;;  %s6230_s14 = scalar_lea.vmem %s7492_s2, %s4251_s9 }
  0x5a   : > { %7519 = vst [vmem:[#allocation12_spill] sm:$0xff] %v6142_v6  ;;  %7520 = vst [vmem:[#allocation13_spill] sm:$0xff] %v6144_v7  ;;  %v6154_v12 = vadd.s32 1, %v6142_v6  ;;  %v817_v15 = vrot.slane %v6149_v10, 1  ;;  %v6163_v16 = vadd.s32 4294967295, %v6144_v7  ;;  %v780_v18 = vrot.slane %v6149_v10, 7 }
  0x5b   : > { %5737 = vrot.lane.b32.xlu0 %v5736_v11, %s5954_s29  ;;  %v781_v20 = vrot.slane %v6159_v14, 7  ;;  %v5741_v21 = vpack.i.bf16 %v6159_v14, %v6149_v10  ;;  %v818_v24 = vrot.slane %v6159_v14, 1  ;;  %v6192_v30 = vld [vmem:[%s6140_s27 + $0x20] sm:$0xff]  ;;  %v782_v32 = vrot.slane %v6168_v19, 7  ;;  %v6204_v38 = vld [vmem:[%s6140_s27 + $0x28] sm:$0xff]  ;;  %v6217_v44 = vld [vmem:[%s6140_s27 + $0x30] sm:$0xff] }
  0x5c   : > { %vm561_vm2 = vcmp.ge.s32.totalorder %v6154_v12, 0  ;;  %v837_v22 = vsel %vm827_vm1, %v816_v13, %v817_v15  ;;  %vm514_vm3 = vcmp.ge.s32.totalorder %v6163_v16, 0  ;;  %v800_v23 = vsel %vm790_vm0, %v779_v17, %v780_v18  ;;  %v6222_v47 = vld [vmem:[%s6140_s27 + $0x38] sm:$0xff]  ;;  %v6246_v62 = vld [vmem:[%s6230_s14] sm:$0xff]  ;;  %v1074_v8 = vld [vmem:[#allocation2 + $0x10] sm:$0xff]  ;;  %s4252_s13 = sshll.u32 %s5935_s21, 10 }
  0x5d   : > { %v841_v26 = vsel %vm561_vm2, %v837_v22, 0.0  ;;  %v799_v27 = vsel %vm790_vm0, %v780_v18, %v781_v20  ;;  %v805_v28 = vsel %vm514_vm3, %v800_v23, 0.0  ;;  %v783_v33 = vrot.slane %v6182_v25, 7  ;;  %v1075_v11 = vld [vmem:[#allocation2 + $0x18] sm:$0xff]  ;;  %s7437_s24 = scalar_lea.hbm %s7495_s5, %s4252_s13  ;;  %s7444_s21 = scalar_lea.sflag [#allocation4], %s362_s15 }
  0x5e   : > { %v5746_v31 = vpack.i.bf16 %v841_v26, %v7501_v2  ;;  %v820_v34 = vrot.slane %v6182_v25, 1  ;;  %v5751_v35 = vpack.i.bf16 %v799_v27, %v805_v28  ;;  %v798_v36 = vsel %vm790_vm0, %v781_v20, %v782_v32  ;;  %s5956_s27 = smov [#allocation7]  }
  0x5f   : > { %5742 = vrot.lane.b32.xlu0 %v5741_v21, %s5954_s29  ;;  %v821_v37 = vrot.slane %v6192_v30, 1  ;;  %v835_v40 = vsel %vm827_vm1, %v818_v24, %v819_v29  ;;  %v836_v41 = vsel %vm827_vm1, %v817_v15, %v818_v24  ;;  %v797_v42 = vsel %vm790_vm0, %v782_v32, %v783_v33  ;;  %v1076_v32 = vld [vmem:[#allocation2 + $0x20] sm:$0xff] }
  0x60   : > { %5747 = vrot.lane.b32.xlu1 %v5746_v31, %s5955_s10  ;;  %v834_v43 = vsel %vm827_vm1, %v819_v29, %v820_v34  ;;  %v5761_v45 = vpack.i.bf16 %v797_v42, %v798_v36  ;;  %v784_v49 = vrot.slane %v6192_v30, 7  ;;  %v785_v50 = vrot.slane %v6204_v38, 7  ;;  %v1078_v36 = vld [vmem:[#allocation2 + $0x30] sm:$0xff] }
  0x61   : > { %v833_v46 = vsel %vm827_vm1, %v820_v34, %v821_v37  ;;  %v5756_v51 = vpack.i.bf16 %v835_v40, %v836_v41  ;;  %v822_v53 = vrot.slane %v6204_v38, 1  ;;  %v823_v54 = vrot.slane %v6217_v44, 1 }
  0x62   : > { %v5771_v52 = vpack.i.bf16 %v833_v46, %v834_v43  ;;  %v786_v55 = vrot.slane %v6217_v44, 7  ;;  %v787_v56 = vrot.slane %v6222_v47, 7  ;;  %v6238_v57 = vadd.s32 4294967280, %v437_v39 }
  0x63   : > { %5762 = vrot.lane.b32.xlu0 %v5761_v45, %s5953_s11  ;;  %v5766_v60 = vpack.i.bf16 %v6182_v25, %v6168_v19  ;;  %v6242_v61 = vadd.s32 4294967280, %v436_v48  ;;  %v795_v63 = vsel %vm790_vm0, %v784_v49, %v785_v50  ;;  %v796_v0 = vsel %vm790_vm0, %v783_v33, %v784_v49  ;;  %v1077_v33 = vld [vmem:[#allocation2 + $0x28] sm:$0xff] }
  0x64   : > { %5752 = vrot.lane.b32.xlu1 %v5751_v35, %s5953_s11  ;;  %7521 = vst [vmem:[#allocation14_spill] sm:$0xff] %v6238_v57  ;;  %v5781_v4 = vpack.i.bf16 %v6204_v38, %v6192_v30  ;;  %v824_v5 = vrot.slane %v6222_v47, 1  ;;  %v6259_v13 = vsel %vm827_vm1, %v822_v53, %v823_v54  ;;  %v6263_v15 = vsel %vm827_vm1, %v821_v37, %v822_v53  ;;  %v1079_v37 = vld [vmem:[#allocation2 + $0x38] sm:$0xff] }
  0x65   : > { %7522 = vst [vmem:[#allocation15_spill] sm:$0xff] %v6242_v61  ;;  %v5199_v17 = vpack.c.bf16 %v1073_v59, %v1072_v58  ;;  %v742_v18 = vrot.slane %v6146_v9, 6  ;;  %v793_v20 = vsel %vm790_vm0, %v786_v55, %v787_v56  ;;  %v794_v21 = vsel %vm790_vm0, %v785_v50, %v786_v55 }
  0x66   : > { %v6272_v22 = vadd.s32 4294967295, %v6238_v57  ;;  %v5776_v23 = vpack.i.bf16 %v795_v63, %v796_v0  ;;  %v6275_v24 = vadd.s32 1, %v6242_v61  ;;  %v825_v26 = vrot.slane %v6246_v62, 1 }
  0x67   : > { %5772 = vrot.lane.b32.xlu0 %v5771_v52, %s5955_s10  ;;  %5200 = vmatpush1.bf16.msra.mxu0 %v5199_v17  ;;  %v5202_v27 = vpack.c.bf16 %v1075_v11, %v1074_v8  ;;  %v5786_v28 = vpack.i.bf16 %v6259_v13, %v6263_v15  ;;  %v830_v29 = vsel %vm827_vm1, %v823_v54, %v824_v5  ;;  %v788_v31 = vrot.slane %v6246_v62, 7 }
  0x68   : > { %5757 = vrot.lane.b32.xlu1 %v5756_v51, %s5955_s10  ;;  %5201 = vmatprep.subr.bf16.mxu0 %v5951_v1  ;;  %v853_v34 = vrot.slane %v6146_v9, 2  ;;  %v5791_v35 = vpack.i.bf16 %v793_v20, %v794_v21  ;;  %v854_v39 = vrot.slane %v6149_v10, 2  ;;  %v855_v40 = vrot.slane %v6159_v14, 2 }
  0x69   : > { %v743_v41 = vrot.slane %v6149_v10, 6  ;;  %vm534_vm6 = vcmp.lt.s32.totalorder %v6272_v22, 64  ;;  %v856_v42 = vrot.slane %v6168_v19, 2  ;;  %v744_v43 = vrot.slane %v6159_v14, 6 }
  0x6a   : > { %v857_v9 = vrot.slane %v6182_v25, 2  ;;  %v5205_v45 = vpack.c.bf16 %v1077_v33, %v1076_v32  ;;  %v6298_v46 = vsel %vm864_vm4, %v853_v34, %v854_v39  ;;  %v6302_v48 = vsel %vm864_vm4, %v854_v39, %v855_v40  ;;  %v1083_v32 = vld [vmem:[#allocation2 + $0x58] sm:$0xff] }
  0x6b   : > { %5782 = vrot.lane.b32.xlu0 %v5781_v4, %s5954_s29  ;;  %5203 = vmatpush1.bf16.msra.mxu0 %v5202_v27  ;;  %v6306_v10 = vsel %vm753_vm5, %v742_v18, %v743_v41  ;;  %v792_v49 = vsel %vm790_vm0, %v787_v56, %v788_v31  ;;  %v5208_v14 = vpack.c.bf16 %v1079_v37, %v1078_v36  ;;  %v745_v53 = vrot.slane %v6168_v19, 6  ;;  %v1081_v4 = vld [vmem:[#allocation2 + $0x48] sm:$0xff] }
  0x6c   : > { %5767 = vrot.lane.b32.xlu1 %v5766_v60, %s5954_s29  ;;  %5204 = vmatprep.subr.bf16.mxu0 %v5951_v1  ;;  %v6313_v50 = vsel %vm864_vm4, %v855_v40, %v856_v42  ;;  %v6317_v51 = vsel %vm753_vm5, %v743_v41, %v744_v43  ;;  %v6323_v52 = vsel %vm864_vm4, %v856_v42, %v857_v9  ;;  %v858_v54 = vrot.slane %v6192_v30, 2  ;;  %v1085_v36 = vld [vmem:[#allocation2 + $0x68] sm:$0xff]  ;;  %v1086_v40 = vld [vmem:[#allocation2 + $0x70] sm:$0xff]  ;;  %v1087_v41 = vld [vmem:[#allocation2 + $0x78] sm:$0xff] }
  0x6d   : > { %v746_v55 = vrot.slane %v6182_v25, 6  ;;  %v859_v56 = vrot.slane %v6204_v38, 2  ;;  %v747_v58 = vrot.slane %v6192_v30, 6  ;;  %v860_v59 = vrot.slane %v6217_v44, 2  ;;  %v1080_v30 = vld [vmem:[#allocation2 + $0x40] sm:$0xff]  ;;  %v425_v37 = vld [vmem:[%s6230_s14 + $0x8] sm:$0xff] }
  0x6e   : > { %v748_v60 = vrot.slane %v6204_v38, 6  ;;  %v6334_v63 = vsel %vm753_vm5, %v744_v43, %v745_v53  ;;  %v6338_v19 = vsel %vm864_vm4, %v857_v9, %v858_v54  ;;  %v861_v0 = vrot.slane %v6222_v47, 2  ;;  %v1088_v42 = vld [vmem:[#allocation2 + $0x80] sm:$0xff]  ;;  %v1089_v43 = vld [vmem:[#allocation2 + $0x88] sm:$0xff] }
  0x6f   : > { %5792 = vrot.lane.b32.xlu0 %v5791_v35, %s5953_s11  ;;  %5206 = vmatpush1.bf16.msra.mxu0 %v5205_v45  ;;  %v6342_v25 = vsel %vm753_vm5, %v745_v53, %v746_v55  ;;  %v6348_v38 = vsel %vm864_vm4, %v858_v54, %v859_v56  ;;  %v6352_v8 = vsel %vm753_vm5, %v746_v55, %v747_v58  ;;  %v750_v18 = vrot.slane %v6222_v47, 6  ;;  %v1084_v35 = vld [vmem:[#allocation2 + $0x60] sm:$0xff]  ;;  %v1370_v54 = vld [vmem:[#allocation2 + $0xa8] sm:$0xff]  ;;  %v1387_v55 = vld [vmem:[#allocation2 + $0x130] sm:$0xff] }
  0x70   : > { %5777 = vrot.lane.b32.xlu1 %v5776_v23, %s5953_s11  ;;  %5207 = vmatprep.subr.bf16.mxu0 %v5951_v1  ;;  %v6356_v11 = vsel %vm864_vm4, %v859_v56, %v860_v59  ;;  %v6360_v13 = vsel %vm753_vm5, %v747_v58, %v748_v60  ;;  %v5796_v15 = vpack.i.bf16 %v6222_v47, %v6217_v44  ;;  %v751_v20 = vrot.slane %v6246_v62, 6  ;;  %v1385_v45 = vld [vmem:[#allocation2 + $0x120] sm:$0xff]  ;;  %v1388_v56 = vld [vmem:[#allocation2 + $0x138] sm:$0xff] }
  0x71   : > { %v6368_v17 = vsel %vm864_vm4, %v860_v59, %v861_v0  ;;  %v813_v21 = vsel %vm534_vm6, %v792_v49, 0.0  ;;  %v749_v23 = vrot.slane %v6217_v44, 6  ;;  %v862_v27 = vrot.slane %v6246_v62, 2  ;;  %v1082_v44 = vld [vmem:[#allocation2 + $0x50] sm:$0xff]  ;;  %v1386_v49 = vld [vmem:[#allocation2 + $0x128] sm:$0xff] }
  0x72   : > { %vm581_vm7 = vcmp.lt.s32.totalorder %v6275_v24, 64  ;;  %v6385_v31 = vsel %vm753_vm5, %v750_v18, %v751_v20  ;;  %v5214_v34 = vpack.c.bf16 %v1083_v32, %v1082_v44  ;;  %v5217_v39 = vpack.c.bf16 %v1085_v36, %v1084_v35  ;;  %v1371_v59 = vld [vmem:[#allocation2 + $0xb0] sm:$0xff]  ;;  %v1091_v20 = vld [vmem:[#allocation2 + $0x98] sm:$0xff]  ;;  %v1393_v36 = vld [vmem:[#allocation2 + $0x160] sm:$0xff] }
  0x73   : > { %1013 = vrot.lane.b32.xlu0 %v830_v29, %s5955_s10  ;;  %5209 = vmatpush1.bf16.msra.mxu0 %v5208_v14  ;;  %v5211_v29 = vpack.c.bf16 %v1081_v4, %v1080_v30  ;;  %v6390_v33 = vsel %vm753_vm5, %v748_v60, %v749_v23  ;;  %v6394_v47 = vsel %vm864_vm4, %v861_v0, %v862_v27  ;;  %v1369_v14 = vld [vmem:[#allocation2 + $0xa0] sm:$0xff]  ;;  %v1372_v60 = vld [vmem:[#allocation2 + $0xb8] sm:$0xff]  ;;  %v1390_v30 = vld [vmem:[#allocation2 + $0x148] sm:$0xff] }
  0x74   : > { %5787 = vrot.lane.b32.xlu1 %v5786_v28, %s5955_s10  ;;  %v829_v28 = vsel %vm827_vm1, %v824_v5, %v825_v26  ;;  %5210 = vmatprep.subr.bf16.mxu0 %v5951_v1  ;;  %v6400_v5 = vsel %vm753_vm5, %v749_v23, %v750_v18  ;;  %v5220_v9 = vpack.c.bf16 %v1087_v41, %v1086_v40  ;;  %v1389_v0 = vld [vmem:[#allocation2 + $0x140] sm:$0xff]  ;;  %v1374_v27 = vld [vmem:[#allocation2 + $0xc8] sm:$0xff]  ;;  %v1376_v35 = vld [vmem:[#allocation2 + $0xd8] sm:$0xff] }
  0x75   : > { %v849_v26 = vsel %vm581_vm7, %v829_v28, 0.0  ;;  %v5228_v53 = vpack.c.bf16 %v1386_v49, %v1385_v45  ;;  %v5230_v58 = vpack.c.bf16 %v1370_v54, %v1369_v14  ;;  %v5223_v4 = vpack.c.bf16 %v1089_v43, %v1088_v42  ;;  %v1373_v23 = vld [vmem:[#allocation2 + $0xc0] sm:$0xff]  ;;  %v1391_v28 = vld [vmem:[#allocation2 + $0x150] sm:$0xff]  ;;  %v1378_v42 = vld [vmem:[#allocation2 + $0xe8] sm:$0xff] }
  0x76   : > { %v5234_v18 = vpack.c.bf16 %v1372_v60, %v1371_v59  ;;  %v5238_v32 = vpack.c.bf16 %v1374_v27, %v1373_v23  ;;  %v1377_v41 = vld [vmem:[#allocation2 + $0xe0] sm:$0xff]  ;;  %v1395_v43 = vld [vmem:[#allocation2 + $0x170] sm:$0xff]  ;;  %v1380_v14 = vld [vmem:[#allocation2 + $0xf8] sm:$0xff] }
  0x77   : > { %921 = vrot.lane.b32.xlu0 %v813_v21, %s5953_s11  ;;  %5212 = vmatpush1.bf16.msra.mxu0 %v5211_v29  ;;  %v5236_v21 = vpack.c.bf16 %v1390_v30, %v1389_v0  ;;  %v1392_v29 = vld [vmem:[#allocation2 + $0x158] sm:$0xff]  ;;  %v5246_v45 = vpack.c.bf16 %v1378_v42, %v1377_v41 }
  0x78   : > { %5797 = vrot.lane.b32.xlu1 %v5796_v15, %s5954_s29  ;;  %5213 = vmatprep.subr.bf16.mxu0 %v5951_v1  ;;  %v1090_v15 = vld [vmem:[#allocation2 + $0x90] sm:$0xff] }
  0x79   : > { %5229 = vmatprep.subr.bf16.mxu1 %v5228_v53  ;;  %v5226_v44 = vpack.c.bf16 %v1091_v20, %v1090_v15 }
  0x7a   : > { %5231 = vmatpush3.bf16.msra.mxu1 %v5230_v58  ;;  %v6421_v58 = vadd.s32 2, %v6142_v6 }
  0x7b   : > { %1017 = vrot.lane.b32.xlu0 %v7501_v2, %s5955_s10  ;;  %5215 = vmatpush1.bf16.msra.mxu0 %v5214_v34  ;;  %v1375_v34 = vld [vmem:[#allocation2 + $0xd0] sm:$0xff] }
  0x7c   : > { %1015 = vrot.lane.b32.xlu1 %v849_v26, %s5955_s10  ;;  %5216 = vmatprep.subr.bf16.mxu0 %v5951_v1  ;;  %v5240_v26 = vpack.c.bf16 %v1392_v29, %v1391_v28  ;;  %7523 = vst [vmem:[#allocation16_spill] sm:$0xff] %v6421_v58  ;;  %vm609_vm10 = vcmp.ge.s32.totalorder %v6421_v58, 0 }
  0x7f   : > { %971 = vrot.lane.b32.xlu0 %v425_v37, %s5954_s29  ;;  %5218 = vmatpush1.bf16.msra.mxu0 %v5217_v39  ;;  %v1394_v37 = vld [vmem:[#allocation2 + $0x168] sm:$0xff]  ;;  %v5242_v39 = vpack.c.bf16 %v1376_v35, %v1375_v34 }
  0x80   : > { %969 = vrot.lane.b32.xlu1 %v6246_v62, %s5954_s29  ;;  %5219 = vmatprep.subr.bf16.mxu0 %v5951_v1  ;;  %v5232_v62 = vpack.c.bf16 %v1388_v56, %v1387_v55  ;;  %v5244_v40 = vpack.c.bf16 %v1394_v37, %v1393_v36  ;;  %s5861_s29 = sshll.u32 %s5956_s27, 4  ;;  %s5862_s29 = int_to_ptr.vmem [resolvable:$false] %s5861_s29 }
  0x82   : > { %5233 = vmatprep.subr.bf16.mxu1 %v5232_v62  ;;  %v6424_v62 = vadd.s32 4294967294, %v6144_v7 }
  0x83   : > { %5221 = vmatpush1.bf16.msra.mxu0 %v5220_v9  ;;  %5235 = vmatpush3.bf16.msra.mxu1 %v5234_v18  ;;  %v1396_v9 = vld [vmem:[#allocation2 + $0x178] sm:$0xff] }
  0x84   : > { %923 = vrot.lane.b32.xlu1 %v7501_v2, %s5953_s11  ;;  %5222 = vmatprep.subr.bf16.mxu0 %v5951_v1  ;;  %v5248_v49 = vpack.c.bf16 %v1396_v9, %v1395_v43  ;;  %7524 = vst [vmem:[#allocation17_spill] sm:$0xff] %v6424_v62  ;;  %vm466_vm12 = vcmp.ge.s32.totalorder %v6424_v62, 0  ;;  %s7412_s11 = scalar_lea.vmem [#allocation7], %s4192_s7 }
  0x85   : > { %5237 = vmatprep.subr.bf16.mxu1 %v5236_v21  ;;  %v878_v21 = vsel %vm609_vm10, %v6298_v46, 0.0  ;;  %s4046_s8 = sshll.u32 %s7412_s11, 4  ;;  %s7439_s8 = int_to_ptr.vmem [resolvable:$true] %s4046_s8 }
  0x86   : > { %s5857_s25 = scalar_lea.vmem %s7439_s8, 1024  ;;  %p5864_p2 = scmp.lt.s32.totalorder %s7439_s8, %s5862_s29 }
  0x87   : > { %5224 = vmatpush1.bf16.msra.mxu0 %v5223_v4  ;;  %5239 = vmatpush3.bf16.msra.mxu1 %v5238_v32  ;;  %v768_v32 = vsel %vm466_vm12, %v6306_v10, 0.0  ;;  %p5858_p13 = scmp.ne.s32.totalorder %s7439_s8, %s5857_s25 }
  0x88   : > { %1019 = vrot.lane.b32.xlu1 %v7501_v2, %s5955_s10  ;;  %5225 = vmatprep.subr.bf16.mxu0 %v5951_v1  ;;  %v1379_v1 = vld [vmem:[#allocation2 + $0xf0] sm:$0xff]  ;;  %s5863_s10 = scalar_lea.vmem %s5862_s29, 2048 }
  0x89   : > { %5241 = vmatprep.subr.bf16.mxu1 %v5240_v26  ;;  %v5250_v53 = vpack.c.bf16 %v1380_v14, %v1379_v1  ;;  %p5859_p10 = pnand %p5858_p13, %p7543_p8  ;;  %p5865_p3 = scmp.lt.s32.totalorder %s5863_s10, %s5857_s25 }
  0x8b   : > { %5227 = vmatpush1.bf16.msra.mxu0 %v5226_v44  ;;  %5243 = vmatpush3.bf16.msra.mxu1 %v5242_v39  ;;  %p5860_p11 = pneg %p5859_p10  ;;  %p5866_p5 = por %p5865_p3, %p5864_p2 }
  0x8c   : > { %5245 = vmatprep.subr.bf16.mxu1 %v5244_v40 }
  0x8d   : > { %p5867_p6 = pnand %p5866_p5, %p5860_p11 }
  0x8f   : > { %5247 = vmatpush3.bf16.msra.mxu1 %v5246_v45 }
  0x90   : > { %5249 = vmatprep.subr.bf16.mxu1 %v5248_v49 }
  0x93   : > { %5251 = vmatpush3.bf16.msra.mxu1 %v5250_v53 }
  0xc6   : > { %v5733_v54 = vpop.permute.xlu0 %5732 }
  0xc7   : > { %v5734_v55 = vunpack.i.l.bf16 %v5733_v54  ;;  %v5735_v60 = vunpack.i.h.bf16 %v5733_v54 }
  0xc9   : > { %v1034_v0 = vsel %vm1033_vm8, 0.0, %v5734_v55  ;;  %v1035_v23 = vsel %vm1033_vm8, 0.0, %v5735_v60 }
  0xcd   : > { %v5738_v56 = vpop.permute.xlu0 %5737 }
  0xce   : > { %v5739_v59 = vunpack.i.l.bf16 %v5738_v56  ;;  %v5740_v18 = vunpack.i.h.bf16 %v5738_v56 }
  0xd0   : > { %v1047_v20 = vsel %vm1046_vm9, %v1034_v0, %v5739_v59  ;;  %v1048_v35 = vsel %vm1046_vm9, %v1035_v23, %v5740_v18 }
  0xd1   : > { %v5743_v30 = vpop.permute.xlu0 %5742 }
  0xd2   : > { %v5748_v4 = vpop.permute.xlu1 %5747  ;;  %v5744_v34 = vunpack.i.l.bf16 %v5743_v30  ;;  %v5745_v10 = vunpack.i.h.bf16 %v5743_v30 }
  0xd3   : > { %v5749_v15 = vunpack.i.l.bf16 %v5748_v4  ;;  %v5750_v27 = vunpack.i.h.bf16 %v5748_v4 }
  0xd5   : > { %v1060_v28 = vsel %vm1059_vm11, %v1047_v20, %v5749_v15  ;;  %v5763_v44 = vpop.permute.xlu0 %5762  ;;  %v1061_v46 = vsel %vm1059_vm11, %v1048_v35, %v5750_v27  ;;  %v6472_v35 = vadd.s32 4294967294, %v6238_v57 }
  0xd6   : > { %v5753_v29 = vpop.permute.xlu1 %5752  ;;  %1199 = vmatmul.mubr.f32.vlgmr.msra.gmra.mrb[0].mxu0 %v1060_v28  ;;  %v5764_v42 = vunpack.i.l.bf16 %v5763_v44  ;;  %v5765_v53 = vunpack.i.h.bf16 %v5763_v44 }
  0xd7   : > { %v5754_v26 = vunpack.i.l.bf16 %v5753_v29  ;;  %4200 = vmatprep.mubr.msk.f32.mxu0 %vm1033_vm8, %v878_v21  ;;  %v5755_v36 = vunpack.i.h.bf16 %v5753_v29  ;;  %7525 = vst [vmem:[#allocation18_spill] sm:$0xff] %v6472_v35  ;;  %vm486_vm13 = vcmp.lt.s32.totalorder %v6472_v35, 64 }
  0xd9   : > { %v1036_v37 = vsel %vm1033_vm8, %v768_v32, %v5754_v26  ;;  %v5773_v40 = vpop.permute.xlu0 %5772  ;;  %v1037_v49 = vsel %vm1033_vm8, %v6317_v51, %v5755_v36 }
  0xda   : > { %v5758_v39 = vpop.permute.xlu1 %5757  ;;  %1204 = vmatmul.mubr.f32.gmra.mrb[2].mxu0 %v1061_v46  ;;  %v1049_v43 = vsel %vm1046_vm9, %v1036_v37, %v5744_v34  ;;  %v1050_v55 = vsel %vm1046_vm9, %v1037_v49, %v5745_v10  ;;  %v5774_v56 = vunpack.i.l.bf16 %v5773_v40  ;;  %v5775_v15 = vunpack.i.h.bf16 %v5773_v40 }
  0xdb   : > { %v5759_v41 = vunpack.i.l.bf16 %v5758_v39  ;;  %4201 = vmatprep.mubr.msk.f32.mxu0 %vm1033_vm8, %v6302_v48  ;;  %v5760_v9 = vunpack.i.h.bf16 %v5758_v39  ;;  %v1038_v48 = vsel %vm1033_vm8, %v6334_v63, %v5764_v42  ;;  %v6478_v39 = vadd.s32 2, %v6242_v61 }
  0xdd   : > { %v1062_v45 = vsel %vm1059_vm11, %v1049_v43, %v5759_v41  ;;  %v5783_v14 = vpop.permute.xlu0 %5782  ;;  %v1063_v59 = vsel %vm1059_vm11, %v1050_v55, %v5760_v9  ;;  %7526 = vst [vmem:[#allocation19_spill] sm:$0xff] %v6478_v39  ;;  %vm629_vm14 = vcmp.lt.s32.totalorder %v6478_v39, 64 }
  0xde   : > { %1209 = vmatmul.mubr.f32.gmra.mrb[4].mxu0 %v1062_v45  ;;  %v5768_v1 = vpop.permute.xlu1 %5767  ;;  %v5784_v18 = vunpack.i.l.bf16 %v5783_v14  ;;  %v5785_v44 = vunpack.i.h.bf16 %v5783_v14  ;;  %v776_v45 = vsel %vm486_vm13, %v6385_v31, 0.0  ;;  %v886_v49 = vsel %vm629_vm14, %v6394_v47, 0.0 }
  0xdf   : > { %v5769_v54 = vunpack.i.l.bf16 %v5768_v1  ;;  %4202 = vmatprep.mubr.msk.f32.mxu0 %vm1033_vm8, %v6313_v50  ;;  %v5770_v60 = vunpack.i.h.bf16 %v5768_v1  ;;  %v1039_v50 = vsel %vm1033_vm8, %v6342_v25, %v5765_v53 }
  0xe1   : > { %v1051_v51 = vsel %vm1046_vm9, %v1038_v48, %v5769_v54  ;;  %v5793_v30 = vpop.permute.xlu0 %5792  ;;  %v1052_v21 = vsel %vm1046_vm9, %v1039_v50, %v5770_v60  ;;  %v1398_v60 = vld [vmem:[#allocation2 + $0x188] sm:$0xff]  ;;  %v1399_v50 = vld [vmem:[#allocation2 + $0x190] sm:$0xff] }
  0xe2   : > { %1214 = vmatmul.mubr.f32.gmra.mrb[6].mxu0 %v1063_v59  ;;  %v5778_v0 = vpop.permute.xlu1 %5777  ;;  %v1064_v63 = vsel %vm1059_vm11, %v1051_v51, %v5774_v56  ;;  %v1065_v29 = vsel %vm1059_vm11, %v1052_v21, %v5775_v15  ;;  %v5794_v25 = vunpack.i.l.bf16 %v5793_v30  ;;  %v5795_v41 = vunpack.i.h.bf16 %v5793_v30  ;;  %v1397_v59 = vld [vmem:[#allocation2 + $0x180] sm:$0xff]  ;;  %v1382_v30 = vld [vmem:[#allocation2 + $0x108] sm:$0xff]  ;;  %v1400_v15 = vld [vmem:[#allocation2 + $0x198] sm:$0xff] }
  0xe3   : > { %v5779_v4 = vunpack.i.l.bf16 %v5778_v0  ;;  %4203 = vmatprep.mubr.msk.f32.mxu0 %vm1033_vm8, %v6323_v52  ;;  %v5780_v23 = vunpack.i.h.bf16 %v5778_v0  ;;  %v5252_v0 = vpack.c.bf16 %v1398_v60, %v1397_v59  ;;  %v1381_v51 = vld [vmem:[#allocation2 + $0x100] sm:$0xff] }
  0xe4   : > { %v1042_v37 = vsel %vm1033_vm8, %v6390_v33, %v5794_v25 }
  0xe5   : > { %v1040_v27 = vsel %vm1033_vm8, %v6352_v8, %v5779_v4  ;;  %v1014_v28 = vpop.permute.xlu0 %1013  ;;  %v1041_v34 = vsel %vm1033_vm8, %v6360_v13, %v5780_v23  ;;  %v5254_v4 = vpack.c.bf16 %v1382_v30, %v1381_v51  ;;  %5253 = vmatprep.subr.bf16.mxu1 %v5252_v0  ;;  %v1401_v23 = vld [vmem:[#allocation2 + $0x1a0] sm:$0xff] }
  0xe6   : > { %1219 = vmatmul.mubr.f32.gmra.mrb[8].mxu0 %v1064_v63  ;;  %v5788_v20 = vpop.permute.xlu1 %5787  ;;  %v1053_v32 = vsel %vm1046_vm9, %v1040_v27, %v5784_v18  ;;  %v5256_v63 = vpack.c.bf16 %v1400_v15, %v1399_v50  ;;  %v1383_v18 = vld [vmem:[#allocation2 + $0x110] sm:$0xff]  ;;  %v1402_v27 = vld [vmem:[#allocation2 + $0x1a8] sm:$0xff]  ;;  %v1412_v50 = vld [vmem:[#allocation2 + $0x1f8] sm:$0xff] }
  0xe7   : > { %4204 = vmatprep.mubr.msk.f32.mxu0 %vm1033_vm8, %v6338_v19  ;;  %v5789_v52 = vunpack.i.l.bf16 %v5788_v20  ;;  %v5790_v8 = vunpack.i.h.bf16 %v5788_v20  ;;  %5255 = vmatpush3.bf16.msra.mxu1 %v5254_v4  ;;  %v1384_v20 = vld [vmem:[#allocation2 + $0x118] sm:$0xff]  ;;  %v1411_v4 = vld [vmem:[#allocation2 + $0x1f0] sm:$0xff] }
  0xe8   : > { %v5258_v21 = vpack.c.bf16 %v1384_v20, %v1383_v18  ;;  %5257 = vmatprep.subr.bf16.mxu1 %v5256_v63 }
  0xe9   : > { %v1066_v36 = vsel %vm1059_vm11, %v1053_v32, %v5789_v52  ;;  %v922_v46 = vpop.permute.xlu0 %921  ;;  %v6509_v52 = vld [vmem:[#allocation5] ss:$0 sm:$0xff]  ;;  %v1403_v32 = vld [vmem:[#allocation2 + $0x1b0] sm:$0xff] }
  0xea   : > { %1224 = vmatmul.mubr.f32.gmra.mrb[10].mxu0 %v1065_v29  ;;  %v5798_v26 = vpop.permute.xlu1 %5797 }
  0xeb   : > { %4205 = vmatprep.mubr.msk.f32.mxu0 %vm1033_vm8, %v6348_v38  ;;  %v5799_v19 = vunpack.i.l.bf16 %v5798_v26  ;;  %v1054_v38 = vsel %vm1046_vm9, %v1041_v34, %v5785_v44  ;;  %v5800_v33 = vunpack.i.h.bf16 %v5798_v26  ;;  %5259 = vmatpush3.bf16.msra.mxu1 %v5258_v21  ;;  %v1404_v26 = vld [vmem:[#allocation2 + $0x1b8] sm:$0xff] }
  0xec   : > { %v1067_v42 = vsel %vm1059_vm11, %v1054_v38, %v5790_v8  ;;  %v1405_v38 = vld [vmem:[#allocation2 + $0x1c0] sm:$0xff] }
  0xed   : > { %v1055_v13 = vsel %vm1046_vm9, %v1042_v37, %v5799_v19  ;;  %v1018_v9 = vpop.permute.xlu0 %1017  ;;  %v5264_v37 = vpack.c.bf16 %v1404_v26, %v1403_v32 }
  0xee   : > { %1229 = vmatmul.mubr.f32.gmra.mrb[12].mxu0 %v1066_v36  ;;  %v1016_v40 = vpop.permute.xlu1 %1015  ;;  %v1068_v43 = vsel %vm1059_vm11, %v1055_v13, %v1014_v28  ;;  %v5260_v28 = vpack.c.bf16 %v1402_v27, %v1401_v23  ;;  %v5280_v27 = vpack.c.bf16 %v1412_v50, %v1411_v4 }
  0xef   : > { %4206 = vmatprep.mubr.msk.f32.mxu0 %vm1033_vm8, %v6356_v11  ;;  %v1043_v11 = vsel %vm1033_vm8, %v6400_v5, %v5795_v41 }
  0xf0   : > { %v1056_v1 = vsel %vm1046_vm9, %v1043_v11, %v5800_v33  ;;  %5261 = vmatprep.subr.bf16.mxu1 %v5260_v28  ;;  %v1408_v11 = vld [vmem:[#allocation2 + $0x1d8] sm:$0xff] }
  0xf1   : > { %v1069_v53 = vsel %vm1059_vm11, %v1056_v1, %v1016_v40  ;;  %v972_v54 = vpop.permute.xlu0 %971  ;;  %v1406_v40 = vld [vmem:[#allocation2 + $0x1c8] sm:$0xff] }
  0xf2   : > { %1234 = vmatmul.mubr.f32.gmra.mrb[14].mxu0 %v1067_v42  ;;  %v970_v10 = vpop.permute.xlu1 %969 }
  0xf3   : > { %4207 = vmatprep.mubr.msk.f32.mxu0 %vm1033_vm8, %v6368_v17  ;;  %v1044_v17 = vsel %vm1033_vm8, %v776_v45, %v922_v46 }
  0xf4   : > { %v1057_v48 = vsel %vm1046_vm9, %v1044_v17, %v970_v10 }
  0xf5   : > { %v1070_v55 = vsel %vm1059_vm11, %v1057_v48, %v1018_v9  ;;  %v1407_v9 = vld [vmem:[#allocation2 + $0x1d0] sm:$0xff]  ;;  %v1409_v48 = vld [vmem:[#allocation2 + $0x1e0] sm:$0xff] }
  0xf6   : > { %1239 = vmatmul.mubr.f32.gmra.mrb[16].mxu0 %v1068_v43  ;;  %v924_v14 = vpop.permute.xlu1 %923  ;;  %v5268_v43 = vpack.c.bf16 %v1406_v40, %v1405_v38  ;;  %v1415_v38 = vld [vmem:[#allocation2 + $0x210] sm:$0xff]  ;;  %v1416_v40 = vld [vmem:[#allocation2 + $0x218] sm:$0xff] }
  0xf7   : > { %4208 = vmatprep.mubr.msk.f32.mxu0 %vm1033_vm8, %v886_v49  ;;  %v1045_v5 = vsel %vm1033_vm8, 0.0, %v924_v14 }
  0xf8   : > { %v1058_v31 = vsel %vm1046_vm9, %v1045_v5, %v972_v54 }
  0xfa   : > { %1244 = vmatmul.mubr.f32.gmra.mrb[18].mxu0 %v1069_v53  ;;  %v1020_v47 = vpop.permute.xlu1 %1019  ;;  %v5272_v53 = vpack.c.bf16 %v1408_v11, %v1407_v9  ;;  %v5288_v11 = vpack.c.bf16 %v1416_v40, %v1415_v38 }
  0xfb   : > { %1248 = vmatprep.mubr.f32.mxu0 %v7501_v2  ;;  %v1071_v56 = vsel %vm1059_vm11, %v1058_v31, %v1020_v47  ;;  %v1410_v31 = vld [vmem:[#allocation2 + $0x1e8] sm:$0xff] }
  0xfc   : > { %v5276_v51 = vpack.c.bf16 %v1410_v31, %v1409_v48 }
  0xfe   : > { %1249 = vmatmul.mubr.f32.gmra.mrb[20].mxu0 %v1070_v55 }
  0xff   : > { %1253 = vmatprep.mubr.f32.mxu0 %v7501_v2 }
 0x102   : > { %1254 = vmatmul.mubr.f32.gmra.mrb[22].mxu0 %v1071_v56 }
 0x1a9   : > { %v1200_v29 = vpop.f32.mrb[0].mxu0 }
 0x1aa   : > { %v1201_v25 = vadd.f32 %v6509_v52, %v1200_v29  ;;  %v1202_v44 = vpop.f32.mrb[1].mxu0  ;;  %v1413_v29 = vld [vmem:[#allocation2 + $0x200] sm:$0xff] }
 0x1ac   : > { %vm1259_vm15 = vcmp.gt.f32.partialorder %v1201_v25, 0.0  ;;  %v1271_v34 = vmul.f32 0.01, %v1201_v25 }
 0x1ad   : > { %v1205_v19 = vpop.f32.mrb[2].mxu0 }
 0x1ae   : > { %v1206_v8 = vadd.f32 %v6509_v52, %v1205_v19  ;;  %v1207_v36 = vpop.f32.mrb[3].mxu0  ;;  %v6513_v46 = vsel %vm1259_vm15, %v1201_v25, %v1271_v34  ;;  %v1414_v25 = vld [vmem:[#allocation2 + $0x208] sm:$0xff] }
 0x1af   : > { %1487 = vmatprep.mubr.f32.mxu1 %v6513_v46  ;;  %v5284_v36 = vpack.c.bf16 %v1414_v25, %v1413_v29 }
 0x1b0   : > { %vm1260_vm8 = vcmp.gt.f32.partialorder %v1206_v8, 0.0  ;;  %v1272_v41 = vmul.f32 0.01, %v1206_v8  ;;  %1488 = vmatmul.mubr.f32.vlgmr.msra.gmra.mrb[0].mxu1 %v7501_v2 }
 0x1b1   : > { %v1210_v13 = vpop.f32.mrb[4].mxu0  ;;  %5263 = vmatpush3.bf16.msra.mxu1 %v5260_v28 }
 0x1b2   : > { %v1211_v42 = vadd.f32 %v6509_v52, %v1210_v13  ;;  %v1212_v33 = vpop.f32.mrb[5].mxu0  ;;  %v6518_v10 = vsel %vm1260_vm8, %v1206_v8, %v1272_v41  ;;  %5265 = vmatprep.subr.bf16.mxu1 %v5264_v37 }
 0x1b3   : > { %1492 = vmatprep.mubr.f32.mxu1 %v6518_v10  ;;  %v1298_v5 = vrot.slane %v6518_v10, 7 }
 0x1b4   : > { %vm1261_vm9 = vcmp.gt.f32.partialorder %v1211_v42, 0.0  ;;  %v1273_v45 = vmul.f32 0.01, %v1211_v42  ;;  %1493 = vmatmul.mubr.f32.gmra.mrb[2].mxu1 %v7501_v2 }
 0x1b5   : > { %v1215_v49 = vpop.f32.mrb[6].mxu0  ;;  %5267 = vmatpush3.bf16.msra.mxu1 %v5264_v37 }
 0x1b6   : > { %v1216_v1 = vadd.f32 %v6509_v52, %v1215_v49  ;;  %v1217_v14 = vpop.f32.mrb[7].mxu0  ;;  %v6523_v17 = vsel %vm1261_vm9, %v1211_v42, %v1273_v45  ;;  %5269 = vmatprep.subr.bf16.mxu1 %v5268_v43 }
 0x1b7   : > { %v1299_v54 = vrot.slane %v6523_v17, 7  ;;  %1497 = vmatprep.mubr.f32.mxu1 %v6523_v17 }
 0x1b8   : > { %vm1262_vm11 = vcmp.gt.f32.partialorder %v1216_v1, 0.0  ;;  %v1274_v47 = vmul.f32 0.01, %v1216_v1 }
 0x1b9   : > { %v1220_v55 = vpop.f32.mrb[8].mxu0  ;;  %v1318_v56 = vsel %vm790_vm0, %v1298_v5, %v1299_v54  ;;  %5271 = vmatpush3.bf16.msra.mxu1 %v5268_v43 }
 0x1ba   : > { %v1221_v59 = vadd.f32 %v6509_v52, %v1220_v55  ;;  %v1222_v60 = vpop.f32.mrb[9].mxu0  ;;  %4210 = vmatmul.mubr.msk.f32.gmra.mrb[4].mxu1 %vm514_vm3, %v1318_v56  ;;  %v6533_v0 = vsel %vm1262_vm11, %v1216_v1, %v1274_v47  ;;  %5273 = vmatprep.subr.bf16.mxu1 %v5272_v53 }
 0x1bb   : > { %1502 = vmatprep.mubr.f32.mxu1 %v6533_v0  ;;  %v1300_v30 = vrot.slane %v6533_v0, 7 }
 0x1bc   : > { %vm1263_vm15 = vcmp.gt.f32.partialorder %v1221_v59, 0.0  ;;  %v1275_v15 = vmul.f32 0.01, %v1221_v59 }
 0x1bd   : > { %v1225_v63 = vpop.f32.mrb[10].mxu0  ;;  %v1317_v18 = vsel %vm790_vm0, %v1299_v54, %v1300_v30  ;;  %5275 = vmatpush3.bf16.msra.mxu1 %v5272_v53 }
 0x1be   : > { %v1226_v20 = vadd.f32 %v6509_v52, %v1225_v63  ;;  %v1227_v21 = vpop.f32.mrb[11].mxu0  ;;  %1503 = vmatmul.mubr.f32.gmra.mrb[6].mxu1 %v1317_v18  ;;  %v6540_v23 = vsel %vm1263_vm15, %v1221_v59, %v1275_v15  ;;  %5277 = vmatprep.subr.bf16.mxu1 %v5276_v51 }
 0x1bf   : > { %1507 = vmatprep.mubr.f32.mxu1 %v6540_v23  ;;  %v1301_v28 = vrot.slane %v6540_v23, 7  ;;  %v1337_v40 = vrot.slane %v6540_v23, 1 }
 0x1c0   : > { %vm1264_vm8 = vcmp.gt.f32.partialorder %v1226_v20, 0.0  ;;  %v1276_v44 = vmul.f32 0.01, %v1226_v20 }
 0x1c1   : > { %v1230_v32 = vpop.f32.mrb[12].mxu0  ;;  %v1316_v26 = vsel %vm790_vm0, %v1300_v30, %v1301_v28  ;;  %5279 = vmatpush3.bf16.msra.mxu1 %v5276_v51 }
 0x1c2   : > { %v1231_v34 = vadd.f32 %v6509_v52, %v1230_v32  ;;  %v1232_v19 = vpop.f32.mrb[13].mxu0  ;;  %1508 = vmatmul.mubr.f32.gmra.mrb[8].mxu1 %v1316_v26  ;;  %v6547_v8 = vsel %vm1264_vm8, %v1226_v20, %v1276_v44  ;;  %5281 = vmatprep.subr.bf16.mxu1 %v5280_v27 }
 0x1c3   : > { %1512 = vmatprep.mubr.f32.mxu1 %v6547_v8  ;;  %v1302_v37 = vrot.slane %v6547_v8, 7 }
 0x1c4   : > { %vm1265_vm9 = vcmp.gt.f32.partialorder %v1231_v34, 0.0  ;;  %v1277_v41 = vmul.f32 0.01, %v1231_v34 }
 0x1c5   : > { %v1235_v13 = vpop.f32.mrb[14].mxu0  ;;  %v1315_v42 = vsel %vm790_vm0, %v1301_v28, %v1302_v37  ;;  %5283 = vmatpush3.bf16.msra.mxu1 %v5280_v27 }
 0x1c6   : > { %v1236_v33 = vadd.f32 %v6509_v52, %v1235_v13  ;;  %v1237_v43 = vpop.f32.mrb[15].mxu0  ;;  %1513 = vmatmul.mubr.f32.gmra.mrb[10].mxu1 %v1315_v42  ;;  %v6554_v9 = vsel %vm1265_vm9, %v1231_v34, %v1277_v41  ;;  %5285 = vmatprep.subr.bf16.mxu1 %v5284_v36  ;;  %v1338_v13 = vrot.slane %v6547_v8, 1 }
 0x1c7   : > { %1517 = vmatprep.mubr.f32.mxu1 %v6554_v9  ;;  %v1303_v45 = vrot.slane %v6554_v9, 7 }
 0x1c8   : > { %vm1266_vm11 = vcmp.gt.f32.partialorder %v1236_v33, 0.0  ;;  %v1278_v49 = vmul.f32 0.01, %v1236_v33  ;;  %v1351_v43 = vsel %vm827_vm1, %v1337_v40, %v1338_v13 }
 0x1c9   : > { %v1240_v1 = vpop.f32.mrb[16].mxu0  ;;  %v1314_v14 = vsel %vm790_vm0, %v1302_v37, %v1303_v45  ;;  %5287 = vmatpush3.bf16.msra.mxu1 %v5284_v36  ;;  %v1336_v36 = vrot.slane %v6533_v0, 1  ;;  %v1334_v37 = vrot.slane %v6518_v10, 1 }
 0x1ca   : > { %v1241_v53 = vadd.f32 %v6509_v52, %v1240_v1  ;;  %v1242_v5 = vpop.f32.mrb[17].mxu0  ;;  %1518 = vmatmul.mubr.f32.gmra.mrb[12].mxu1 %v1314_v14  ;;  %v6561_v54 = vsel %vm1266_vm11, %v1236_v33, %v1278_v49  ;;  %5289 = vmatprep.subr.bf16.mxu1 %v5288_v11  ;;  %v1339_v33 = vrot.slane %v6554_v9, 1 }
 0x1cb   : > { %1522 = vmatprep.mubr.f32.mxu1 %v6561_v54  ;;  %v1304_v48 = vrot.slane %v6561_v54, 7  ;;  %v1352_v42 = vsel %vm827_vm1, %v1336_v36, %v1337_v40  ;;  %v1815_v40 = vld [vmem:[#allocation2 + $0x320] sm:$0xff] }
 0x1cc   : > { %vm1267_vm15 = vcmp.gt.f32.partialorder %v1241_v53, 0.0  ;;  %v1279_v31 = vmul.f32 0.01, %v1241_v53 }
 0x1cd   : > { %v1245_v47 = vpop.f32.mrb[18].mxu0  ;;  %v1313_v55 = vsel %vm790_vm0, %v1303_v45, %v1304_v48  ;;  %5291 = vmatpush3.bf16.msra.mxu1 %v5288_v11  ;;  %v1340_v11 = vrot.slane %v6561_v54, 1  ;;  %v1350_v45 = vsel %vm827_vm1, %v1338_v13, %v1339_v33 }
 0x1ce   : > { %v1246_v56 = vadd.f32 %v6509_v52, %v1245_v47  ;;  %v1247_v59 = vpop.f32.mrb[19].mxu0  ;;  %1523 = vmatmul.mubr.f32.gmra.mrb[14].mxu1 %v1313_v55  ;;  %v6568_v60 = vsel %vm1267_vm15, %v1241_v53, %v1279_v31  ;;  %v1799_v47 = vld [vmem:[#allocation2 + $0x2a0] sm:$0xff]  ;;  %v1800_v55 = vld [vmem:[#allocation2 + $0x2a8] sm:$0xff] }
 0x1cf   : > { %1527 = vmatprep.mubr.f32.mxu1 %v6568_v60  ;;  %v1305_v51 = vrot.slane %v6568_v60, 7  ;;  %v1341_v49 = vrot.slane %v6568_v60, 1  ;;  %v1349_v1 = vsel %vm827_vm1, %v1339_v33, %v1340_v11  ;;  %v1783_v59 = vld [vmem:[#allocation2 + $0x220] sm:$0xff] }
 0x1d0   : > { %vm1268_vm8 = vcmp.gt.f32.partialorder %v1246_v56, 0.0  ;;  %v1280_v30 = vmul.f32 0.01, %v1246_v56  ;;  %v1807_v33 = vld [vmem:[#allocation2 + $0x2e0] sm:$0xff] }
 0x1d1   : > { %v1250_v4 = vpop.f32.mrb[20].mxu0  ;;  %v1312_v50 = vsel %vm790_vm0, %v1304_v48, %v1305_v51  ;;  %v1348_v5 = vsel %vm827_vm1, %v1340_v11, %v1341_v49 }
 0x1d2   : > { %v1251_v15 = vadd.f32 %v6509_v52, %v1250_v4  ;;  %v1252_v63 = vpop.f32.mrb[21].mxu0  ;;  %1528 = vmatmul.mubr.f32.gmra.mrb[16].mxu1 %v1312_v50  ;;  %v6575_v18 = vsel %vm1268_vm8, %v1246_v56, %v1280_v30  ;;  %v5292_v56 = vpack.c.bf16 %v1800_v55, %v1799_v47  ;;  %v1801_v4 = vld [vmem:[#allocation2 + $0x2b0] sm:$0xff]  ;;  %v1802_v50 = vld [vmem:[#allocation2 + $0x2b8] sm:$0xff] }
 0x1d3   : > { %1532 = vmatprep.mubr.f32.mxu1 %v6575_v18  ;;  %v1306_v20 = vrot.slane %v6575_v18, 7  ;;  %v1342_v14 = vrot.slane %v6575_v18, 1  ;;  %v5296_v63 = vpack.c.bf16 %v1802_v50, %v1801_v4  ;;  %v1809_v55 = vld [vmem:[#allocation2 + $0x2f0] sm:$0xff]  ;;  %v1822_v50 = vld [vmem:[#allocation2 + $0x358] sm:$0xff] }
 0x1d4   : > { %vm1269_vm9 = vcmp.gt.f32.partialorder %v1251_v15, 0.0  ;;  %v1281_v21 = vmul.f32 0.01, %v1251_v15  ;;  %5293 = vmatprep.subr.bf16.mxu0 %v5292_v56  ;;  %v1810_v56 = vld [vmem:[#allocation2 + $0x2f8] sm:$0xff]  ;;  %v1821_v4 = vld [vmem:[#allocation2 + $0x350] sm:$0xff] }
 0x1d5   : > { %v1255_v27 = vpop.f32.mrb[22].mxu0  ;;  %v1311_v28 = vsel %vm790_vm0, %v1305_v51, %v1306_v20  ;;  %v1347_v48 = vsel %vm827_vm1, %v1341_v49, %v1342_v14  ;;  %v1784_v51 = vld [vmem:[#allocation2 + $0x228] sm:$0xff]  ;;  %v1818_v49 = vld [vmem:[#allocation2 + $0x338] sm:$0xff] }
 0x1d6   : > { %v1256_v29 = vadd.f32 %v6509_v52, %v1255_v27  ;;  %v1257_v25 = vpop.f32.mrb[23].mxu0  ;;  %1533 = vmatmul.mubr.f32.gmra.mrb[18].mxu1 %v1311_v28  ;;  %v6582_v44 = vsel %vm1269_vm9, %v1251_v15, %v1281_v21  ;;  %v1335_v52 = vrot.slane %v6523_v17, 1  ;;  %v5294_v30 = vpack.c.bf16 %v1784_v51, %v1783_v59  ;;  %v1785_v15 = vld [vmem:[#allocation2 + $0x230] sm:$0xff]  ;;  %v1803_v27 = vld [vmem:[#allocation2 + $0x2c0] sm:$0xff]  ;;  %v1804_v28 = vld [vmem:[#allocation2 + $0x2c8] sm:$0xff] }
 0x1d7   : > { %v1307_v32 = vrot.slane %v6582_v44, 7  ;;  %1537 = vmatprep.mubr.f32.mxu1 %v6582_v44  ;;  %v1343_v53 = vrot.slane %v6582_v44, 1  ;;  %v1787_v25 = vld [vmem:[#allocation2 + $0x240] sm:$0xff]  ;;  %v1793_v59 = vld [vmem:[#allocation2 + $0x270] sm:$0xff]  ;;  %v5312_v51 = vpack.c.bf16 %v1810_v56, %v1809_v55 }
 0x1d8   : > { %v1282_v26 = vmul.f32 0.01, %v1256_v29  ;;  %vm1270_vm11 = vcmp.gt.f32.partialorder %v1256_v29, 0.0  ;;  %v1354_v38 = vsel %vm827_vm1, %v1334_v37, %v1335_v52  ;;  %v1353_v41 = vsel %vm827_vm1, %v1335_v52, %v1336_v36  ;;  %5295 = vmatpush3.bf16.msra.mxu0 %v5294_v30  ;;  %v1806_v52 = vld [vmem:[#allocation2 + $0x2d8] sm:$0xff]  ;;  %v1789_v36 = vld [vmem:[#allocation2 + $0x250] sm:$0xff] }
 0x1d9   : > { %v1310_v34 = vsel %vm790_vm0, %v1306_v20, %v1307_v32  ;;  %v1346_v31 = vsel %vm827_vm1, %v1342_v14, %v1343_v53  ;;  %v1786_v20 = vld [vmem:[#allocation2 + $0x238] sm:$0xff]  ;;  %5297 = vmatprep.subr.bf16.mxu0 %v5296_v63  ;;  %v1788_v32 = vld [vmem:[#allocation2 + $0x248] sm:$0xff]  ;;  %v5336_v63 = vpack.c.bf16 %v1822_v50, %v1821_v4 }
 0x1da   : > { %4211 = vmatmul.mubr.msk.f32.gmra.mrb[20].mxu1 %vm534_vm6, %v1310_v34  ;;  %v6590_v19 = vsel %vm1270_vm11, %v1256_v29, %v1282_v26  ;;  %v5298_v21 = vpack.c.bf16 %v1786_v20, %v1785_v15  ;;  %v5300_v29 = vpack.c.bf16 %v1804_v28, %v1803_v27  ;;  %v5302_v26 = vpack.c.bf16 %v1788_v32, %v1787_v25  ;;  %v1805_v34 = vld [vmem:[#allocation2 + $0x2d0] sm:$0xff]  ;;  %v1792_v14 = vld [vmem:[#allocation2 + $0x268] sm:$0xff]  ;;  %v1794_v30 = vld [vmem:[#allocation2 + $0x278] sm:$0xff] }
 0x1db   : > { %1542 = vmatprep.mubr.f32.mxu1 %v6590_v19  ;;  %v5304_v37 = vpack.c.bf16 %v1806_v52, %v1805_v34  ;;  %v5314_v15 = vpack.c.bf16 %v1794_v30, %v1793_v59  ;;  %v1811_v20 = vld [vmem:[#allocation2 + $0x300] sm:$0xff]  ;;  %v1796_v32 = vld [vmem:[#allocation2 + $0x288] sm:$0xff]  ;;  %v1825_v52 = vld [vmem:[#allocation2 + $0x370] sm:$0xff] }
 0x1dc   : > { %5299 = vmatpush3.bf16.msra.mxu0 %v5298_v21  ;;  %v1812_v21 = vld [vmem:[#allocation2 + $0x308] sm:$0xff]  ;;  %v1823_v28 = vld [vmem:[#allocation2 + $0x360] sm:$0xff] }
 0x1dd   : > { %5301 = vmatprep.subr.bf16.mxu0 %v5300_v29  ;;  %v5316_v27 = vpack.c.bf16 %v1812_v21, %v1811_v20  ;;  %v1824_v29 = vld [vmem:[#allocation2 + $0x368] sm:$0xff]  ;;  %v1795_v25 = vld [vmem:[#allocation2 + $0x280] sm:$0xff] }
 0x1de   : > { %1543 = vmatmul.mubr.f32.gmra.mrb[22].mxu1 %v7501_v2  ;;  %v5318_v34 = vpack.c.bf16 %v1796_v32, %v1795_v25 }
 0x1df   : > { %4930 = vmatprep.mubr.f32.mxu1 %v7501_v2 }
 0x1e0   : > { %5303 = vmatpush3.bf16.msra.mxu0 %v5302_v26  ;;  %v5340_v26 = vpack.c.bf16 %v1824_v29, %v1823_v28 }
 0x1e1   : > { %5305 = vmatprep.subr.bf16.mxu0 %v5304_v37 }
 0x1e2   : > { %4931 = vmatmul.mubr.msk.f32.vlgmr.msra.gmra.mrb[24].mxu1 %vm561_vm2, %v1354_v38  ;;  %v1790_v38 = vld [vmem:[#allocation2 + $0x258] sm:$0xff] }
 0x1e3   : > { %4933 = vmatprep.mubr.f32.mxu1 %v1353_v41  ;;  %v1816_v41 = vld [vmem:[#allocation2 + $0x328] sm:$0xff]  ;;  %v5306_v13 = vpack.c.bf16 %v1790_v38, %v1789_v36  ;;  %v1826_v36 = vld [vmem:[#allocation2 + $0x378] sm:$0xff]  ;;  %v1813_v38 = vld [vmem:[#allocation2 + $0x310] sm:$0xff] }
 0x1e4   : > { %v5344_v37 = vpack.c.bf16 %v1826_v36, %v1825_v52 }
 0x1e5   : > { %5307 = vmatpush3.bf16.msra.mxu0 %v5306_v13  ;;  %v1797_v13 = vld [vmem:[#allocation2 + $0x290] sm:$0xff] }
 0x1e6   : > { %4934 = vmatmul.mubr.f32.gmra.mrb[26].mxu1 %v1352_v42  ;;  %v5324_v42 = vpack.c.bf16 %v1816_v41, %v1815_v40  ;;  %v1814_v40 = vld [vmem:[#allocation2 + $0x318] sm:$0xff] }
 0x1e7   : > { %4936 = vmatprep.mubr.f32.mxu1 %v1351_v43  ;;  %v1808_v43 = vld [vmem:[#allocation2 + $0x2e8] sm:$0xff]  ;;  %v5320_v41 = vpack.c.bf16 %v1814_v40, %v1813_v38 }
 0x1e8   : > { %5325 = vmatprep.subr.bf16.mxu1 %v5324_v42  ;;  %v5308_v11 = vpack.c.bf16 %v1808_v43, %v1807_v33  ;;  %v1827_v43 = vld [vmem:[#allocation2 + $0x380] sm:$0xff] }
 0x1e9   : > { %5327 = vmatpush3.bf16.msra.mxu1 %v5324_v42  ;;  %v1798_v42 = vld [vmem:[#allocation2 + $0x298] sm:$0xff] }
 0x1ea   : > { %4937 = vmatmul.mubr.f32.gmra.mrb[28].mxu1 %v1350_v45  ;;  %v1817_v45 = vld [vmem:[#allocation2 + $0x330] sm:$0xff]  ;;  %5309 = vmatprep.subr.bf16.mxu0 %v5308_v11  ;;  %v5322_v33 = vpack.c.bf16 %v1798_v42, %v1797_v13  ;;  %v1828_v11 = vld [vmem:[#allocation2 + $0x388] sm:$0xff] }
 0x1eb   : > { %4939 = vmatprep.mubr.f32.mxu1 %v1349_v1  ;;  %v1791_v1 = vld [vmem:[#allocation2 + $0x260] sm:$0xff]  ;;  %v5328_v53 = vpack.c.bf16 %v1818_v49, %v1817_v45  ;;  %v5348_v45 = vpack.c.bf16 %v1828_v11, %v1827_v43  ;;  %v1829_v49 = vld [vmem:[#allocation2 + $0x390] sm:$0xff] }
 0x1ed   : > { %5329 = vmatprep.subr.bf16.mxu1 %v5328_v53 }
 0x1ee   : > { %4940 = vmatmul.mubr.f32.gmra.mrb[30].mxu1 %v1348_v5  ;;  %v5310_v5 = vpack.c.bf16 %v1792_v14, %v1791_v1  ;;  %v1830_v1 = vld [vmem:[#allocation2 + $0x398] sm:$0xff] }
 0x1ef   : > { %4942 = vmatprep.mubr.f32.mxu1 %v1347_v48  ;;  %5331 = vmatpush3.bf16.msra.mxu1 %v5328_v53  ;;  %v1819_v48 = vld [vmem:[#allocation2 + $0x340] sm:$0xff]  ;;  %v5352_v14 = vpack.c.bf16 %v1830_v1, %v1829_v49 }
 0x1f0   : > { %5311 = vmatpush3.bf16.msra.mxu0 %v5310_v5  ;;  %v2225_v53 = vld [vmem:[#allocation2 + $0x420] sm:$0xff]  ;;  %v2226_v5 = vld [vmem:[#allocation2 + $0x428] sm:$0xff] }
 0x1f1   : > { %5313 = vmatprep.subr.bf16.mxu0 %v5312_v51 }
 0x1f2   : > { %4943 = vmatmul.mubr.msk.f32.gmra.mrb[32].mxu1 %vm581_vm7, %v1346_v31  ;;  %v1820_v31 = vld [vmem:[#allocation2 + $0x348] sm:$0xff] }
 0x1f3   : > { %4945 = vmatprep.mubr.f32.mxu1 %v7501_v2  ;;  %v5332_v47 = vpack.c.bf16 %v1820_v31, %v1819_v48  ;;  %v5356_v48 = vpack.c.bf16 %v2226_v5, %v2225_v53  ;;  %v2241_v31 = vld [vmem:[#allocation2 + $0x4a0] sm:$0xff] }
 0x1f4   : > { %5315 = vmatpush3.bf16.msra.mxu0 %v5314_v15  ;;  %v6649_v5 = vld [vmem:[#allocation5 + $0x1] ss:$0 sm:$0xff] }
 0x1f5   : > { %5333 = vmatprep.subr.bf16.mxu1 %v5332_v47  ;;  %5317 = vmatprep.subr.bf16.mxu0 %v5316_v27 }
 0x1f6   : > { %4946 = vmatmul.mubr.f32.gmra.mrb[34].mxu1 %v7501_v2 }
 0x1f7   : > { %4980 = vmatprep.mubr.f32.mxu1 %v7501_v2  ;;  %5335 = vmatpush3.bf16.msra.mxu1 %v5332_v47  ;;  %v2242_v47 = vld [vmem:[#allocation2 + $0x4a8] sm:$0xff] }
 0x1f8   : > { %5337 = vmatprep.subr.bf16.mxu1 %v5336_v63  ;;  %5319 = vmatpush3.bf16.msra.mxu0 %v5318_v34  ;;  %v6630_v55 = vpack.c.bf16 %v2242_v47, %v2241_v31  ;;  %v6651_v31 = vld [vmem:[#allocation2 + $0x3a0] sm:$0xff]  ;;  %v6653_v47 = vld [vmem:[#allocation2 + $0x3a8] sm:$0xff] }
 0x1f9   : > { %5321 = vmatprep.subr.bf16.mxu0 %v5320_v41 }
 0x1fb   : > { %5339 = vmatpush3.bf16.msra.mxu1 %v5336_v63 }
 0x1fc   : > { %5341 = vmatprep.subr.bf16.mxu1 %v5340_v26  ;;  %5323 = vmatpush3.bf16.msra.mxu0 %v5322_v33 }
 0x1fd   : > { %5357 = vmatprep.subr.bf16.mxu0 %v5356_v48 }
 0x1ff   : > { %5343 = vmatpush3.bf16.msra.mxu1 %v5340_v26 }
 0x200   : > { %5345 = vmatprep.subr.bf16.mxu1 %v5344_v37 }
 0x203   : > { %5347 = vmatpush3.bf16.msra.mxu1 %v5344_v37 }
 0x204   : > { %5349 = vmatprep.subr.bf16.mxu1 %v5348_v45 }
 0x207   : > { %5351 = vmatpush3.bf16.msra.mxu1 %v5348_v45 }
 0x208   : > { %5353 = vmatprep.subr.bf16.mxu1 %v5352_v14 }
 0x20b   : > { %5355 = vmatpush3.bf16.msra.mxu1 %v5352_v14 }
 0x20c   : > { %5389 = vmatprep.subr.bf16.mxu1 %v6630_v55 }
 0x283   : > { %v4286_v56 = vpop.f32.mrb[0].mxu1 }
 0x284   : > { %v4287_v59 = vpop.f32.mrb[1].mxu1 }
 0x285   : > { %v4288_v51 = vadd.f32 %v4287_v59, %v4286_v56  ;;  %v6655_v56 = vld [vmem:[#allocation2 + $0x430] sm:$0xff] }
 0x287   : > { %v4289_v30 = vpop.f32.mrb[2].mxu1 }
 0x288   : > { %v4290_v4 = vpop.f32.mrb[3].mxu1 }
 0x289   : > { %v4291_v50 = vadd.f32 %v4290_v4, %v4289_v30  ;;  %v6657_v30 = vld [vmem:[#allocation2 + $0x438] sm:$0xff]  ;;  %v6659_v4 = vld [vmem:[#allocation2 + $0x3b0] sm:$0xff] }
 0x28d   : > { %v4292_v15 = vpop.f32.mrb[4].mxu1 }
 0x28e   : > { %v4293_v63 = vpop.f32.mrb[5].mxu1 }
 0x28f   : > { %v6633_v20 = vadd.f32 %v4293_v63, %v4292_v15  ;;  %v6661_v15 = vld [vmem:[#allocation2 + $0x3b8] sm:$0xff] }
 0x291   : > { %v4295_v21 = vpop.f32.mrb[6].mxu1 }
 0x292   : > { %v4296_v27 = vpop.f32.mrb[7].mxu1 }
 0x293   : > { %v4297_v28 = vadd.f32 %v4296_v27, %v4295_v21  ;;  %v6665_v21 = vld [vmem:[#allocation2 + $0x440] sm:$0xff]  ;;  %v6667_v27 = vld [vmem:[#allocation2 + $0x448] sm:$0xff] }
 0x295   : > { %v4298_v29 = vpop.f32.mrb[8].mxu1  ;;  %v1505_v2 = vadd.f32 %v4297_v28, %v6649_v5  ;;  %v7527_v28 = vmov 0.0  }
 0x296   : > { %v4299_v25 = vpop.f32.mrb[9].mxu1 }
 0x297   : > { %v6635_v32 = vadd.f32 %v4299_v25, %v4298_v29  ;;  %v6669_v29 = vld [vmem:[#allocation2 + $0x3c0] sm:$0xff]  ;;  %v1495_v25 = vadd.f32 %v4291_v50, %v6649_v5  ;;  %v5360_v50 = vpack.c.bf16 %v6657_v30, %v6655_v56  ;;  %v2243_v56 = vld [vmem:[#allocation2 + $0x4b0] sm:$0xff]  ;;  %v2244_v30 = vld [vmem:[#allocation2 + $0x4b8] sm:$0xff] }
 0x298   : > { %v6714_v35 = vpack.c.bf16 %v2244_v30, %v2243_v56 }
 0x299   : > { %v4301_v26 = vpop.f32.mrb[10].mxu1  ;;  %v1510_v39 = vadd.f32 %v6635_v32, %v6649_v5 }
 0x29a   : > { %v4302_v34 = vpop.f32.mrb[11].mxu1 }
 0x29b   : > { %v6637_v52 = vadd.f32 %v4302_v34, %v4301_v26  ;;  %v6672_v26 = vld [vmem:[#allocation2 + $0x3c8] sm:$0xff]  ;;  %v6674_v34 = vld [vmem:[#allocation2 + $0x450] sm:$0xff] }
 0x29d   : > { %v4304_v36 = vpop.f32.mrb[12].mxu1  ;;  %v1515_v58 = vadd.f32 %v6637_v52, %v6649_v5 }
 0x29e   : > { %v4305_v37 = vpop.f32.mrb[13].mxu1 }
 0x29f   : > { %v6639_v38 = vadd.f32 %v4305_v37, %v4304_v36  ;;  %v6676_v36 = vld [vmem:[#allocation2 + $0x458] sm:$0xff] }
 0x2a1   : > { %v4307_v40 = vpop.f32.mrb[14].mxu1 }
 0x2a2   : > { %v4308_v41 = vpop.f32.mrb[15].mxu1 }
 0x2a3   : > { %v6641_v13 = vadd.f32 %v4308_v41, %v4307_v40  ;;  %v1490_v40 = vadd.f32 %v4288_v51, %v6649_v5  ;;  %v6679_v41 = vld [vmem:[#allocation2 + $0x3d0] sm:$0xff]  ;;  %v6693_v51 = vld [vmem:[#allocation2 + $0x3e0] sm:$0xff] }
 0x2a5   : > { %v4310_v42 = vpop.f32.mrb[16].mxu1 }
 0x2a6   : > { %v4311_v33 = vpop.f32.mrb[17].mxu1 }
 0x2a7   : > { %v6643_v43 = vadd.f32 %v4311_v33, %v4310_v42  ;;  %v6681_v42 = vld [vmem:[#allocation2 + $0x3d8] sm:$0xff] }
 0x2a9   : > { %v4313_v11 = vpop.f32.mrb[18].mxu1  ;;  %v1530_v52 = vadd.f32 %v6643_v43, %v6649_v5 }
 0x2aa   : > { %v4314_v45 = vpop.f32.mrb[19].mxu1 }
 0x2ab   : > { %v6645_v49 = vadd.f32 %v4314_v45, %v4313_v11  ;;  %v5358_v45 = vpack.c.bf16 %v6653_v47, %v6651_v31  ;;  %v6701_v47 = vld [vmem:[#allocation2 + $0x3e8] sm:$0xff] }
 0x2ad   : > { %v4316_v1 = vpop.f32.mrb[20].mxu1 }
 0x2ae   : > { %v4317_v14 = vpop.f32.mrb[21].mxu1 }
 0x2af   : > { %v6647_v53 = vadd.f32 %v4317_v14, %v4316_v1  ;;  %v6689_v14 = vld [vmem:[#allocation2 + $0x460] sm:$0xff] }
 0x2b1   : > { %v4319_v48 = vpop.f32.mrb[22].mxu1 }
 0x2b2   : > { %v4320_v59 = vpop.f32.mrb[23].mxu1 }
 0x2b3   : > { %v6663_v63 = vadd.f32 %v4320_v59, %v4319_v48  ;;  %v6691_v48 = vld [vmem:[#allocation2 + $0x468] sm:$0xff] }
 0x2b5   : > { %v4932_v37 = vpop.f32.mrb[24].mxu1 }
 0x2b6   : > { %v1620_v33 = vadd.f32 %v4932_v37, %v1495_v25  ;;  %v1614_v11 = vpop.f32.mrb[25].mxu1  ;;  %v1500_v25 = vadd.f32 %v6633_v20, %v6649_v5 }
 0x2b7   : > { %v1615_v59 = vadd.f32 %v1614_v11, %v1490_v40 }
 0x2b8   : > { %v1686_v1 = vmul.f32 0.01, %v1620_v33  ;;  %vm1674_vm15 = vcmp.gt.f32.partialorder %v1620_v33, 0.0 }
 0x2b9   : > { %v1685_v11 = vmul.f32 0.01, %v1615_v59  ;;  %v4935_v61 = vpop.f32.mrb[26].mxu1  ;;  %vm1673_vm8 = vcmp.gt.f32.partialorder %v1615_v59, 0.0 }
 0x2ba   : > { %v1630_v37 = vadd.f32 %v4935_v61, %v1505_v2  ;;  %v1624_v6 = vpop.f32.mrb[27].mxu1  ;;  %v1698_v20 = vsel %vm1674_vm15, %v1620_v33, %v1686_v1  ;;  %v1525_v2 = vadd.f32 %v6641_v13, %v6649_v5  ;;  %v1520_v61 = vadd.f32 %v6639_v38, %v6649_v5 }
 0x2bb   : > { %v1625_v40 = vadd.f32 %v1624_v6, %v1500_v25  ;;  %v1697_v57 = vsel %vm1673_vm8, %v1615_v59, %v1685_v11  ;;  %v1535_v6 = vadd.f32 %v6645_v49, %v6649_v5  ;;  %v1748_v59 = vrot.slane %v1698_v20, 1 }
 0x2bc   : > { %vm1676_vm9 = vcmp.gt.f32.partialorder %v1630_v37, 0.0  ;;  %v1688_v62 = vmul.f32 0.01, %v1630_v37  ;;  %1901 = vmatprep.mubr.f32.mxu0 %v1697_v57  ;;  %v6729_v13 = vadd.f32 %v6647_v53, %v6649_v5  ;;  %v1545_v53 = vadd.f32 %v6663_v63, %v6649_v5 }
 0x2bd   : > { %v1687_v32 = vmul.f32 0.01, %v1625_v40  ;;  %v4938_v31 = vpop.f32.mrb[28].mxu1  ;;  %1902 = vmatmul.mubr.f32.vlgmr.msra.gmra.mrb[24].mxu0 %v7527_v28  ;;  %vm1675_vm11 = vcmp.gt.f32.partialorder %v1625_v40, 0.0  ;;  %v7528_v63 = vpack.c.bf16 %v6661_v15, %v6659_v4 }
 0x2be   : > { %v1700_v33 = vsel %vm1676_vm9, %v1630_v37, %v1688_v62  ;;  %v1640_v1 = vadd.f32 %v4938_v31, %v1515_v58  ;;  %v1634_v57 = vpop.f32.mrb[29].mxu1  ;;  %1906 = vmatprep.mubr.f32.mxu0 %v1698_v20  ;;  %5359 = vmatpush3.bf16.msra.mxu0 %v5358_v45  ;;  %v1712_v58 = vrot.slane %v1698_v20, 7 }
 0x2bf   : > { %v1635_v38 = vadd.f32 %v1634_v57, %v1510_v39  ;;  %v1699_v25 = vsel %vm1675_vm11, %v1625_v40, %v1687_v32  ;;  %v1750_v56 = vrot.slane %v1700_v33, 1  ;;  %v1714_v30 = vrot.slane %v1700_v33, 7  ;;  %5361 = vmatprep.subr.bf16.mxu0 %v5360_v50 }
 0x2c0   : > { %vm1678_vm15 = vcmp.gt.f32.partialorder %v1640_v1, 0.0  ;;  %v1690_v49 = vmul.f32 0.01, %v1640_v1  ;;  %v1713_v11 = vrot.slane %v1699_v25, 7  ;;  %v1749_v7 = vrot.slane %v1699_v25, 1 }
 0x2c1   : > { %vm1677_vm8 = vcmp.gt.f32.partialorder %v1635_v38, 0.0  ;;  %v1689_v62 = vmul.f32 0.01, %v1635_v38  ;;  %v4941_v43 = vpop.f32.mrb[30].mxu1  ;;  %1907 = vmatmul.mubr.f32.gmra.mrb[26].mxu0 %v7527_v28 }
 0x2c2   : > { %v6734_v37 = vsel %vm1678_vm15, %v1640_v1, %v1690_v49  ;;  %v1650_v39 = vadd.f32 %v4941_v43, %v1525_v2  ;;  %v1644_v45 = vpop.f32.mrb[31].mxu1  ;;  %1911 = vmatprep.mubr.f32.mxu0 %v1699_v25  ;;  %v1768_v50 = vsel %vm827_vm1, %v1748_v59, %v1749_v7  ;;  %v1767_v31 = vsel %vm827_vm1, %v1749_v7, %v1750_v56 }
 0x2c3   : > { %v1701_v40 = vsel %vm1677_vm8, %v1635_v38, %v1689_v62  ;;  %v1645_v32 = vadd.f32 %v1644_v45, %v1520_v61  ;;  %4981 = vmatmul.mubr.msk.f32.vlgmr.msra.gmra.mrb[36].mxu1 %vm561_vm2, %v1768_v50  ;;  %v1732_v20 = vsel %vm790_vm0, %v1712_v58, %v1713_v11  ;;  %v1752_v5 = vrot.slane %v6734_v37, 1  ;;  %5363 = vmatpush3.bf16.msra.mxu0 %v7528_v63 }
 0x2c4   : > { %vm1680_vm9 = vcmp.gt.f32.partialorder %v1650_v39, 0.0  ;;  %v1692_v2 = vmul.f32 0.01, %v1650_v39  ;;  %4983 = vmatprep.mubr.f32.mxu1 %v1767_v31  ;;  %v1751_v1 = vrot.slane %v1701_v40, 1  ;;  %v1731_v7 = vsel %vm790_vm0, %v1713_v11, %v1714_v30  ;;  %5391 = vmatpush3.bf16.msra.mxu1 %v6630_v55 }
 0x2c5   : > { %v7529_v61 = vpack.c.bf16 %v6667_v27, %v6665_v21  ;;  %vm1679_vm11 = vcmp.gt.f32.partialorder %v1645_v32, 0.0  ;;  %v1691_v57 = vmul.f32 0.01, %v1645_v32  ;;  %v4944_v59 = vpop.f32.mrb[32].mxu1  ;;  %4215 = vmatmul.mubr.msk.f32.gmra.mrb[28].mxu0 %vm514_vm3, %v1732_v20  ;;  %v1715_v38 = vrot.slane %v1701_v40, 7  ;;  %5393 = vmatprep.subr.bf16.mxu1 %v6714_v35 }
 0x2c6   : > { %v1716_v4 = vrot.slane %v6734_v37, 7  ;;  %v6757_v15 = vsel %vm1680_vm9, %v1650_v39, %v1692_v2  ;;  %v1660_v25 = vadd.f32 %v4944_v59, %v1535_v6  ;;  %v1654_v49 = vpop.f32.mrb[33].mxu1  ;;  %1916 = vmatprep.mubr.f32.mxu0 %v1700_v33  ;;  %v1766_v21 = vsel %vm827_vm1, %v1750_v56, %v1751_v1 }
 0x2c7   : > { %5365 = vmatprep.subr.bf16.mxu0 %v7529_v61  ;;  %v1765_v27 = vsel %vm827_vm1, %v1751_v1, %v1752_v5  ;;  %v1703_v11 = vsel %vm1679_vm11, %v1645_v32, %v1691_v57  ;;  %v1655_v62 = vadd.f32 %v1654_v49, %v1530_v52  ;;  %4984 = vmatmul.mubr.f32.gmra.mrb[38].mxu1 %v1766_v21  ;;  %v1754_v58 = vrot.slane %v6757_v15, 1  ;;  %v2235_v21 = vld [vmem:[#allocation2 + $0x470] sm:$0xff] }
 0x2c8   : > { %v1730_v43 = vsel %vm790_vm0, %v1714_v30, %v1715_v38  ;;  %v7530_v55 = vpack.c.bf16 %v6672_v26, %v6669_v29  ;;  %vm1682_vm15 = vcmp.gt.f32.partialorder %v1660_v25, 0.0  ;;  %v1694_v6 = vmul.f32 0.01, %v1660_v25  ;;  %4986 = vmatprep.mubr.f32.mxu1 %v1765_v27  ;;  %5395 = vmatpush3.bf16.msra.mxu1 %v6714_v35  ;;  %v2236_v27 = vld [vmem:[#allocation2 + $0x478] sm:$0xff] }
 0x2c9   : > { %v1753_v33 = vrot.slane %v1703_v11, 1  ;;  %v1729_v56 = vsel %vm790_vm0, %v1715_v38, %v1716_v4  ;;  %v7531_v52 = vpack.c.bf16 %v6676_v36, %v6674_v34  ;;  %vm1681_vm8 = vcmp.gt.f32.partialorder %v1655_v62, 0.0  ;;  %v4947_v45 = vpop.f32.mrb[34].mxu1  ;;  %1917 = vmatmul.mubr.f32.gmra.mrb[30].mxu0 %v1731_v7 }
 0x2ca   : > { %5367 = vmatpush3.bf16.msra.mxu0 %v7530_v55  ;;  %v1693_v39 = vmul.f32 0.01, %v1655_v62  ;;  %v1717_v30 = vrot.slane %v1703_v11, 7  ;;  %v1718_v50 = vrot.slane %v6757_v15, 7  ;;  %v1706_v29 = vsel %vm1682_vm15, %v1660_v25, %v1694_v6  ;;  %v1664_v31 = vpop.f32.mrb[35].mxu1  ;;  %1921 = vmatprep.mubr.f32.mxu0 %v1701_v40  ;;  %v2246_v25 = vld [vmem:[#allocation2 + $0x4c8] sm:$0xff] }
 0x2cb   : > { %5369 = vmatprep.subr.bf16.mxu0 %v7531_v52  ;;  %v1670_v26 = vadd.f32 %v4947_v45, %v1545_v53  ;;  %v1764_v32 = vsel %vm827_vm1, %v1752_v5, %v1753_v33  ;;  %v1763_v34 = vsel %vm827_vm1, %v1753_v33, %v1754_v58  ;;  %v1665_v20 = vadd.f32 %v1664_v31, %v6729_v13  ;;  %v2248_v55 = vld [vmem:[#allocation2 + $0x4d8] sm:$0xff]  ;;  %v2238_v52 = vld [vmem:[#allocation2 + $0x488] sm:$0xff] }
 0x2cc   : > { %v1705_v36 = vsel %vm1681_vm8, %v1655_v62, %v1693_v39  ;;  %4987 = vmatmul.mubr.f32.gmra.mrb[40].mxu1 %v1764_v32  ;;  %v1756_v63 = vrot.slane %v1706_v29, 1  ;;  %v1728_v2 = vsel %vm790_vm0, %v1716_v4, %v1717_v30  ;;  %v7532_v1 = vpack.c.bf16 %v6681_v42, %v6679_v41  ;;  %v2249_v39 = vld [vmem:[#allocation2 + $0x4e0] sm:$0xff]  ;;  %v2239_v32 = vld [vmem:[#allocation2 + $0x490] sm:$0xff] }
 0x2cd   : > { %4989 = vmatprep.mubr.f32.mxu1 %v1763_v34  ;;  %v1755_v53 = vrot.slane %v1705_v36, 1  ;;  %v1727_v40 = vsel %vm790_vm0, %v1717_v30, %v1718_v50  ;;  %v1719_v5 = vrot.slane %v1705_v36, 7  ;;  %v7533_v7 = vpack.c.bf16 %v6691_v48, %v6689_v14  ;;  %1922 = vmatmul.mubr.f32.gmra.mrb[32].mxu0 %v1730_v43  ;;  %v2247_v43 = vld [vmem:[#allocation2 + $0x4d0] sm:$0xff]  ;;  %v2221_v30 = vld [vmem:[#allocation2 + $0x400] sm:$0xff]  ;;  %v2240_v34 = vld [vmem:[#allocation2 + $0x498] sm:$0xff] }
 0x2ce   : > { %5371 = vmatpush3.bf16.msra.mxu0 %v7532_v1  ;;  %vm1683_vm9 = vcmp.gt.f32.partialorder %v1665_v20, 0.0  ;;  %v1695_v13 = vmul.f32 0.01, %v1665_v20  ;;  %v1720_v61 = vrot.slane %v1706_v29, 7  ;;  %1926 = vmatprep.mubr.f32.mxu0 %v6734_v37  ;;  %v7534_v48 = vpack.c.bf16 %v6701_v47, %v6693_v51  ;;  %v2224_v1 = vld [vmem:[#allocation2 + $0x418] sm:$0xff] }
 0x2cf   : > { %5373 = vmatprep.subr.bf16.mxu0 %v7533_v7  ;;  %v1762_v41 = vsel %vm827_vm1, %v1754_v58, %v1755_v53  ;;  %v1761_v42 = vsel %vm827_vm1, %v1755_v53, %v1756_v63  ;;  %v1726_v57 = vsel %vm790_vm0, %v1718_v50, %v1719_v5  ;;  %v1696_v51 = vmul.f32 0.01, %v1670_v26  ;;  %v2220_v58 = vld [vmem:[#allocation2 + $0x3f8] sm:$0xff]  ;;  %v2222_v50 = vld [vmem:[#allocation2 + $0x408] sm:$0xff] }
 0x2d0   : > { %v1707_v59 = vsel %vm1683_vm9, %v1665_v20, %v1695_v13  ;;  %4990 = vmatmul.mubr.f32.gmra.mrb[42].mxu1 %v1762_v41  ;;  %v1725_v14 = vsel %vm790_vm0, %v1719_v5, %v1720_v61  ;;  %vm1684_vm11 = vcmp.gt.f32.partialorder %v1670_v26, 0.0  ;;  %v5376_v62 = vpack.c.bf16 %v2236_v27, %v2235_v21  ;;  %v2253_v5 = vld [vmem:[#allocation2 + $0x500] sm:$0xff]  ;;  %v2254_v7 = vld [vmem:[#allocation2 + $0x508] sm:$0xff]  ;;  %v2256_v41 = vld [vmem:[#allocation2 + $0x518] sm:$0xff] }
 0x2d1   : > { %v1721_v35 = vrot.slane %v1707_v59, 7  ;;  %v1757_v37 = vrot.slane %v1707_v59, 1  ;;  %4992 = vmatprep.mubr.f32.mxu1 %v1761_v42  ;;  %1927 = vmatmul.mubr.f32.gmra.mrb[34].mxu0 %v1729_v56  ;;  %v1708_v47 = vsel %vm1684_vm11, %v1670_v26, %v1696_v51  ;;  %v5400_v33 = vpack.c.bf16 %v2248_v55, %v2247_v43  ;;  %v2237_v56 = vld [vmem:[#allocation2 + $0x480] sm:$0xff] }
 0x2d2   : > { %5375 = vmatpush3.bf16.msra.mxu0 %v7534_v48  ;;  %1931 = vmatprep.mubr.f32.mxu0 %v1703_v11  ;;  %v2219_v11 = vld [vmem:[#allocation2 + $0x3f0] sm:$0xff]  ;;  %v5380_v45 = vpack.c.bf16 %v2238_v52, %v2237_v56  ;;  %v5382_v26 = vpack.c.bf16 %v2222_v50, %v2221_v30  ;;  %v5384_v20 = vpack.c.bf16 %v2240_v34, %v2239_v32 }
 0x2d3   : > { %v1760_v38 = vsel %vm827_vm1, %v1756_v63, %v1757_v37  ;;  %v1724_v4 = vsel %vm790_vm0, %v1720_v61, %v1721_v35  ;;  %v5378_v6 = vpack.c.bf16 %v2220_v58, %v2219_v11  ;;  %5377 = vmatprep.subr.bf16.mxu0 %v5376_v62  ;;  %v2252_v63 = vld [vmem:[#allocation2 + $0x4f8] sm:$0xff]  ;;  %v5412_v13 = vpack.c.bf16 %v2254_v7, %v2253_v5  ;;  %v2255_v61 = vld [vmem:[#allocation2 + $0x510] sm:$0xff]  ;;  %v2640_v35 = vld [vmem:[#allocation2 + $0x5a8] sm:$0xff] }
 0x2d4   : > { %4993 = vmatmul.mubr.msk.f32.gmra.mrb[44].mxu1 %vm581_vm7, %v1760_v38  ;;  %v5416_v42 = vpack.c.bf16 %v2256_v41, %v2255_v61 }
 0x2d5   : > { %4995 = vmatprep.mubr.f32.mxu1 %v7527_v28  ;;  %1932 = vmatmul.mubr.f32.gmra.mrb[36].mxu0 %v1728_v2  ;;  %v2223_v2 = vld [vmem:[#allocation2 + $0x410] sm:$0xff] }
 0x2d6   : > { %1936 = vmatprep.mubr.f32.mxu0 %v6757_v15  ;;  %v2245_v15 = vld [vmem:[#allocation2 + $0x4c0] sm:$0xff]  ;;  %5379 = vmatpush3.bf16.msra.mxu0 %v5378_v6 }
 0x2d7   : > { %v5396_v49 = vpack.c.bf16 %v2246_v25, %v2245_v15  ;;  %5381 = vmatprep.subr.bf16.mxu0 %v5380_v45  ;;  %v2658_v45 = vld [vmem:[#allocation2 + $0x638] sm:$0xff] }
 0x2d8   : > { %4996 = vmatmul.mubr.f32.gmra.mrb[46].mxu1 %v7527_v28 }
 0x2d9   : > { %5030 = vmatprep.mubr.f32.mxu1 %v7527_v28  ;;  %1937 = vmatmul.mubr.f32.gmra.mrb[38].mxu0 %v1727_v40  ;;  %v5386_v40 = vpack.c.bf16 %v2224_v1, %v2223_v2  ;;  %v2659_v1 = vld [vmem:[#allocation2 + $0x640] sm:$0xff] }
 0x2da   : > { %1941 = vmatprep.mubr.f32.mxu0 %v1705_v36  ;;  %5397 = vmatprep.subr.bf16.mxu1 %v5396_v49  ;;  %v2251_v36 = vld [vmem:[#allocation2 + $0x4f0] sm:$0xff] }
 0x2db   : > { %5399 = vmatpush3.bf16.msra.mxu1 %v5396_v49  ;;  %5383 = vmatpush3.bf16.msra.mxu0 %v5382_v26  ;;  %v5408_v53 = vpack.c.bf16 %v2252_v63, %v2251_v36 }
 0x2dc   : > { %5401 = vmatprep.subr.bf16.mxu1 %v5400_v33  ;;  %5385 = vmatprep.subr.bf16.mxu0 %v5384_v20 }
 0x2dd   : > { %1942 = vmatmul.mubr.f32.gmra.mrb[40].mxu0 %v1726_v57  ;;  %v2655_v57 = vld [vmem:[#allocation2 + $0x620] sm:$0xff] }
 0x2de   : > { %1946 = vmatprep.mubr.f32.mxu0 %v1706_v29  ;;  %v2250_v29 = vld [vmem:[#allocation2 + $0x4e8] sm:$0xff] }
 0x2df   : > { %5403 = vmatpush3.bf16.msra.mxu1 %v5400_v33  ;;  %v5404_v31 = vpack.c.bf16 %v2250_v29, %v2249_v39  ;;  %5387 = vmatpush3.bf16.msra.mxu0 %v5386_v40  ;;  %v2657_v39 = vld [vmem:[#allocation2 + $0x630] sm:$0xff] }
 0x2e0   : > { %v5456_v34 = vpack.c.bf16 %v2658_v45, %v2657_v39  ;;  %v2626_v39 = vld [vmem:[#allocation2 + $0x538] sm:$0xff] }
 0x2e1   : > { %1947 = vmatmul.mubr.f32.gmra.mrb[42].mxu0 %v1725_v14  ;;  %5405 = vmatprep.subr.bf16.mxu1 %v5404_v31  ;;  %v2639_v14 = vld [vmem:[#allocation2 + $0x5a0] sm:$0xff] }
 0x2e2   : > { %1951 = vmatprep.mubr.f32.mxu0 %v1707_v59  ;;  %v2656_v59 = vld [vmem:[#allocation2 + $0x628] sm:$0xff]  ;;  %v5420_v37 = vpack.c.bf16 %v2640_v35, %v2639_v14 }
 0x2e3   : > { %5407 = vmatpush3.bf16.msra.mxu1 %v5404_v31  ;;  %v5452_v48 = vpack.c.bf16 %v2656_v59, %v2655_v57  ;;  %v2623_v59 = vld [vmem:[#allocation2 + $0x520] sm:$0xff]  ;;  %v2624_v14 = vld [vmem:[#allocation2 + $0x528] sm:$0xff] }
 0x2e4   : > { %5409 = vmatprep.subr.bf16.mxu1 %v5408_v53 }
 0x2e5   : > { %4216 = vmatmul.mubr.msk.f32.gmra.mrb[44].mxu0 %vm534_vm6, %v1724_v4  ;;  %5453 = vmatprep.subr.bf16.mxu0 %v5452_v48 }
 0x2e6   : > { %1956 = vmatprep.mubr.f32.mxu0 %v1708_v47  ;;  %v6817_v47 = vld [vmem:[#allocation5 + $0x2] ss:$0 sm:$0xff] }
 0x2e7   : > { %5411 = vmatpush3.bf16.msra.mxu1 %v5408_v53  ;;  %v2660_v53 = vld [vmem:[#allocation2 + $0x648] sm:$0xff] }
 0x2e8   : > { %5413 = vmatprep.subr.bf16.mxu1 %v5412_v13  ;;  %v5460_v35 = vpack.c.bf16 %v2660_v53, %v2659_v1 }
 0x2e9   : > { %1957 = vmatmul.mubr.f32.gmra.mrb[46].mxu0 %v7527_v28 }
 0x2eb   : > { %5415 = vmatpush3.bf16.msra.mxu1 %v5412_v13 }
 0x2ec   : > { %5417 = vmatprep.subr.bf16.mxu1 %v5416_v42 }
 0x2ef   : > { %5419 = vmatpush3.bf16.msra.mxu1 %v5416_v42 }
 0x2f0   : > { %5421 = vmatprep.subr.bf16.mxu1 %v5420_v37 }
 0x390   : > { %v4382_v38 = vpop.f32.mrb[24].mxu0 }
 0x391   : > { %v4383_v4 = vpop.f32.mrb[25].mxu0 }
 0x392   : > { %v4384_v51 = vadd.f32 %v4383_v4, %v4382_v38  ;;  %v2641_v38 = vld [vmem:[#allocation2 + $0x5b0] sm:$0xff] }
 0x394   : > { %v4385_v15 = vpop.f32.mrb[26].mxu0  ;;  %v1904_v27 = vadd.f32 %v4384_v51, %v6817_v47 }
 0x395   : > { %v4386_v25 = vpop.f32.mrb[27].mxu0 }
 0x396   : > { %v4387_v49 = vadd.f32 %v4386_v25, %v4385_v15  ;;  %v4982_v21 = vpop.f32.mrb[36].mxu1  ;;  %v2642_v15 = vld [vmem:[#allocation2 + $0x5b8] sm:$0xff]  ;;  %v2661_v25 = vld [vmem:[#allocation2 + $0x650] sm:$0xff] }
 0x397   : > { %v2028_v11 = vpop.f32.mrb[37].mxu1 }
 0x398   : > { %v1909_v62 = vadd.f32 %v4387_v49, %v6817_v47  ;;  %v2029_v58 = vadd.f32 %v2028_v11, %v1904_v27  ;;  %v4388_v43 = vpop.f32.mrb[28].mxu0  ;;  %v2662_v49 = vld [vmem:[#allocation2 + $0x658] sm:$0xff] }
 0x399   : > { %v4389_v55 = vpop.f32.mrb[29].mxu0 }
 0x39a   : > { %v2034_v6 = vadd.f32 %v4982_v21, %v1909_v62  ;;  %v6822_v33 = vadd.f32 %v2029_v58, %v6513_v46  ;;  %v4390_v56 = vadd.f32 %v4389_v55, %v4388_v43  ;;  %v4985_v52 = vpop.f32.mrb[38].mxu1  ;;  %v5422_v58 = vpack.c.bf16 %v2624_v14, %v2623_v59 }
 0x39b   : > { %v2038_v30 = vpop.f32.mrb[39].mxu1 }
 0x39c   : > { %v6825_v50 = vadd.f32 %v2034_v6, %v6518_v10  ;;  %v1914_v29 = vadd.f32 %v4390_v56, %v6817_v47  ;;  %v4391_v26 = vpop.f32.mrb[30].mxu0  ;;  %vm2099_vm15 = vcmp.gt.f32.partialorder %v6822_v33, 0.0  ;;  %v2111_v31 = vmul.f32 0.01, %v6822_v33 }
 0x39d   : > { %v4392_v32 = vpop.f32.mrb[31].mxu0 }
 0x39e   : > { %v2039_v36 = vadd.f32 %v2038_v30, %v1914_v29  ;;  %v4393_v46 = vadd.f32 %v4392_v32, %v4391_v26  ;;  %v2123_v63 = vsel %vm2099_vm15, %v6822_v33, %v2111_v31  ;;  %vm2100_vm8 = vcmp.gt.f32.partialorder %v6825_v50, 0.0 }
 0x39f   : > { %v6830_v20 = vpop.f32.mrb[40].mxu1  ;;  %2327 = vmatprep.mubr.f32.mxu0 %v2123_v63  ;;  %v2112_v10 = vmul.f32 0.01, %v6825_v50  ;;  %v5424_v29 = vpack.c.bf16 %v2642_v15, %v2641_v38  ;;  %v5464_v26 = vpack.c.bf16 %v2662_v49, %v2661_v25  ;;  %v2643_v63 = vld [vmem:[#allocation2 + $0x5c0] sm:$0xff]  ;;  %v2645_v25 = vld [vmem:[#allocation2 + $0x5d0] sm:$0xff]  ;;  %v2646_v49 = vld [vmem:[#allocation2 + $0x5d8] sm:$0xff] }
 0x3a0   : > { %v2048_v2 = vpop.f32.mrb[41].mxu1  ;;  %v6836_v40 = vadd.f32 %v2039_v36, %v6523_v17  ;;  %v1919_v5 = vadd.f32 %v4393_v46, %v6817_v47  ;;  %v4394_v7 = vpop.f32.mrb[32].mxu0  ;;  %2328 = vmatmul.mubr.f32.vlgmr.msra.gmra.mrb[48].mxu0 %v7527_v28 }
 0x3a1   : > { %v4395_v13 = vpop.f32.mrb[33].mxu0  ;;  %v2124_v61 = vsel %vm2100_vm8, %v6825_v50, %v2112_v10  ;;  %5455 = vmatpush3.bf16.msra.mxu0 %v5452_v48 }
 0x3a2   : > { %v2044_v41 = vadd.f32 %v4985_v52, %v1919_v5  ;;  %v4396_v42 = vadd.f32 %v4395_v13, %v4394_v7  ;;  %2332 = vmatprep.mubr.f32.mxu0 %v2124_v61  ;;  %5457 = vmatprep.subr.bf16.mxu0 %v5456_v34  ;;  %vm2101_vm9 = vcmp.gt.f32.partialorder %v6836_v40, 0.0  ;;  %v2113_v37 = vmul.f32 0.01, %v6836_v40  ;;  %v2625_v52 = vld [vmem:[#allocation2 + $0x530] sm:$0xff] }
 0x3a3   : > { %v6841_v57 = vpop.f32.mrb[42].mxu1  ;;  %v2138_v21 = vrot.slane %v2124_v61, 7  ;;  %v2174_v27 = vrot.slane %v2124_v61, 1  ;;  %v5426_v1 = vpack.c.bf16 %v2626_v39, %v2625_v52 }
 0x3a4   : > { %v6843_v17 = vpop.f32.mrb[43].mxu1  ;;  %v6848_v4 = vadd.f32 %v2044_v41, %v6533_v0  ;;  %v1924_v48 = vadd.f32 %v4396_v42, %v6817_v47  ;;  %v4397_v51 = vpop.f32.mrb[34].mxu0  ;;  %2333 = vmatmul.mubr.f32.gmra.mrb[50].mxu0 %v7527_v28  ;;  %v2125_v62 = vsel %vm2101_vm9, %v6836_v40, %v2113_v37  ;;  %v2627_v41 = vld [vmem:[#allocation2 + $0x540] sm:$0xff]  ;;  %v2628_v42 = vld [vmem:[#allocation2 + $0x548] sm:$0xff] }
 0x3a5   : > { %v4398_v11 = vpop.f32.mrb[35].mxu0  ;;  %5459 = vmatpush3.bf16.msra.mxu0 %v5456_v34  ;;  %v2139_v6 = vrot.slane %v2125_v62, 7  ;;  %v2175_v0 = vrot.slane %v2125_v62, 1  ;;  %2337 = vmatprep.mubr.f32.mxu0 %v2125_v62 }
 0x3a6   : > { %v2049_v43 = vadd.f32 %v2048_v2, %v1924_v48  ;;  %v4399_v55 = vadd.f32 %v4398_v11, %v4397_v51  ;;  %5461 = vmatprep.subr.bf16.mxu0 %v5460_v35  ;;  %vm2102_vm11 = vcmp.gt.f32.partialorder %v6848_v4, 0.0  ;;  %v2114_v30 = vmul.f32 0.01, %v6848_v4  ;;  %v2644_v2 = vld [vmem:[#allocation2 + $0x5c8] sm:$0xff] }
 0x3a7   : > { %v6853_v56 = vpop.f32.mrb[44].mxu1  ;;  %v2158_v36 = vsel %vm790_vm0, %v2138_v21, %v2139_v6  ;;  %v2194_v46 = vsel %vm827_vm1, %v2174_v27, %v2175_v0  ;;  %v5428_v37 = vpack.c.bf16 %v2644_v2, %v2643_v63 }
 0x3a8   : > { %v6855_v45 = vpop.f32.mrb[45].mxu1  ;;  %v6860_v31 = vadd.f32 %v2049_v43, %v6540_v23  ;;  %v1929_v32 = vadd.f32 %v4399_v55, %v6817_v47  ;;  %v4400_v34 = vpop.f32.mrb[36].mxu0  ;;  %4220 = vmatmul.mubr.msk.f32.gmra.mrb[52].mxu0 %vm514_vm3, %v2158_v36  ;;  %5031 = vmatmul.mubr.msk.f32.vlgmr.msra.gmra.mrb[48].mxu1 %vm561_vm2, %v2194_v46  ;;  %v2126_v23 = vsel %vm2102_vm11, %v6848_v4, %v2114_v30  ;;  %v2629_v43 = vld [vmem:[#allocation2 + $0x550] sm:$0xff]  ;;  %v2630_v55 = vld [vmem:[#allocation2 + $0x558] sm:$0xff] }
 0x3a9   : > { %v4401_v10 = vpop.f32.mrb[37].mxu0  ;;  %v2140_v7 = vrot.slane %v2126_v23, 7  ;;  %v2176_v13 = vrot.slane %v2126_v23, 1  ;;  %2342 = vmatprep.mubr.f32.mxu0 %v2126_v23  ;;  %5423 = vmatpush3.bf16.msra.mxu1 %v5422_v58  ;;  %v2631_v23 = vld [vmem:[#allocation2 + $0x560] sm:$0xff] }
 0x3aa   : > { %v2054_v53 = vadd.f32 %v6830_v20, %v1929_v32  ;;  %v4402_v5 = vadd.f32 %v4401_v10, %v4400_v34  ;;  %vm2103_vm15 = vcmp.gt.f32.partialorder %v6860_v31, 0.0  ;;  %v2115_v59 = vmul.f32 0.01, %v6860_v31  ;;  %5425 = vmatprep.subr.bf16.mxu1 %v5424_v29  ;;  %5463 = vmatpush3.bf16.msra.mxu0 %v5460_v35  ;;  %v2647_v32 = vld [vmem:[#allocation2 + $0x5e0] sm:$0xff]  ;;  %v2648_v34 = vld [vmem:[#allocation2 + $0x5e8] sm:$0xff] }
 0x3ab   : > { %v6873_v61 = vpop.f32.mrb[46].mxu1  ;;  %v2157_v51 = vsel %vm790_vm0, %v2139_v6, %v2140_v7  ;;  %v2193_v15 = vsel %vm827_vm1, %v2175_v0, %v2176_v13  ;;  %5465 = vmatprep.subr.bf16.mxu0 %v5464_v26  ;;  %v5430_v35 = vpack.c.bf16 %v2628_v42, %v2627_v41  ;;  %v5432_v0 = vpack.c.bf16 %v2646_v49, %v2645_v25 }
 0x3ac   : > { %v6877_v14 = vpop.f32.mrb[47].mxu1  ;;  %v6880_v20 = vadd.f32 %v2054_v53, %v6547_v8  ;;  %v1934_v38 = vadd.f32 %v4402_v5, %v6817_v47  ;;  %v4403_v48 = vpop.f32.mrb[38].mxu0  ;;  %2343 = vmatmul.mubr.f32.gmra.mrb[54].mxu0 %v2157_v51  ;;  %5033 = vmatprep.mubr.f32.mxu1 %v2193_v15  ;;  %v2127_v8 = vsel %vm2103_vm15, %v6860_v31, %v2115_v59 }
 0x3ad   : > { %v4404_v21 = vpop.f32.mrb[39].mxu0  ;;  %v2141_v62 = vrot.slane %v2127_v8, 7  ;;  %v2177_v58 = vrot.slane %v2127_v8, 1  ;;  %2347 = vmatprep.mubr.f32.mxu0 %v2127_v8  ;;  %5427 = vmatpush3.bf16.msra.mxu1 %v5426_v1  ;;  %v2632_v1 = vld [vmem:[#allocation2 + $0x568] sm:$0xff]  ;;  %v5436_v5 = vpack.c.bf16 %v2648_v34, %v2647_v32 }
 0x3ae   : > { %v2059_v27 = vadd.f32 %v6843_v17, %v1934_v38  ;;  %v4405_v11 = vadd.f32 %v4404_v21, %v4403_v48  ;;  %vm2104_vm8 = vcmp.gt.f32.partialorder %v6880_v20, 0.0  ;;  %v2116_v6 = vmul.f32 0.01, %v6880_v20  ;;  %5429 = vmatprep.subr.bf16.mxu1 %v5428_v37  ;;  %5467 = vmatpush3.bf16.msra.mxu0 %v5464_v26 }
 0x3af   : > { %v2156_v30 = vsel %vm790_vm0, %v2140_v7, %v2141_v62  ;;  %v2192_v29 = vsel %vm827_vm1, %v2176_v13, %v2177_v58  ;;  %v5434_v26 = vpack.c.bf16 %v2630_v55, %v2629_v43  ;;  %v5438_v38 = vpack.c.bf16 %v2632_v1, %v2631_v23 }
 0x3b0   : > { %v6894_v52 = vadd.f32 %v2059_v27, %v6554_v9  ;;  %v1939_v39 = vadd.f32 %v4405_v11, %v6817_v47  ;;  %v4406_v17 = vpop.f32.mrb[40].mxu0  ;;  %2348 = vmatmul.mubr.f32.gmra.mrb[56].mxu0 %v2156_v30  ;;  %5034 = vmatmul.mubr.f32.gmra.mrb[50].mxu1 %v2192_v29  ;;  %v2128_v46 = vsel %vm2104_vm8, %v6880_v20, %v2116_v6 }
 0x3b1   : > { %v4407_v36 = vpop.f32.mrb[41].mxu0  ;;  %v2142_v2 = vrot.slane %v2128_v46, 7  ;;  %v2178_v10 = vrot.slane %v2128_v46, 1  ;;  %2352 = vmatprep.mubr.f32.mxu0 %v2128_v46  ;;  %5431 = vmatpush3.bf16.msra.mxu1 %v5430_v35 }
 0x3b2   : > { %v2064_v9 = vadd.f32 %v6841_v57, %v1939_v39  ;;  %v4408_v63 = vadd.f32 %v4407_v36, %v4406_v17  ;;  %vm2105_vm9 = vcmp.gt.f32.partialorder %v6894_v52, 0.0  ;;  %v2117_v53 = vmul.f32 0.01, %v6894_v52  ;;  %5433 = vmatprep.subr.bf16.mxu1 %v5432_v0 }
 0x3b3   : > { %v2155_v57 = vsel %vm790_vm0, %v2141_v62, %v2142_v2  ;;  %v2191_v42 = vsel %vm827_vm1, %v2177_v58, %v2178_v10 }
 0x3b4   : > { %v6906_v7 = vadd.f32 %v2064_v9, %v6561_v54  ;;  %v1944_v13 = vadd.f32 %v4408_v63, %v6817_v47  ;;  %v4409_v41 = vpop.f32.mrb[42].mxu0  ;;  %2353 = vmatmul.mubr.f32.gmra.mrb[58].mxu0 %v2155_v57  ;;  %5036 = vmatprep.mubr.f32.mxu1 %v2191_v42  ;;  %v2129_v37 = vsel %vm2105_vm9, %v6894_v52, %v2117_v53 }
 0x3b5   : > { %v4410_v59 = vpop.f32.mrb[43].mxu0  ;;  %v2143_v54 = vrot.slane %v2129_v37, 7  ;;  %v2179_v15 = vrot.slane %v2129_v37, 1  ;;  %2357 = vmatprep.mubr.f32.mxu0 %v2129_v37  ;;  %5435 = vmatpush3.bf16.msra.mxu1 %v5434_v26  ;;  %v2649_v37 = vld [vmem:[#allocation2 + $0x5f0] sm:$0xff] }
 0x3b6   : > { %v2069_v48 = vadd.f32 %v6855_v45, %v1944_v13  ;;  %v4411_v51 = vadd.f32 %v4410_v59, %v4409_v41  ;;  %vm2106_vm11 = vcmp.gt.f32.partialorder %v6906_v7, 0.0  ;;  %v2118_v25 = vmul.f32 0.01, %v6906_v7  ;;  %5437 = vmatprep.subr.bf16.mxu1 %v5436_v5 }
 0x3b7   : > { %v2154_v35 = vsel %vm790_vm0, %v2142_v2, %v2143_v54  ;;  %v2190_v45 = vsel %vm827_vm1, %v2178_v10, %v2179_v15 }
 0x3b8   : > { %v6918_v49 = vadd.f32 %v2069_v48, %v6568_v60  ;;  %v1949_v21 = vadd.f32 %v4411_v51, %v6817_v47  ;;  %v4412_v8 = vpop.f32.mrb[44].mxu0  ;;  %2358 = vmatmul.mubr.f32.gmra.mrb[60].mxu0 %v2154_v35  ;;  %5037 = vmatmul.mubr.f32.gmra.mrb[52].mxu1 %v2190_v45  ;;  %v2130_v11 = vsel %vm2106_vm11, %v6906_v7, %v2118_v25  ;;  %v2633_v51 = vld [vmem:[#allocation2 + $0x570] sm:$0xff]  ;;  %v2663_v25 = vld [vmem:[#allocation2 + $0x660] sm:$0xff]  ;;  %v2652_v45 = vld [vmem:[#allocation2 + $0x608] sm:$0xff] }
 0x3b9   : > { %v4413_v27 = vpop.f32.mrb[45].mxu0  ;;  %v2144_v43 = vrot.slane %v2130_v11, 7  ;;  %v2180_v60 = vrot.slane %v2130_v11, 1  ;;  %2362 = vmatprep.mubr.f32.mxu0 %v2130_v11  ;;  %5439 = vmatpush3.bf16.msra.mxu1 %v5438_v38  ;;  %v2650_v38 = vld [vmem:[#allocation2 + $0x5f8] sm:$0xff]  ;;  %v2651_v35 = vld [vmem:[#allocation2 + $0x600] sm:$0xff] }
 0x3ba   : > { %v2074_v62 = vadd.f32 %v6853_v56, %v1949_v21  ;;  %v4414_v58 = vadd.f32 %v4413_v27, %v4412_v8  ;;  %vm2107_vm15 = vcmp.gt.f32.partialorder %v6918_v49, 0.0  ;;  %v2119_v55 = vmul.f32 0.01, %v6918_v49  ;;  %v2664_v21 = vld [vmem:[#allocation2 + $0x668] sm:$0xff]  ;;  %v2635_v11 = vld [vmem:[#allocation2 + $0x580] sm:$0xff] }
 0x3bb   : > { %v2153_v17 = vsel %vm790_vm0, %v2143_v54, %v2144_v43  ;;  %v2189_v56 = vsel %vm827_vm1, %v2179_v15, %v2180_v60  ;;  %v5440_v48 = vpack.c.bf16 %v2650_v38, %v2649_v37  ;;  %v2634_v54 = vld [vmem:[#allocation2 + $0x578] sm:$0xff]  ;;  %v5468_v8 = vpack.c.bf16 %v2664_v21, %v2663_v25  ;;  %v3155_v25 = vld [vmem:[#allocation2 + $0x7a0] sm:$0xff]  ;;  %v3156_v21 = vld [vmem:[#allocation2 + $0x7a8] sm:$0xff] }
 0x3bc   : > { %v6930_v6 = vadd.f32 %v2074_v62, %v6575_v18  ;;  %v4415_v0 = vpop.f32.mrb[46].mxu0  ;;  %v1954_v39 = vadd.f32 %v4414_v58, %v6817_v47  ;;  %2363 = vmatmul.mubr.f32.gmra.mrb[62].mxu0 %v2153_v17  ;;  %5039 = vmatprep.mubr.f32.mxu1 %v2189_v56  ;;  %v2131_v29 = vsel %vm2107_vm15, %v6918_v49, %v2119_v55  ;;  %v2636_v62 = vld [vmem:[#allocation2 + $0x588] sm:$0xff]  ;;  %v2665_v17 = vld [vmem:[#allocation2 + $0x670] sm:$0xff]  ;;  %v2666_v56 = vld [vmem:[#allocation2 + $0x678] sm:$0xff] }
 0x3bd   : > { %v4416_v30 = vpop.f32.mrb[47].mxu0  ;;  %v2145_v36 = vrot.slane %v2131_v29, 7  ;;  %v2181_v18 = vrot.slane %v2131_v29, 1  ;;  %2367 = vmatprep.mubr.f32.mxu0 %v2131_v29  ;;  %v5442_v15 = vpack.c.bf16 %v2634_v54, %v2633_v51  ;;  %5441 = vmatprep.subr.bf16.mxu1 %v5440_v48  ;;  %v5444_v27 = vpack.c.bf16 %v2652_v45, %v2651_v35  ;;  %v3174_v35 = vld [vmem:[#allocation2 + $0x838] sm:$0xff] }
 0x3be   : > { %v2079_v32 = vadd.f32 %v6877_v14, %v1954_v39  ;;  %v4417_v34 = vadd.f32 %v4416_v30, %v4415_v0  ;;  %vm2108_vm8 = vcmp.gt.f32.partialorder %v6930_v6, 0.0  ;;  %v2120_v46 = vmul.f32 0.01, %v6930_v6  ;;  %5469 = vmatprep.subr.bf16.mxu0 %v5468_v8  ;;  %v2637_v0 = vld [vmem:[#allocation2 + $0x590] sm:$0xff]  ;;  %v2638_v39 = vld [vmem:[#allocation2 + $0x598] sm:$0xff] }
 0x3bf   : > { %v2152_v63 = vsel %vm790_vm0, %v2144_v43, %v2145_v36  ;;  %v2188_v2 = vsel %vm827_vm1, %v2180_v60, %v2181_v18  ;;  %5443 = vmatpush3.bf16.msra.mxu1 %v5442_v15  ;;  %v5446_v58 = vpack.c.bf16 %v2636_v62, %v2635_v11  ;;  %5471 = vmatpush3.bf16.msra.mxu0 %v5468_v8  ;;  %v2653_v43 = vld [vmem:[#allocation2 + $0x610] sm:$0xff]  ;;  %v2654_v60 = vld [vmem:[#allocation2 + $0x618] sm:$0xff] }
 0x3c0   : > { %v6942_v26 = vadd.f32 %v2079_v32, %v6582_v44  ;;  %v1959_v9 = vadd.f32 %v4417_v34, %v6817_v47  ;;  %2368 = vmatmul.mubr.f32.gmra.mrb[64].mxu0 %v2152_v63  ;;  %5040 = vmatmul.mubr.f32.gmra.mrb[54].mxu1 %v2188_v2  ;;  %v2132_v14 = vsel %vm2108_vm8, %v6930_v6, %v2120_v46  ;;  %v2667_v32 = vld [vmem:[#allocation2 + $0x680] sm:$0xff]  ;;  %v2668_v34 = vld [vmem:[#allocation2 + $0x688] sm:$0xff]  ;;  %v2670_v46 = vld [vmem:[#allocation2 + $0x698] sm:$0xff] }
 0x3c1   : > { %v2146_v23 = vrot.slane %v2132_v14, 7  ;;  %v2182_v1 = vrot.slane %v2132_v14, 1  ;;  %2372 = vmatprep.mubr.f32.mxu0 %v2132_v14  ;;  %5445 = vmatprep.subr.bf16.mxu1 %v5444_v27  ;;  %v5448_v55 = vpack.c.bf16 %v2654_v60, %v2653_v43  ;;  %v5450_v30 = vpack.c.bf16 %v2638_v39, %v2637_v0  ;;  %v3139_v63 = vld [vmem:[#allocation2 + $0x720] sm:$0xff]  ;;  %v3140_v2 = vld [vmem:[#allocation2 + $0x728] sm:$0xff]  ;;  %v3173_v8 = vld [vmem:[#allocation2 + $0x830] sm:$0xff] }
 0x3c2   : > { %v2084_v10 = vadd.f32 %v6873_v61, %v1959_v9  ;;  %vm2109_vm9 = vcmp.gt.f32.partialorder %v6942_v26, 0.0  ;;  %v2121_v44 = vmul.f32 0.01, %v6942_v26  ;;  %v5472_v29 = vpack.c.bf16 %v2666_v56, %v2665_v17  ;;  %v3157_v0 = vld [vmem:[#allocation2 + $0x7b0] sm:$0xff]  ;;  %v3158_v39 = vld [vmem:[#allocation2 + $0x7b8] sm:$0xff]  ;;  %v3175_v17 = vld [vmem:[#allocation2 + $0x840] sm:$0xff] }
 0x3c3   : > { %v2151_v53 = vsel %vm790_vm0, %v2145_v36, %v2146_v23  ;;  %v2187_v5 = vsel %vm827_vm1, %v2181_v18, %v2182_v1  ;;  %5447 = vmatpush3.bf16.msra.mxu1 %v5446_v58  ;;  %v5476_v36 = vpack.c.bf16 %v2668_v34, %v2667_v32  ;;  %v2669_v18 = vld [vmem:[#allocation2 + $0x690] sm:$0xff]  ;;  %v5484_v14 = vpack.c.bf16 %v3140_v2, %v3139_v63  ;;  %v3176_v56 = vld [vmem:[#allocation2 + $0x848] sm:$0xff] }
 0x3c4   : > { %v6954_v47 = vadd.f32 %v2084_v10, %v6590_v19  ;;  %2373 = vmatmul.mubr.f32.gmra.mrb[66].mxu0 %v2151_v53  ;;  %5042 = vmatprep.mubr.f32.mxu1 %v2187_v5  ;;  %v2133_v61 = vsel %vm2109_vm9, %v6942_v26, %v2121_v44  ;;  %v5480_v9 = vpack.c.bf16 %v2670_v46, %v2669_v18  ;;  %v3171_v10 = vld [vmem:[#allocation2 + $0x820] sm:$0xff]  ;;  %v6985_v63 = vld [vmem:[#allocation2 + $0x6a8] sm:$0xff]  ;;  %v6987_v2 = vld [vmem:[#allocation2 + $0x730] sm:$0xff] }
 0x3c5   : > { %v2147_v13 = vrot.slane %v2133_v61, 7  ;;  %v2183_v41 = vrot.slane %v2133_v61, 1  ;;  %2377 = vmatprep.mubr.f32.mxu0 %v2133_v61  ;;  %5449 = vmatprep.subr.bf16.mxu1 %v5448_v55  ;;  %v5518_v58 = vpack.c.bf16 %v3156_v21, %v3155_v25  ;;  %v5520_v55 = vpack.c.bf16 %v3174_v35, %v3173_v8  ;;  %v3162_v25 = vld [vmem:[#allocation2 + $0x7d8] sm:$0xff] }
 0x3c6   : > { %vm2110_vm11 = vcmp.gt.f32.partialorder %v6954_v47, 0.0  ;;  %v2122_v57 = vmul.f32 0.01, %v6954_v47  ;;  %5473 = vmatprep.subr.bf16.mxu0 %v5472_v29 }
 0x3c7   : > { %v2150_v19 = vsel %vm790_vm0, %v2146_v23, %v2147_v13  ;;  %v2186_v42 = vsel %vm827_vm1, %v2182_v1, %v2183_v41  ;;  %5451 = vmatpush3.bf16.msra.mxu1 %v5450_v30  ;;  %5475 = vmatpush3.bf16.msra.mxu0 %v5472_v29  ;;  %v3172_v23 = vld [vmem:[#allocation2 + $0x828] sm:$0xff]  ;;  %v6976_v13 = vld [vmem:[#allocation5 + $0x3] ss:$0 sm:$0xff] }
 0x3c8   : > { %v2134_v59 = vsel %vm2110_vm11, %v6954_v47, %v2122_v57  ;;  %4221 = vmatmul.mubr.msk.f32.gmra.mrb[68].mxu0 %vm534_vm6, %v2150_v19  ;;  %5043 = vmatmul.mubr.msk.f32.gmra.mrb[56].mxu1 %vm581_vm7, %v2186_v42  ;;  %v5516_v1 = vpack.c.bf16 %v3172_v23, %v3171_v10 }
 0x3c9   : > { %2382 = vmatprep.mubr.f32.mxu0 %v2134_v59  ;;  %5045 = vmatprep.mubr.f32.mxu1 %v7527_v28 }
 0x3ca   : > { %5477 = vmatprep.subr.bf16.mxu0 %v5476_v36  ;;  %5517 = vmatprep.subr.bf16.mxu1 %v5516_v1 }
 0x3cb   : > { %5479 = vmatpush3.bf16.msra.mxu0 %v5476_v36 }
 0x3cc   : > { %2383 = vmatmul.mubr.f32.gmra.mrb[70].mxu0 %v7527_v28  ;;  %5046 = vmatmul.mubr.f32.gmra.mrb[58].mxu1 %v7527_v28 }
 0x3cd   : > { %5080 = vmatprep.mubr.f32.mxu0 %v7527_v28  ;;  %5481 = vmatprep.subr.bf16.mxu0 %v5480_v9 }
 0x3cf   : > { %5483 = vmatpush3.bf16.msra.mxu0 %v5480_v9  ;;  %v6983_v9 = vld [vmem:[#allocation2 + $0x6a0] sm:$0xff] }
 0x3d0   : > { %5485 = vmatprep.subr.bf16.mxu0 %v5484_v14  ;;  %v5522_v14 = vpack.c.bf16 %v3158_v39, %v3157_v0 }
 0x473   : > { %v4478_v44 = vpop.f32.mrb[48].mxu0 }
 0x474   : > { %v4479_v53 = vpop.f32.mrb[49].mxu0 }
 0x475   : > { %v4480_v5 = vadd.f32 %v4479_v53, %v4478_v44  ;;  %v6989_v44 = vld [vmem:[#allocation2 + $0x738] sm:$0xff]  ;;  %v5524_v53 = vpack.c.bf16 %v3176_v56, %v3175_v17 }
 0x477   : > { %v4481_v61 = vpop.f32.mrb[50].mxu0  ;;  %v2330_v19 = vadd.f32 %v4480_v5, %v6976_v13  ;;  %v3159_v5 = vld [vmem:[#allocation2 + $0x7c0] sm:$0xff] }
 0x478   : > { %v4482_v41 = vpop.f32.mrb[51].mxu0 }
 0x479   : > { %v4483_v57 = vadd.f32 %v4482_v41, %v4481_v61  ;;  %v3160_v61 = vld [vmem:[#allocation2 + $0x7c8] sm:$0xff]  ;;  %v3177_v41 = vld [vmem:[#allocation2 + $0x850] sm:$0xff] }
 0x47b   : > { %v2335_v42 = vadd.f32 %v4483_v57, %v6976_v13  ;;  %v4484_v59 = vpop.f32.mrb[52].mxu0  ;;  %v5032_v37 = vpop.f32.mrb[48].mxu1 }
 0x47c   : > { %v4485_v48 = vpop.f32.mrb[53].mxu0  ;;  %v2454_v51 = vpop.f32.mrb[49].mxu1 }
 0x47d   : > { %v2460_v38 = vadd.f32 %v5032_v37, %v2335_v42  ;;  %v4486_v54 = vadd.f32 %v4485_v48, %v4484_v59  ;;  %v2455_v15 = vadd.f32 %v2454_v51, %v2330_v19  ;;  %v5486_v59 = vpack.c.bf16 %v6985_v63, %v6983_v9 }
 0x47e   : > { %v5488_v48 = vpack.c.bf16 %v6989_v44, %v6987_v2  ;;  %v5526_v51 = vpack.c.bf16 %v3160_v61, %v3159_v5 }
 0x47f   : > { %v2526_v45 = vmul.f32 0.01, %v2460_v38  ;;  %v2525_v27 = vmul.f32 0.01, %v2455_v15  ;;  %v4487_v11 = vpop.f32.mrb[54].mxu0  ;;  %vm2513_vm15 = vcmp.gt.f32.partialorder %v2455_v15, 0.0  ;;  %v2340_v34 = vadd.f32 %v4486_v54, %v6976_v13 }
 0x480   : > { %v4488_v62 = vpop.f32.mrb[55].mxu0  ;;  %vm2514_vm8 = vcmp.gt.f32.partialorder %v2460_v38, 0.0  ;;  %v3178_v54 = vld [vmem:[#allocation2 + $0x858] sm:$0xff] }
 0x481   : > { %v4489_v43 = vadd.f32 %v4488_v62, %v4487_v11  ;;  %v2537_v60 = vsel %vm2513_vm15, %v2455_v15, %v2525_v27  ;;  %v2538_v36 = vsel %vm2514_vm8, %v2460_v38, %v2526_v45  ;;  %v3161_v15 = vld [vmem:[#allocation2 + $0x7d0] sm:$0xff]  ;;  %v5528_v39 = vpack.c.bf16 %v3178_v54, %v3177_v41 }
 0x482   : > { %2741 = vmatprep.mubr.f32.mxu1 %v2537_v60  ;;  %v2552_v37 = vrot.slane %v2538_v36, 7  ;;  %v2588_v21 = vrot.slane %v2538_v36, 1  ;;  %v5530_v17 = vpack.c.bf16 %v3162_v25, %v3161_v15 }
 0x483   : > { %v4490_v30 = vpop.f32.mrb[56].mxu0  ;;  %v2345_v29 = vadd.f32 %v4489_v43, %v6976_v13  ;;  %v5035_v32 = vpop.f32.mrb[50].mxu1  ;;  %2742 = vmatmul.mubr.f32.vlgmr.msra.gmra.mrb[60].mxu1 %v7527_v28 }
 0x484   : > { %v4491_v18 = vpop.f32.mrb[57].mxu0  ;;  %v2464_v46 = vpop.f32.mrb[51].mxu1  ;;  %2746 = vmatprep.mubr.f32.mxu1 %v2538_v36  ;;  %5519 = vmatpush3.bf16.msra.mxu1 %v5518_v58 }
 0x485   : > { %v2470_v10 = vadd.f32 %v5035_v32, %v2345_v29  ;;  %v4492_v23 = vadd.f32 %v4491_v18, %v4490_v30  ;;  %v2465_v1 = vadd.f32 %v2464_v46, %v2340_v34  ;;  %5521 = vmatprep.subr.bf16.mxu1 %v5520_v55  ;;  %v3125_v18 = vld [vmem:[#allocation2 + $0x6b0] sm:$0xff]  ;;  %v3126_v46 = vld [vmem:[#allocation2 + $0x6b8] sm:$0xff] }
 0x486   : > { %v5490_v5 = vpack.c.bf16 %v3126_v46, %v3125_v18 }
 0x487   : > { %v2528_v57 = vmul.f32 0.01, %v2470_v10  ;;  %v2527_v19 = vmul.f32 0.01, %v2465_v1  ;;  %v4493_v42 = vpop.f32.mrb[58].mxu0  ;;  %2747 = vmatmul.mubr.f32.gmra.mrb[62].mxu1 %v7527_v28  ;;  %vm2515_vm9 = vcmp.gt.f32.partialorder %v2465_v1, 0.0  ;;  %v2350_v0 = vadd.f32 %v4492_v23, %v6976_v13 }
 0x488   : > { %v4494_v38 = vpop.f32.mrb[59].mxu0  ;;  %vm2516_vm11 = vcmp.gt.f32.partialorder %v2470_v10, 0.0  ;;  %5523 = vmatpush3.bf16.msra.mxu1 %v5522_v14  ;;  %v3143_v14 = vld [vmem:[#allocation2 + $0x740] sm:$0xff] }
 0x489   : > { %v4495_v8 = vadd.f32 %v4494_v38, %v4493_v42  ;;  %v2539_v35 = vsel %vm2515_vm9, %v2465_v1, %v2527_v19  ;;  %v6996_v45 = vsel %vm2516_vm11, %v2470_v10, %v2528_v57  ;;  %5525 = vmatprep.subr.bf16.mxu1 %v5524_v53  ;;  %v3144_v10 = vld [vmem:[#allocation2 + $0x748] sm:$0xff]  ;;  %v3127_v23 = vld [vmem:[#allocation2 + $0x6c0] sm:$0xff]  ;;  %v3145_v19 = vld [vmem:[#allocation2 + $0x750] sm:$0xff] }
 0x48a   : > { %v2553_v27 = vrot.slane %v2539_v35, 7  ;;  %v2589_v11 = vrot.slane %v2539_v35, 1  ;;  %2751 = vmatprep.mubr.f32.mxu1 %v2539_v35  ;;  %v2554_v62 = vrot.slane %v6996_v45, 7  ;;  %v2590_v58 = vrot.slane %v6996_v45, 1  ;;  %v3128_v57 = vld [vmem:[#allocation2 + $0x6c8] sm:$0xff]  ;;  %v3146_v42 = vld [vmem:[#allocation2 + $0x758] sm:$0xff] }
 0x48b   : > { %v4496_v43 = vpop.f32.mrb[60].mxu0  ;;  %v2355_v60 = vadd.f32 %v4495_v8, %v6976_v13  ;;  %v5038_v55 = vpop.f32.mrb[52].mxu1  ;;  %v5492_v41 = vpack.c.bf16 %v3144_v10, %v3143_v14  ;;  %v3132_v14 = vld [vmem:[#allocation2 + $0x6e8] sm:$0xff] }
 0x48c   : > { %v4497_v56 = vpop.f32.mrb[61].mxu0  ;;  %v2474_v30 = vpop.f32.mrb[53].mxu1  ;;  %v2572_v29 = vsel %vm790_vm0, %v2552_v37, %v2553_v27  ;;  %v2608_v32 = vsel %vm827_vm1, %v2588_v21, %v2589_v11  ;;  %v2607_v34 = vsel %vm827_vm1, %v2589_v11, %v2590_v58  ;;  %v2571_v36 = vsel %vm790_vm0, %v2553_v27, %v2554_v62  ;;  %5527 = vmatpush3.bf16.msra.mxu1 %v5526_v51 }
 0x48d   : > { %v2480_v9 = vadd.f32 %v5038_v55, %v2355_v60  ;;  %v4498_v63 = vadd.f32 %v4497_v56, %v4496_v43  ;;  %v2475_v2 = vadd.f32 %v2474_v30, %v2350_v0  ;;  %4225 = vmatmul.mubr.msk.f32.gmra.mrb[64].mxu1 %vm514_vm3, %v2572_v29  ;;  %5081 = vmatmul.mubr.msk.f32.vlgmr.msra.gmra.mrb[72].mxu0 %vm561_vm2, %v2608_v32  ;;  %v3130_v56 = vld [vmem:[#allocation2 + $0x6d8] sm:$0xff] }
 0x48e   : > { %2756 = vmatprep.mubr.f32.mxu1 %v6996_v45  ;;  %5083 = vmatprep.mubr.f32.mxu0 %v2607_v34  ;;  %v5494_v45 = vpack.c.bf16 %v3128_v57, %v3127_v23  ;;  %v5496_v27 = vpack.c.bf16 %v3146_v42, %v3145_v19  ;;  %v3147_v34 = vld [vmem:[#allocation2 + $0x760] sm:$0xff] }
 0x48f   : > { %v2530_v1 = vmul.f32 0.01, %v2480_v9  ;;  %v2529_v44 = vmul.f32 0.01, %v2475_v2  ;;  %v4499_v53 = vpop.f32.mrb[62].mxu0  ;;  %vm2517_vm15 = vcmp.gt.f32.partialorder %v2475_v2, 0.0  ;;  %5487 = vmatpush3.bf16.msra.mxu0 %v5486_v59  ;;  %5529 = vmatprep.subr.bf16.mxu1 %v5528_v39  ;;  %v2360_v35 = vadd.f32 %v4498_v63, %v6976_v13 }
 0x490   : > { %v4500_v61 = vpop.f32.mrb[63].mxu0  ;;  %vm2518_vm8 = vcmp.gt.f32.partialorder %v2480_v9, 0.0  ;;  %5489 = vmatprep.subr.bf16.mxu0 %v5488_v48  ;;  %5531 = vmatpush3.bf16.msra.mxu1 %v5530_v17  ;;  %v3129_v17 = vld [vmem:[#allocation2 + $0x6d0] sm:$0xff] }
 0x491   : > { %v4501_v37 = vadd.f32 %v4500_v61, %v4499_v53  ;;  %2757 = vmatmul.mubr.f32.gmra.mrb[66].mxu1 %v2571_v36  ;;  %v2541_v38 = vsel %vm2517_vm15, %v2475_v2, %v2529_v44  ;;  %v7015_v51 = vsel %vm2518_vm8, %v2480_v9, %v2530_v1  ;;  %v3148_v36 = vld [vmem:[#allocation2 + $0x768] sm:$0xff]  ;;  %v5498_v46 = vpack.c.bf16 %v3130_v56, %v3129_v17  ;;  %v3131_v2 = vld [vmem:[#allocation2 + $0x6e0] sm:$0xff] }
 0x492   : > { %v2555_v54 = vrot.slane %v2541_v38, 7  ;;  %v2591_v15 = vrot.slane %v2541_v38, 1  ;;  %2761 = vmatprep.mubr.f32.mxu1 %v2541_v38  ;;  %v2556_v59 = vrot.slane %v7015_v51, 7  ;;  %v2592_v25 = vrot.slane %v7015_v51, 1 }
 0x493   : > { %v4502_v21 = vpop.f32.mrb[64].mxu0  ;;  %v2365_v48 = vadd.f32 %v4501_v37, %v6976_v13  ;;  %v5041_v8 = vpop.f32.mrb[54].mxu1  ;;  %5491 = vmatpush3.bf16.msra.mxu0 %v5490_v5  ;;  %v5500_v63 = vpack.c.bf16 %v3148_v36, %v3147_v34  ;;  %v5502_v37 = vpack.c.bf16 %v3132_v14, %v3131_v2 }
 0x494   : > { %v4503_v11 = vpop.f32.mrb[65].mxu0  ;;  %v2484_v43 = vpop.f32.mrb[55].mxu1  ;;  %v2570_v60 = vsel %vm790_vm0, %v2554_v62, %v2555_v54  ;;  %v2606_v55 = vsel %vm827_vm1, %v2590_v58, %v2591_v15  ;;  %v2605_v0 = vsel %vm827_vm1, %v2591_v15, %v2592_v25  ;;  %v2569_v39 = vsel %vm790_vm0, %v2555_v54, %v2556_v59  ;;  %5493 = vmatprep.subr.bf16.mxu0 %v5492_v41 }
 0x495   : > { %v2490_v30 = vadd.f32 %v5041_v8, %v2365_v48  ;;  %v4504_v29 = vadd.f32 %v4503_v11, %v4502_v21  ;;  %v2485_v32 = vadd.f32 %v2484_v43, %v2360_v35  ;;  %2762 = vmatmul.mubr.f32.gmra.mrb[68].mxu1 %v2570_v60  ;;  %5084 = vmatmul.mubr.f32.gmra.mrb[74].mxu0 %v2606_v55 }
 0x496   : > { %2766 = vmatprep.mubr.f32.mxu1 %v7015_v51  ;;  %5086 = vmatprep.mubr.f32.mxu0 %v2605_v0 }
 0x497   : > { %v2532_v62 = vmul.f32 0.01, %v2490_v30  ;;  %v2531_v58 = vmul.f32 0.01, %v2485_v32  ;;  %v4505_v18 = vpop.f32.mrb[66].mxu0  ;;  %vm2519_vm9 = vcmp.gt.f32.partialorder %v2485_v32, 0.0  ;;  %5495 = vmatpush3.bf16.msra.mxu0 %v5494_v45  ;;  %v2370_v42 = vadd.f32 %v4504_v29, %v6976_v13 }
 0x498   : > { %v4506_v9 = vpop.f32.mrb[67].mxu0  ;;  %vm2520_vm11 = vcmp.gt.f32.partialorder %v2490_v30, 0.0  ;;  %5497 = vmatprep.subr.bf16.mxu0 %v5496_v27 }
 0x499   : > { %v4507_v10 = vadd.f32 %v4506_v9, %v4505_v18  ;;  %2767 = vmatmul.mubr.f32.gmra.mrb[70].mxu1 %v2569_v39  ;;  %v2543_v23 = vsel %vm2519_vm9, %v2485_v32, %v2531_v58  ;;  %v2544_v1 = vsel %vm2520_vm11, %v2490_v30, %v2532_v62 }
 0x49a   : > { %v2557_v44 = vrot.slane %v2543_v23, 7  ;;  %v2593_v53 = vrot.slane %v2543_v23, 1  ;;  %2771 = vmatprep.mubr.f32.mxu1 %v2543_v23  ;;  %v2558_v5 = vrot.slane %v2544_v1, 7  ;;  %v2594_v61 = vrot.slane %v2544_v1, 1 }
 0x49b   : > { %v4508_v41 = vpop.f32.mrb[68].mxu0  ;;  %v2375_v57 = vadd.f32 %v4507_v10, %v6976_v13  ;;  %v5044_v19 = vpop.f32.mrb[56].mxu1  ;;  %5499 = vmatpush3.bf16.msra.mxu0 %v5498_v46 }
 0x49c   : > { %v4509_v38 = vpop.f32.mrb[69].mxu0  ;;  %v2494_v51 = vpop.f32.mrb[57].mxu1  ;;  %v2568_v54 = vsel %vm790_vm0, %v2556_v59, %v2557_v44  ;;  %v2604_v15 = vsel %vm827_vm1, %v2592_v25, %v2593_v53  ;;  %v2603_v21 = vsel %vm827_vm1, %v2593_v53, %v2594_v61  ;;  %v2567_v48 = vsel %vm790_vm0, %v2557_v44, %v2558_v5  ;;  %5501 = vmatprep.subr.bf16.mxu0 %v5500_v63  ;;  %v3179_v53 = vld [vmem:[#allocation2 + $0x860] sm:$0xff] }
 0x49d   : > { %v2500_v8 = vadd.f32 %v5044_v19, %v2375_v57  ;;  %v4510_v35 = vadd.f32 %v4509_v38, %v4508_v41  ;;  %v2495_v45 = vadd.f32 %v2494_v51, %v2370_v42  ;;  %2772 = vmatmul.mubr.f32.gmra.mrb[72].mxu1 %v2568_v54  ;;  %5087 = vmatmul.mubr.f32.gmra.mrb[76].mxu0 %v2604_v15  ;;  %v3163_v41 = vld [vmem:[#allocation2 + $0x7e0] sm:$0xff]  ;;  %v3164_v57 = vld [vmem:[#allocation2 + $0x7e8] sm:$0xff]  ;;  %v3149_v42 = vld [vmem:[#allocation2 + $0x770] sm:$0xff] }
 0x49e   : > { %2776 = vmatprep.mubr.f32.mxu1 %v2544_v1  ;;  %5089 = vmatprep.mubr.f32.mxu0 %v2603_v21  ;;  %v5534_v19 = vpack.c.bf16 %v3164_v57, %v3163_v41  ;;  %v3133_v51 = vld [vmem:[#allocation2 + $0x6f0] sm:$0xff]  ;;  %v3134_v54 = vld [vmem:[#allocation2 + $0x6f8] sm:$0xff]  ;;  %v3192_v41 = vld [vmem:[#allocation2 + $0x8c8] sm:$0xff] }
 0x49f   : > { %v2534_v27 = vmul.f32 0.01, %v2500_v8  ;;  %v2533_v11 = vmul.f32 0.01, %v2495_v45  ;;  %v4511_v59 = vpop.f32.mrb[70].mxu0  ;;  %v5047_v43 = vpop.f32.mrb[58].mxu1  ;;  %v2380_v25 = vadd.f32 %v4510_v35, %v6976_v13  ;;  %5503 = vmatpush3.bf16.msra.mxu0 %v5502_v37  ;;  %v5506_v15 = vpack.c.bf16 %v3134_v54, %v3133_v51 }
 0x4a0   : > { %v4512_v60 = vpop.f32.mrb[71].mxu0  ;;  %v2504_v55 = vpop.f32.mrb[59].mxu1  ;;  %vm2521_vm15 = vcmp.gt.f32.partialorder %v2495_v45, 0.0  ;;  %vm2522_vm8 = vcmp.gt.f32.partialorder %v2500_v8, 0.0  ;;  %v3150_v37 = vld [vmem:[#allocation2 + $0x778] sm:$0xff]  ;;  %v3181_v21 = vld [vmem:[#allocation2 + $0x870] sm:$0xff] }
 0x4a1   : > { %v4513_v0 = vadd.f32 %v4512_v60, %v4511_v59  ;;  %v2505_v39 = vadd.f32 %v2504_v55, %v2380_v25  ;;  %2777 = vmatmul.mubr.f32.gmra.mrb[74].mxu1 %v2567_v48  ;;  %v2545_v17 = vsel %vm2521_vm15, %v2495_v45, %v2533_v11  ;;  %v2546_v56 = vsel %vm2522_vm8, %v2500_v8, %v2534_v27  ;;  %v3182_v48 = vld [vmem:[#allocation2 + $0x878] sm:$0xff]  ;;  %v3165_v35 = vld [vmem:[#allocation2 + $0x7f0] sm:$0xff]  ;;  %v3151_v27 = vld [vmem:[#allocation2 + $0x780] sm:$0xff] }
 0x4a2   : > { %v2559_v30 = vrot.slane %v2545_v17, 7  ;;  %v2595_v29 = vrot.slane %v2545_v17, 1  ;;  %2781 = vmatprep.mubr.f32.mxu1 %v2545_v17  ;;  %v2560_v32 = vrot.slane %v2546_v56, 7  ;;  %v2596_v34 = vrot.slane %v2546_v56, 1  ;;  %v3166_v45 = vld [vmem:[#allocation2 + $0x7f8] sm:$0xff]  ;;  %v3152_v59 = vld [vmem:[#allocation2 + $0x788] sm:$0xff] }
 0x4a3   : > { %v2385_v36 = vadd.f32 %v4513_v0, %v6976_v13  ;;  %vm2523_vm9 = vcmp.gt.f32.partialorder %v2505_v39, 0.0  ;;  %v2535_v62 = vmul.f32 0.01, %v2505_v39  ;;  %v5504_v38 = vpack.c.bf16 %v3150_v37, %v3149_v42  ;;  %v3135_v25 = vld [vmem:[#allocation2 + $0x700] sm:$0xff]  ;;  %v3136_v60 = vld [vmem:[#allocation2 + $0x708] sm:$0xff]  ;;  %v3194_v42 = vld [vmem:[#allocation2 + $0x8d8] sm:$0xff] }
 0x4a4   : > { %v2566_v58 = vsel %vm790_vm0, %v2558_v5, %v2559_v30  ;;  %v2602_v18 = vsel %vm827_vm1, %v2594_v61, %v2595_v29  ;;  %v2601_v46 = vsel %vm827_vm1, %v2595_v29, %v2596_v34  ;;  %v2565_v9 = vsel %vm790_vm0, %v2559_v30, %v2560_v32  ;;  %v3180_v5 = vld [vmem:[#allocation2 + $0x868] sm:$0xff]  ;;  %v3183_v0 = vld [vmem:[#allocation2 + $0x880] sm:$0xff] }
 0x4a5   : > { %v2510_v63 = vadd.f32 %v5047_v43, %v2385_v36  ;;  %v2547_v2 = vsel %vm2523_vm9, %v2505_v39, %v2535_v62  ;;  %2782 = vmatmul.mubr.f32.gmra.mrb[76].mxu1 %v2566_v58  ;;  %5090 = vmatmul.mubr.f32.gmra.mrb[78].mxu0 %v2602_v18  ;;  %v5532_v61 = vpack.c.bf16 %v3180_v5, %v3179_v53  ;;  %v3184_v39 = vld [vmem:[#allocation2 + $0x888] sm:$0xff]  ;;  %v3137_v62 = vld [vmem:[#allocation2 + $0x710] sm:$0xff]  ;;  %v3138_v58 = vld [vmem:[#allocation2 + $0x718] sm:$0xff]  ;;  %vm2989_vm9 = vcmp.lt.s32.totalorder %v6124_v3, 3 }
 0x4a6   : > { %v2561_v14 = vrot.slane %v2547_v2, 7  ;;  %v2597_v13 = vrot.slane %v2547_v2, 1  ;;  %2786 = vmatprep.mubr.f32.mxu1 %v2546_v56  ;;  %5092 = vmatprep.mubr.f32.mxu0 %v2601_v46  ;;  %v5536_v8 = vpack.c.bf16 %v3182_v48, %v3181_v21  ;;  %v5538_v11 = vpack.c.bf16 %v3166_v45, %v3165_v35  ;;  %v3167_v56 = vld [vmem:[#allocation2 + $0x800] sm:$0xff]  ;;  %v3168_v30 = vld [vmem:[#allocation2 + $0x808] sm:$0xff]  ;;  %v3185_v46 = vld [vmem:[#allocation2 + $0x890] sm:$0xff] }
 0x4a7   : > { %v2536_v1 = vmul.f32 0.01, %v2510_v63  ;;  %vm2524_vm11 = vcmp.gt.f32.partialorder %v2510_v63, 0.0  ;;  %5533 = vmatprep.subr.bf16.mxu1 %v5532_v61  ;;  %5505 = vmatprep.subr.bf16.mxu0 %v5504_v38  ;;  %v5508_v43 = vpack.c.bf16 %v3152_v59, %v3151_v27  ;;  %v5510_v55 = vpack.c.bf16 %v3136_v60, %v3135_v25  ;;  %v3190_v53 = vld [vmem:[#allocation2 + $0x8b8] sm:$0xff]  ;;  %v3191_v61 = vld [vmem:[#allocation2 + $0x8c0] sm:$0xff]  ;;  %v3196_v51 = vld [vmem:[#allocation2 + $0x8e8] sm:$0xff] }
 0x4a8   : > { %v2600_v10 = vsel %vm827_vm1, %v2596_v34, %v2597_v13  ;;  %v2564_v23 = vsel %vm790_vm0, %v2560_v32, %v2561_v14  ;;  %5535 = vmatpush3.bf16.msra.mxu1 %v5534_v19  ;;  %5507 = vmatpush3.bf16.msra.mxu0 %v5506_v15  ;;  %v5540_v17 = vpack.c.bf16 %v3184_v39, %v3183_v0  ;;  %v3153_v32 = vld [vmem:[#allocation2 + $0x790] sm:$0xff]  ;;  %v3154_v34 = vld [vmem:[#allocation2 + $0x798] sm:$0xff]  ;;  %v3195_v37 = vld [vmem:[#allocation2 + $0x8e0] sm:$0xff] }
 0x4a9   : > { %2787 = vmatmul.mubr.f32.gmra.mrb[78].mxu1 %v2565_v9  ;;  %5093 = vmatmul.mubr.msk.f32.gmra.mrb[80].mxu0 %vm581_vm7, %v2600_v10  ;;  %v2548_v44 = vsel %vm2524_vm11, %v2510_v63, %v2536_v1  ;;  %v5542_v29 = vpack.c.bf16 %v3168_v30, %v3167_v56  ;;  %v5512_v36 = vpack.c.bf16 %v3154_v34, %v3153_v32  ;;  %v3186_v9 = vld [vmem:[#allocation2 + $0x898] sm:$0xff]  ;;  %v3187_v10 = vld [vmem:[#allocation2 + $0x8a0] sm:$0xff]  ;;  %v3193_v19 = vld [vmem:[#allocation2 + $0x8d0] sm:$0xff] }
 0x4aa   : > { %2791 = vmatprep.mubr.f32.mxu1 %v2547_v2  ;;  %5095 = vmatprep.mubr.f32.mxu0 %v7527_v28  ;;  %v5514_v18 = vpack.c.bf16 %v3138_v58, %v3137_v62  ;;  %v5544_v63 = vpack.c.bf16 %v3186_v9, %v3185_v46  ;;  %v3169_v2 = vld [vmem:[#allocation2 + $0x810] sm:$0xff]  ;;  %v3170_v14 = vld [vmem:[#allocation2 + $0x818] sm:$0xff]  ;;  %v5556_v57 = vpack.c.bf16 %v3192_v41, %v3191_v61  ;;  %v3200_v35 = vld [vmem:[#allocation2 + $0x908] sm:$0xff] }
 0x4ab   : > { %5537 = vmatprep.subr.bf16.mxu1 %v5536_v8  ;;  %5509 = vmatprep.subr.bf16.mxu0 %v5508_v43  ;;  %v5546_v13 = vpack.c.bf16 %v3170_v14, %v3169_v2  ;;  %v5560_v38 = vpack.c.bf16 %v3194_v42, %v3193_v19  ;;  %v5564_v54 = vpack.c.bf16 %v3196_v51, %v3195_v37  ;;  %v3197_v15 = vld [vmem:[#allocation2 + $0x8f0] sm:$0xff]  ;;  %v3198_v21 = vld [vmem:[#allocation2 + $0x8f8] sm:$0xff]  ;;  %v3199_v8 = vld [vmem:[#allocation2 + $0x900] sm:$0xff] }
 0x4ac   : > { %5539 = vmatpush3.bf16.msra.mxu1 %v5538_v11  ;;  %5511 = vmatpush3.bf16.msra.mxu0 %v5510_v55  ;;  %v5568_v48 = vpack.c.bf16 %v3198_v21, %v3197_v15  ;;  %v5572_v45 = vpack.c.bf16 %v3200_v35, %v3199_v8  ;;  %v3201_v27 = vld [vmem:[#allocation2 + $0x910] sm:$0xff]  ;;  %v3202_v11 = vld [vmem:[#allocation2 + $0x918] sm:$0xff]  ;;  %v7066_v39 = vld [vmem:[#allocation5 + $0x4] ss:$0 sm:$0xff] }
 0x4ad   : > { %4226 = vmatmul.mubr.msk.f32.gmra.mrb[80].mxu1 %vm534_vm6, %v2564_v23  ;;  %5096 = vmatmul.mubr.f32.gmra.mrb[82].mxu0 %v7527_v28  ;;  %v3188_v23 = vld [vmem:[#allocation2 + $0x8a8] sm:$0xff]  ;;  %v5576_v59 = vpack.c.bf16 %v3202_v11, %v3201_v27  ;;  %v7535_v19 = vld [vmem:[#allocation13_spill] sm:$0xff] }
 0x4ae   : > { %2796 = vmatprep.mubr.f32.mxu1 %v2548_v44  ;;  %3273 = vmatprep.mubr.f32.mxu0 %v7527_v28  ;;  %v5548_v1 = vpack.c.bf16 %v3188_v23, %v3187_v10  ;;  %v3189_v44 = vld [vmem:[#allocation2 + $0x8b0] sm:$0xff]  ;;  %v646_v42 = vadd.s32 4294967293, %v7535_v19 }
 0x4af   : > { %5541 = vmatprep.subr.bf16.mxu1 %v5540_v17  ;;  %5513 = vmatprep.subr.bf16.mxu0 %v5512_v36  ;;  %v5552_v5 = vpack.c.bf16 %v3190_v53, %v3189_v44 }
 0x4b0   : > { %5543 = vmatpush3.bf16.msra.mxu1 %v5542_v29  ;;  %5515 = vmatpush3.bf16.msra.mxu0 %v5514_v18 }
 0x4b1   : > { %2797 = vmatmul.mubr.f32.gmra.mrb[82].mxu1 %v7527_v28  ;;  %5545 = vmatprep.subr.bf16.mxu1 %v5544_v63 }
 0x4b2   : > { %3398 = vmatprep.mubr.f32.mxu1 %v7527_v28  ;;  %5549 = vmatprep.subr.bf16.mxu0 %v5548_v1 }
 0x4b3   : > { %3274 = vmatmul.mubr.f32.vlgmr.msra.gmra.mrb[84].mxu0 %v7527_v28 }
 0x4b4   : > { %5547 = vmatpush3.bf16.msra.mxu1 %v5546_v13  ;;  %3278 = vmatprep.mubr.f32.mxu0 %v7527_v28 }
 0x4b5   : > { %5551 = vmatpush3.bf16.msra.mxu0 %v5548_v1 }
 0x4b6   : > { %5553 = vmatprep.subr.bf16.mxu0 %v5552_v5 }
 0x4b7   : > { %3279 = vmatmul.mubr.f32.gmra.mrb[86].mxu0 %v7527_v28 }
 0x4b9   : > { %5555 = vmatpush3.bf16.msra.mxu0 %v5552_v5 }
 0x4ba   : > { %5557 = vmatprep.subr.bf16.mxu0 %v5556_v57 }
 0x4bd   : > { %5559 = vmatpush3.bf16.msra.mxu0 %v5556_v57 }
 0x4be   : > { %5561 = vmatprep.subr.bf16.mxu0 %v5560_v38 }
 0x4c1   : > { %5563 = vmatpush3.bf16.msra.mxu0 %v5560_v38 }
 0x4c2   : > { %5565 = vmatprep.subr.bf16.mxu0 %v5564_v54 }
 0x4c5   : > { %5567 = vmatpush3.bf16.msra.mxu0 %v5564_v54 }
 0x4c6   : > { %5569 = vmatprep.subr.bf16.mxu0 %v5568_v48 }
 0x4c9   : > { %5571 = vmatpush3.bf16.msra.mxu0 %v5568_v48 }
 0x4ca   : > { %5573 = vmatprep.subr.bf16.mxu0 %v5572_v45 }
 0x4cd   : > { %5575 = vmatpush3.bf16.msra.mxu0 %v5572_v45 }
 0x4ce   : > { %5577 = vmatprep.subr.bf16.mxu0 %v5576_v59 }
 0x4d1   : > { %5579 = vmatpush3.bf16.msra.mxu0 %v5576_v59 }
 0x556   : > { %v4574_v43 = vpop.f32.mrb[60].mxu1 }
 0x557   : > { %v4575_v25 = vpop.f32.mrb[61].mxu1 }
 0x558   : > { %v4576_v60 = vadd.f32 %v4575_v25, %v4574_v43 }
 0x55a   : > { %v4577_v55 = vpop.f32.mrb[62].mxu1  ;;  %v2744_v30 = vadd.f32 %v4576_v60, %v7066_v39 }
 0x55b   : > { %v4578_v0 = vpop.f32.mrb[63].mxu1 }
 0x55c   : > { %v4579_v17 = vadd.f32 %v4578_v0, %v4577_v55 }
 0x55e   : > { %v2749_v56 = vadd.f32 %v4579_v17, %v7066_v39 }
 0x560   : > { %v4580_v29 = vpop.f32.mrb[64].mxu1  ;;  %v5082_v32 = vpop.f32.mrb[72].mxu0 }
 0x561   : > { %v2874_v34 = vadd.f32 %v5082_v32, %v2749_v56  ;;  %v4581_v36 = vpop.f32.mrb[65].mxu1  ;;  %v2868_v62 = vpop.f32.mrb[73].mxu0 }
 0x562   : > { %v4582_v58 = vadd.f32 %v4581_v36, %v4580_v29  ;;  %v2869_v18 = vadd.f32 %v2868_v62, %v2744_v30 }
 0x563   : > { %v2928_v46 = vadd.f32 %v2874_v34, %v6825_v50 }
 0x564   : > { %v2927_v9 = vadd.f32 %v2869_v18, %v6822_v33  ;;  %v4583_v63 = vpop.f32.mrb[66].mxu1  ;;  %v2754_v53 = vadd.f32 %v4582_v58, %v7066_v39 }
 0x565   : > { %v4584_v2 = vpop.f32.mrb[67].mxu1  ;;  %v2952_v10 = vmul.f32 0.01, %v2928_v46  ;;  %vm2940_vm8 = vcmp.gt.f32.partialorder %v2928_v46, 0.0 }
 0x566   : > { %vm2939_vm15 = vcmp.gt.f32.partialorder %v2927_v9, 0.0  ;;  %v2951_v14 = vmul.f32 0.01, %v2927_v9  ;;  %v4585_v13 = vadd.f32 %v4584_v2, %v4583_v63 }
 0x567   : > { %v7075_v37 = vsel %vm2940_vm8, %v2928_v46, %v2952_v10  ;;  %vm658_vm8 = vcmp.ge.s32.totalorder %v646_v42, 0 }
 0x568   : > { %v4586_v23 = vpop.f32.mrb[68].mxu1  ;;  %v2759_v1 = vadd.f32 %v4585_v13, %v7066_v39  ;;  %v5085_v44 = vpop.f32.mrb[74].mxu0  ;;  %v2963_v5 = vsel %vm2939_vm15, %v2927_v9, %v2951_v14  ;;  %v3015_v35 = vrot.slane %v7075_v37, 6  ;;  %v2978_v43 = vrot.slane %v7075_v37, 5 }
 0x569   : > { %v4587_v61 = vpop.f32.mrb[69].mxu1  ;;  %v2878_v41 = vpop.f32.mrb[75].mxu0  ;;  %3399 = vmatmul.mubr.f32.vlgmr.msra.gmra.mrb[84].mxu1 %v2963_v5 }
 0x56a   : > { %v2884_v50 = vadd.f32 %v5085_v44, %v2759_v1  ;;  %v4588_v57 = vadd.f32 %v4587_v61, %v4586_v23  ;;  %v2879_v33 = vadd.f32 %v2878_v41, %v2754_v53 }
 0x56c   : > { %v7078_v38 = vadd.f32 %v2884_v50, %v6848_v4  ;;  %v7081_v51 = vadd.f32 %v2879_v33, %v6836_v40  ;;  %v4589_v54 = vpop.f32.mrb[70].mxu1  ;;  %v3051_v4 = vrot.slane %v7075_v37, 2  ;;  %v2764_v59 = vadd.f32 %v4588_v57, %v7066_v39 }
 0x56d   : > { %v4590_v15 = vpop.f32.mrb[71].mxu1 }
 0x56e   : > { %vm2942_vm11 = vcmp.gt.f32.partialorder %v7078_v38, 0.0  ;;  %v2954_v21 = vmul.f32 0.01, %v7078_v38  ;;  %vm2941_vm15 = vcmp.gt.f32.partialorder %v7081_v51, 0.0  ;;  %v2953_v48 = vmul.f32 0.01, %v7081_v51 }
 0x56f   : > { %v4591_v8 = vadd.f32 %v4590_v15, %v4589_v54 }
 0x570   : > { %v7091_v40 = vsel %vm2942_vm11, %v7078_v38, %v2954_v21  ;;  %v7094_v45 = vsel %vm2941_vm15, %v7081_v51, %v2953_v48  ;;  %v4592_v27 = vpop.f32.mrb[72].mxu1  ;;  %v5088_v11 = vpop.f32.mrb[76].mxu0 }
 0x571   : > { %v2769_v25 = vadd.f32 %v4591_v8, %v7066_v39  ;;  %v4593_v60 = vpop.f32.mrb[73].mxu1  ;;  %v2888_v55 = vpop.f32.mrb[77].mxu0  ;;  %v3016_v0 = vrot.slane %v7094_v45, 6  ;;  %v3052_v17 = vrot.slane %v7094_v45, 2  ;;  %v2979_v56 = vrot.slane %v7094_v45, 5 }
 0x572   : > { %v4594_v30 = vadd.f32 %v4593_v60, %v4592_v27  ;;  %v2889_v29 = vadd.f32 %v2888_v55, %v2764_v59  ;;  %v3017_v32 = vrot.slane %v7091_v40, 6  ;;  %v3053_v34 = vrot.slane %v7091_v40, 2 }
 0x573   : > { %v2894_v36 = vadd.f32 %v5088_v11, %v2769_v25  ;;  %v3035_v62 = vsel %vm753_vm5, %v3015_v35, %v3016_v0  ;;  %v3071_v58 = vsel %vm864_vm4, %v3051_v4, %v3052_v17  ;;  %v2999_v18 = vsel %vm2989_vm9, %v2978_v43, %v2979_v56 }
 0x574   : > { %v7111_v46 = vadd.f32 %v2889_v29, %v6860_v31  ;;  %v4595_v9 = vpop.f32.mrb[74].mxu1  ;;  %4230 = vmatprep.mubr.msk.f32.mxu0 %vm466_vm12, %v3035_v62  ;;  %4234 = vmatprep.mubr.msk.f32.mxu1 %vm609_vm10, %v3071_v58  ;;  %v2980_v14 = vrot.slane %v7091_v40, 5  ;;  %v3034_v31 = vsel %vm753_vm5, %v3016_v0, %v3017_v32  ;;  %v3070_v23 = vsel %vm864_vm4, %v3052_v17, %v3053_v34 }
 0x575   : > { %v7119_v13 = vadd.f32 %v2894_v36, %v6880_v20  ;;  %v4596_v10 = vpop.f32.mrb[75].mxu1  ;;  %4231 = vmatmul.mubr.msk.f32.gmra.mrb[88].mxu0 %vm658_vm8, %v2999_v18  ;;  %3404 = vmatmul.mubr.f32.gmra.mrb[86].mxu1 %v7075_v37  ;;  %v2774_v50 = vadd.f32 %v4594_v30, %v7066_v39 }
 0x576   : > { %vm2943_vm12 = vcmp.gt.f32.partialorder %v7111_v46, 0.0  ;;  %v2955_v1 = vmul.f32 0.01, %v7111_v46  ;;  %v4597_v44 = vadd.f32 %v4596_v10, %v4595_v9  ;;  %3288 = vmatprep.mubr.f32.mxu0 %v3034_v31  ;;  %3408 = vmatprep.mubr.f32.mxu1 %v3070_v23  ;;  %v2998_v57 = vsel %vm2989_vm9, %v2979_v56, %v2980_v14 }
 0x577   : > { %vm2944_vm10 = vcmp.gt.f32.partialorder %v7119_v13, 0.0  ;;  %v2956_v20 = vmul.f32 0.01, %v7119_v13 }
 0x578   : > { %v7132_v53 = vsel %vm2943_vm12, %v7111_v46, %v2955_v1  ;;  %v4598_v5 = vpop.f32.mrb[76].mxu1  ;;  %v2779_v61 = vadd.f32 %v4597_v44, %v7066_v39  ;;  %v5091_v41 = vpop.f32.mrb[78].mxu0 }
 0x579   : > { %v7139_v33 = vsel %vm2944_vm10, %v7119_v13, %v2956_v20  ;;  %v4599_v19 = vpop.f32.mrb[77].mxu1  ;;  %v2898_v42 = vpop.f32.mrb[79].mxu0  ;;  %3289 = vmatmul.mubr.f32.gmra.mrb[90].mxu0 %v2998_v57  ;;  %3409 = vmatmul.mubr.f32.gmra.mrb[88].mxu1 %v7094_v45  ;;  %v3018_v54 = vrot.slane %v7132_v53, 6  ;;  %v3054_v15 = vrot.slane %v7132_v53, 2  ;;  %v2981_v21 = vrot.slane %v7132_v53, 5 }
 0x57a   : > { %v2904_v48 = vadd.f32 %v5091_v41, %v2779_v61  ;;  %v4600_v8 = vadd.f32 %v4599_v19, %v4598_v5  ;;  %v2899_v35 = vadd.f32 %v2898_v42, %v2774_v50  ;;  %v3019_v4 = vrot.slane %v7139_v33, 6 }
 0x57b   : > { %v3033_v27 = vsel %vm753_vm5, %v3017_v32, %v3018_v54  ;;  %v3069_v11 = vsel %vm864_vm4, %v3053_v34, %v3054_v15  ;;  %v2997_v59 = vsel %vm2989_vm9, %v2980_v14, %v2981_v21  ;;  %v3055_v43 = vrot.slane %v7139_v33, 2 }
 0x57c   : > { %v7154_v25 = vadd.f32 %v2904_v48, %v6906_v7  ;;  %v7157_v60 = vadd.f32 %v2899_v35, %v6894_v52  ;;  %v4601_v55 = vpop.f32.mrb[78].mxu1  ;;  %v5094_v0 = vpop.f32.mrb[80].mxu0  ;;  %3293 = vmatprep.mubr.f32.mxu0 %v3033_v27  ;;  %3413 = vmatprep.mubr.f32.mxu1 %v3069_v11  ;;  %v2784_v17 = vadd.f32 %v4600_v8, %v7066_v39  ;;  %v2982_v56 = vrot.slane %v7139_v33, 5 }
 0x57d   : > { %v4602_v30 = vpop.f32.mrb[79].mxu1  ;;  %v2908_v29 = vpop.f32.mrb[81].mxu0  ;;  %3294 = vmatmul.mubr.f32.gmra.mrb[92].mxu0 %v2997_v59  ;;  %3414 = vmatmul.mubr.f32.gmra.mrb[90].mxu1 %v7091_v40  ;;  %v3032_v7 = vsel %vm753_vm5, %v3018_v54, %v3019_v4  ;;  %v3068_v52 = vsel %vm864_vm4, %v3054_v15, %v3055_v43 }
 0x57e   : > { %vm2946_vm11 = vcmp.gt.f32.partialorder %v7154_v25, 0.0  ;;  %v2958_v32 = vmul.f32 0.01, %v7154_v25  ;;  %vm2945_vm15 = vcmp.gt.f32.partialorder %v7157_v60, 0.0  ;;  %v2957_v34 = vmul.f32 0.01, %v7157_v60  ;;  %3298 = vmatprep.mubr.f32.mxu0 %v3032_v7  ;;  %3418 = vmatprep.mubr.f32.mxu1 %v3068_v52 }
 0x57f   : > { %v4603_v36 = vadd.f32 %v4602_v30, %v4601_v55  ;;  %v2909_v62 = vadd.f32 %v2908_v29, %v2784_v17  ;;  %v2996_v63 = vsel %vm2989_vm9, %v2981_v21, %v2982_v56 }
 0x580   : > { %v7171_v58 = vsel %vm2946_vm11, %v7154_v25, %v2958_v32  ;;  %v7174_v18 = vsel %vm2945_vm15, %v7157_v60, %v2957_v34  ;;  %v4604_v9 = vpop.f32.mrb[80].mxu1  ;;  %v5097_v2 = vpop.f32.mrb[82].mxu0 }
 0x581   : > { %v2789_v14 = vadd.f32 %v4603_v36, %v7066_v39  ;;  %v7180_v10 = vadd.f32 %v2909_v62, %v6918_v49  ;;  %v4605_v31 = vpop.f32.mrb[81].mxu1  ;;  %3299 = vmatmul.mubr.f32.gmra.mrb[94].mxu0 %v2996_v63  ;;  %3419 = vmatmul.mubr.f32.gmra.mrb[92].mxu1 %v7132_v53  ;;  %v3020_v23 = vrot.slane %v7174_v18, 6  ;;  %v3056_v1 = vrot.slane %v7174_v18, 2  ;;  %v2918_v44 = vpop.f32.mrb[83].mxu0 }
 0x582   : > { %v4606_v20 = vadd.f32 %v4605_v31, %v4604_v9  ;;  %v2983_v5 = vrot.slane %v7174_v18, 5  ;;  %v3021_v61 = vrot.slane %v7171_v58, 6  ;;  %v3057_v41 = vrot.slane %v7171_v58, 2 }
 0x583   : > { %v2914_v50 = vadd.f32 %v5094_v0, %v2789_v14  ;;  %vm2947_vm8 = vcmp.gt.f32.partialorder %v7180_v10, 0.0  ;;  %v2959_v49 = vmul.f32 0.01, %v7180_v10  ;;  %v3031_v57 = vsel %vm753_vm5, %v3019_v4, %v3020_v23 }
 0x584   : > { %v4607_v19 = vpop.f32.mrb[82].mxu1  ;;  %3303 = vmatprep.mubr.f32.mxu0 %v3031_v57  ;;  %v3067_v42 = vsel %vm864_vm4, %v3055_v43, %v3056_v1  ;;  %v2794_v54 = vadd.f32 %v4606_v20, %v7066_v39  ;;  %v2995_v15 = vsel %vm2989_vm9, %v2982_v56, %v2983_v5  ;;  %v3030_v21 = vsel %vm753_vm5, %v3020_v23, %v3021_v61  ;;  %v7538_v23 = vld [vmem:[#allocation14_spill] sm:$0xff] }
 0x585   : > { %v7200_v48 = vadd.f32 %v2914_v50, %v6930_v6  ;;  %v7203_v8 = vsel %vm2947_vm8, %v7180_v10, %v2959_v49  ;;  %3423 = vmatprep.mubr.f32.mxu1 %v3067_v42  ;;  %v4608_v35 = vpop.f32.mrb[83].mxu1  ;;  %3304 = vmatmul.mubr.f32.gmra.mrb[96].mxu0 %v2995_v15  ;;  %v3066_v4 = vsel %vm864_vm4, %v3056_v1, %v3057_v41  ;;  %v2984_v27 = vrot.slane %v7171_v58, 5  ;;  %v3699_v50 = vld [vmem:[#allocation2 + $0x948] sm:$0xff] }
 0x586   : > { %v4609_v11 = vadd.f32 %v4608_v35, %v4607_v19  ;;  %v2919_v59 = vadd.f32 %v2918_v44, %v2794_v54  ;;  %3424 = vmatmul.mubr.f32.gmra.mrb[94].mxu1 %v7139_v33  ;;  %3308 = vmatprep.mubr.f32.mxu0 %v3030_v21  ;;  %v3022_v43 = vrot.slane %v7203_v8, 6  ;;  %v3058_v6 = vrot.slane %v7203_v8, 2  ;;  %v7541_v19 = vld [vmem:[#allocation12_spill] sm:$0xff] }
 0x587   : > { %vm2948_vm12 = vcmp.gt.f32.partialorder %v7200_v48, 0.0  ;;  %v2960_v55 = vmul.f32 0.01, %v7200_v48  ;;  %3428 = vmatprep.mubr.f32.mxu1 %v3066_v4  ;;  %v2994_v56 = vsel %vm2989_vm9, %v2983_v5, %v2984_v27  ;;  %v2985_v30 = vrot.slane %v7203_v8, 5 }
 0x588   : > { %v2799_v0 = vadd.f32 %v4609_v11, %v7066_v39  ;;  %v2937_v17 = vadd.f32 %v2919_v59, %v6942_v26  ;;  %v3029_v29 = vsel %vm753_vm5, %v3021_v61, %v3022_v43  ;;  %v3065_v7 = vsel %vm864_vm4, %v3057_v41, %v3058_v6  ;;  %v3698_v61 = vld [vmem:[#allocation2 + $0x940] sm:$0xff] }
 0x589   : > { %3309 = vmatmul.mubr.f32.gmra.mrb[98].mxu0 %v2994_v56  ;;  %v7223_v52 = vsel %vm2948_vm12, %v7200_v48, %v2960_v55  ;;  %v2993_v62 = vsel %vm2989_vm9, %v2984_v27, %v2985_v30  ;;  %v654_v1 = vadd.s32 4294967293, %v7538_v23  ;;  %v693_v42 = vadd.s32 3, %v7541_v19  ;;  %v3717_v19 = vld [vmem:[#allocation2 + $0x9d8] sm:$0xff] }
 0x58a   : > { %v2924_v32 = vadd.f32 %v5097_v2, %v2799_v0  ;;  %vm2949_vm10 = vcmp.gt.f32.partialorder %v2937_v17, 0.0  ;;  %v2961_v39 = vmul.f32 0.01, %v2937_v17  ;;  %3429 = vmatmul.mubr.f32.gmra.mrb[96].mxu1 %v7174_v18  ;;  %3313 = vmatprep.mubr.f32.mxu0 %v3029_v29  ;;  %v3023_v26 = vrot.slane %v7223_v52, 6 }
 0x58b   : > { %3433 = vmatprep.mubr.f32.mxu1 %v3065_v7  ;;  %v3059_v34 = vrot.slane %v7223_v52, 2  ;;  %v2986_v9 = vrot.slane %v7223_v52, 5  ;;  %vm678_vm11 = vcmp.lt.s32.totalorder %v654_v1, 64  ;;  %v3088_v54 = vrot.slane %v7094_v45, 3  ;;  %v3697_v1 = vld [vmem:[#allocation2 + $0x938] sm:$0xff] }
 0x58c   : > { %v7228_v36 = vsel %vm2949_vm10, %v2937_v17, %v2961_v39  ;;  %v3028_v63 = vsel %vm753_vm5, %v3022_v43, %v3023_v26  ;;  %v2938_v57 = vadd.f32 %v2924_v32, %v6954_v47  ;;  %v3089_v21 = vrot.slane %v7091_v40, 3  ;;  %v3711_v32 = vld [vmem:[#allocation2 + $0x9a8] sm:$0xff] }
 0x58d   : > { %3314 = vmatmul.mubr.f32.gmra.mrb[100].mxu0 %v2993_v62  ;;  %v3024_v2 = vrot.slane %v7228_v36, 6  ;;  %v3064_v14 = vsel %vm864_vm4, %v3058_v6, %v3059_v34  ;;  %v3060_v31 = vrot.slane %v7228_v36, 2  ;;  %v2992_v44 = vsel %vm2989_vm9, %v2985_v30, %v2986_v9  ;;  %v4670_v30 = vpop.f32.mrb[84].mxu0  ;;  %v3694_v62 = vld [vmem:[#allocation2 + $0x920] sm:$0xff] }
 0x58e   : > { %3434 = vmatmul.mubr.f32.gmra.mrb[98].mxu1 %v7171_v58  ;;  %3318 = vmatprep.mubr.f32.mxu0 %v3028_v63  ;;  %v2987_v20 = vrot.slane %v7228_v36, 5  ;;  %v2962_v15 = vmul.f32 0.01, %v2938_v57  ;;  %v3087_v47 = vrot.slane %v7075_v37, 3  ;;  %v3090_v35 = vrot.slane %v7132_v53, 3  ;;  %v4671_v29 = vpop.f32.mrb[85].mxu0 }
 0x58f   : > { %3438 = vmatprep.mubr.f32.mxu1 %v3064_v14  ;;  %v3027_v5 = vsel %vm753_vm5, %v3023_v26, %v3024_v2  ;;  %v3063_v41 = vsel %vm864_vm4, %v3059_v34, %v3060_v31  ;;  %vm3098_vm4 = vcmp.lt.s32.totalorder %v6124_v3, 5  ;;  %vm2950_vm5 = vcmp.gt.f32.partialorder %v2938_v57, 0.0  ;;  %v4673_v39 = vpop.f32.mrb[86].mxu0  ;;  %v3712_v2 = vld [vmem:[#allocation2 + $0x9b0] sm:$0xff]  ;;  %v3713_v14 = vld [vmem:[#allocation2 + $0x9b8] sm:$0xff] }
 0x590   : > { %v2991_v49 = vsel %vm2989_vm9, %v2986_v9, %v2987_v20  ;;  %v3108_v45 = vsel %vm3098_vm4, %v3087_v47, %v3088_v54  ;;  %v2974_v4 = vsel %vm2950_vm5, %v2938_v57, %v2962_v15  ;;  %v3107_v40 = vsel %vm3098_vm4, %v3088_v54, %v3089_v21  ;;  %v4674_v34 = vpop.f32.mrb[87].mxu0  ;;  %v3695_v9 = vld [vmem:[#allocation2 + $0x928] sm:$0xff]  ;;  %v3696_v31 = vld [vmem:[#allocation2 + $0x930] sm:$0xff]  ;;  %v3714_v20 = vld [vmem:[#allocation2 + $0x9c0] sm:$0xff] }
 0x591   : > { %3319 = vmatmul.mubr.f32.gmra.mrb[102].mxu0 %v2992_v44  ;;  %v3091_v27 = vrot.slane %v7139_v33, 3  ;;  %v3106_v11 = vsel %vm3098_vm4, %v3089_v21, %v3090_v35  ;;  %v3092_v37 = vrot.slane %v7174_v18, 3  ;;  %v3093_v53 = vrot.slane %v7171_v58, 3  ;;  %v7542_v18 = vld [vmem:[#allocation15_spill] sm:$0xff]  ;;  %v3716_v57 = vld [vmem:[#allocation2 + $0x9d0] sm:$0xff]  ;;  %v3701_v15 = vld [vmem:[#allocation2 + $0x958] sm:$0xff] }
 0x592   : > { %3439 = vmatmul.mubr.f32.gmra.mrb[100].mxu1 %v7203_v8  ;;  %4232 = vmatprep.mubr.msk.f32.mxu0 %vm486_vm13, %v3027_v5  ;;  %vm705_vm13 = vcmp.ge.s32.totalorder %v693_v42, 0  ;;  %v3094_v6 = vrot.slane %v7203_v8, 3  ;;  %v3095_v55 = vrot.slane %v7223_v52, 3  ;;  %v701_v0 = vadd.s32 3, %v7542_v18  ;;  %v3715_v5 = vld [vmem:[#allocation2 + $0x9c8] sm:$0xff]  ;;  %v3700_v42 = vld [vmem:[#allocation2 + $0x950] sm:$0xff] }
 0x593   : > { %4235 = vmatprep.mubr.msk.f32.mxu1 %vm629_vm14, %v3063_v41  ;;  %v3105_v59 = vsel %vm3098_vm4, %v3090_v35, %v3091_v27  ;;  %v3104_v43 = vsel %vm3098_vm4, %v3091_v27, %v3092_v37  ;;  %v3103_v33 = vsel %vm3098_vm4, %v3092_v37, %v3093_v53  ;;  %v3096_v58 = vrot.slane %v7228_v36, 3  ;;  %v3726_v47 = vld [vmem:[#allocation2 + $0xa20] sm:$0xff]  ;;  %v3704_v18 = vld [vmem:[#allocation2 + $0x970] sm:$0xff] }
 0x594   : > { %v3102_v17 = vsel %vm3098_vm4, %v3093_v53, %v3094_v6  ;;  %v3101_v56 = vsel %vm3098_vm4, %v3094_v6, %v3095_v55  ;;  %vm725_vm14 = vcmp.lt.s32.totalorder %v701_v0, 64  ;;  %v7297_v7 = vadd.f32 %v4671_v29, %v4670_v30  ;;  %v3718_v35 = vld [vmem:[#allocation2 + $0x9e0] sm:$0xff]  ;;  %v3728_v53 = vld [vmem:[#allocation2 + $0xa30] sm:$0xff] }
 0x595   : > { %4233 = vmatmul.mubr.msk.f32.gmra.mrb[104].mxu0 %vm678_vm11, %v2991_v49  ;;  %v3100_v8 = vsel %vm3098_vm4, %v3095_v55, %v3096_v58  ;;  %v5582_v63 = vpack.c.bf16 %v3695_v9, %v3694_v62  ;;  %v5584_v23 = vpack.c.bf16 %v3713_v14, %v3712_v2  ;;  %v5586_v44 = vpack.c.bf16 %v3697_v1, %v3696_v31  ;;  %v3702_v27 = vld [vmem:[#allocation2 + $0x960] sm:$0xff]  ;;  %v3721_v55 = vld [vmem:[#allocation2 + $0x9f8] sm:$0xff]  ;;  %v3732_v29 = vld [vmem:[#allocation2 + $0xa50] sm:$0xff] }
 0x596   : > { %3444 = vmatmul.mubr.f32.gmra.mrb[102].mxu1 %v7223_v52  ;;  %3328 = vmatprep.mubr.f32.mxu0 %v7527_v28  ;;  %v3710_v52 = vld [vmem:[#allocation2 + $0x9a0] sm:$0xff]  ;;  %v5588_v41 = vpack.c.bf16 %v3715_v5, %v3714_v20  ;;  %v5590_v49 = vpack.c.bf16 %v3699_v50, %v3698_v61  ;;  %v5592_v54 = vpack.c.bf16 %v3717_v19, %v3716_v57  ;;  %v3707_v62 = vld [vmem:[#allocation2 + $0x988] sm:$0xff]  ;;  %v3725_v1 = vld [vmem:[#allocation2 + $0xa18] sm:$0xff] }
 0x597   : > { %3448 = vmatprep.mubr.f32.mxu1 %v7527_v28  ;;  %v5580_v26 = vpack.c.bf16 %v3711_v32, %v3710_v52  ;;  %v5594_v21 = vpack.c.bf16 %v3701_v15, %v3700_v42  ;;  %v3730_v58 = vld [vmem:[#allocation2 + $0xa40] sm:$0xff]  ;;  %v3733_v52 = vld [vmem:[#allocation2 + $0xa58] sm:$0xff]  ;;  %v3735_v14 = vld [vmem:[#allocation2 + $0xa68] sm:$0xff] }
 0x598   : > { %v3722_v32 = vld [vmem:[#allocation2 + $0xa00] sm:$0xff]  ;;  %v3709_v5 = vld [vmem:[#allocation2 + $0x998] sm:$0xff]  ;;  %v3736_v61 = vld [vmem:[#allocation2 + $0xa70] sm:$0xff] }
 0x599   : > { %3329 = vmatmul.mubr.f32.gmra.mrb[106].mxu0 %v7527_v28  ;;  %5581 = vmatprep.subr.bf16.mxu1 %v5580_v26  ;;  %v3723_v26 = vld [vmem:[#allocation2 + $0xa08] sm:$0xff]  ;;  %v3734_v2 = vld [vmem:[#allocation2 + $0xa60] sm:$0xff]  ;;  %v3741_v15 = vld [vmem:[#allocation2 + $0xa98] sm:$0xff] }
 0x59a   : > { %3449 = vmatmul.mubr.f32.gmra.mrb[104].mxu1 %v7228_v36  ;;  %5130 = vmatprep.mubr.f32.mxu0 %v7527_v28  ;;  %v7299_v36 = vadd.f32 %v4674_v34, %v4673_v39  ;;  %v5624_v39 = vpack.c.bf16 %v3733_v52, %v3732_v29  ;;  %v3706_v34 = vld [vmem:[#allocation2 + $0x980] sm:$0xff]  ;;  %v5604_v9 = vpack.c.bf16 %v3723_v26, %v3722_v32  ;;  %v3739_v19 = vld [vmem:[#allocation2 + $0xa88] sm:$0xff] }
 0x59b   : > { %3453 = vmatprep.mubr.f32.mxu1 %v7527_v28  ;;  %5583 = vmatpush3.bf16.msra.mxu1 %v5582_v63  ;;  %v5606_v63 = vpack.c.bf16 %v3707_v62, %v3706_v34  ;;  %v5628_v31 = vpack.c.bf16 %v3735_v14, %v3734_v2  ;;  %v3738_v57 = vld [vmem:[#allocation2 + $0xa80] sm:$0xff] }
 0x59c   : > { %5585 = vmatprep.subr.bf16.mxu1 %v5584_v23  ;;  %v3724_v23 = vld [vmem:[#allocation2 + $0xa10] sm:$0xff]  ;;  %v5636_v42 = vpack.c.bf16 %v3739_v19, %v3738_v57 }
 0x59d   : > { %5131 = vmatmul.mubr.msk.f32.vlgmr.msra.gmra.mrb[108].mxu0 %vm705_vm13, %v3108_v45  ;;  %v3727_v45 = vld [vmem:[#allocation2 + $0xa28] sm:$0xff]  ;;  %v5608_v20 = vpack.c.bf16 %v3725_v1, %v3724_v23 }
 0x59e   : > { %3454 = vmatmul.mubr.f32.gmra.mrb[106].mxu1 %v2974_v4  ;;  %5133 = vmatprep.mubr.f32.mxu0 %v3107_v40  ;;  %v5612_v4 = vpack.c.bf16 %v3727_v45, %v3726_v47  ;;  %v3719_v40 = vld [vmem:[#allocation2 + $0x9e8] sm:$0xff]  ;;  %v7301_v47 = vld [vmem:[#allocation5 + $0x5] ss:$0 sm:$0xff] }
 0x59f   : > { %5587 = vmatpush3.bf16.msra.mxu1 %v5586_v44  ;;  %v5596_v37 = vpack.c.bf16 %v3719_v40, %v3718_v35  ;;  %v3708_v44 = vld [vmem:[#allocation2 + $0x990] sm:$0xff]  ;;  %v3276_v45 = vadd.f32 %v7297_v7, %v7301_v47 }
 0x5a0   : > { %5589 = vmatprep.subr.bf16.mxu1 %v5588_v41  ;;  %5613 = vmatprep.subr.bf16.mxu0 %v5612_v4  ;;  %v3737_v41 = vld [vmem:[#allocation2 + $0xa78] sm:$0xff]  ;;  %v5610_v50 = vpack.c.bf16 %v3709_v5, %v3708_v44 }
 0x5a1   : > { %5134 = vmatmul.mubr.f32.gmra.mrb[110].mxu0 %v3106_v11  ;;  %v3703_v11 = vld [vmem:[#allocation2 + $0x968] sm:$0xff] }
 0x5a2   : > { %5136 = vmatprep.mubr.f32.mxu0 %v3105_v59  ;;  %v5598_v59 = vpack.c.bf16 %v3703_v11, %v3702_v27  ;;  %5615 = vmatpush3.bf16.msra.mxu0 %v5612_v4 }
 0x5a3   : > { %5591 = vmatpush3.bf16.msra.mxu1 %v5590_v49  ;;  %v5632_v49 = vpack.c.bf16 %v3737_v41, %v3736_v61 }
 0x5a4   : > { %5593 = vmatprep.subr.bf16.mxu1 %v5592_v54  ;;  %v3740_v54 = vld [vmem:[#allocation2 + $0xa90] sm:$0xff] }
 0x5a5   : > { %5137 = vmatmul.mubr.f32.gmra.mrb[112].mxu0 %v3104_v43  ;;  %v3729_v43 = vld [vmem:[#allocation2 + $0xa38] sm:$0xff] }
 0x5a6   : > { %5139 = vmatprep.mubr.f32.mxu0 %v3103_v33  ;;  %v5616_v6 = vpack.c.bf16 %v3729_v43, %v3728_v53  ;;  %v3720_v33 = vld [vmem:[#allocation2 + $0x9f0] sm:$0xff]  ;;  %v3281_v43 = vadd.f32 %v7299_v36, %v7301_v47 }
 0x5a7   : > { %5595 = vmatpush3.bf16.msra.mxu1 %v5594_v21  ;;  %v5600_v0 = vpack.c.bf16 %v3721_v55, %v3720_v33  ;;  %v5640_v21 = vpack.c.bf16 %v3741_v15, %v3740_v54 }
 0x5a8   : > { %5597 = vmatprep.subr.bf16.mxu1 %v5596_v37  ;;  %5617 = vmatprep.subr.bf16.mxu0 %v5616_v6 }
 0x5a9   : > { %5140 = vmatmul.mubr.f32.gmra.mrb[114].mxu0 %v3102_v17  ;;  %v3705_v17 = vld [vmem:[#allocation2 + $0x978] sm:$0xff] }
 0x5aa   : > { %5142 = vmatprep.mubr.f32.mxu0 %v3101_v56  ;;  %5619 = vmatpush3.bf16.msra.mxu0 %v5616_v6  ;;  %v3731_v56 = vld [vmem:[#allocation2 + $0xa48] sm:$0xff] }
 0x5ab   : > { %5599 = vmatpush3.bf16.msra.mxu1 %v5598_v59  ;;  %v5620_v30 = vpack.c.bf16 %v3731_v56, %v3730_v58 }
 0x5ac   : > { %5601 = vmatprep.subr.bf16.mxu1 %v5600_v0 }
 0x5ad   : > { %5143 = vmatmul.mubr.msk.f32.gmra.mrb[116].mxu0 %vm725_vm14, %v3100_v8  ;;  %v5602_v8 = vpack.c.bf16 %v3705_v17, %v3704_v18  ;;  %5621 = vmatprep.subr.bf16.mxu0 %v5620_v30 }
 0x5ae   : > { %5145 = vmatprep.mubr.f32.mxu0 %v7527_v28  ;;  %5623 = vmatpush3.bf16.msra.mxu0 %v5620_v30 }
 0x5af   : > { %5603 = vmatpush3.bf16.msra.mxu1 %v5602_v8  ;;  %5625 = vmatprep.subr.bf16.mxu0 %v5624_v39 }
 0x5b0   : > { %5605 = vmatprep.subr.bf16.mxu1 %v5604_v9 }
 0x5b1   : > { %5146 = vmatmul.mubr.f32.gmra.mrb[118].mxu0 %v7527_v28 }
 0x5b2   : > { %5180 = vmatprep.mubr.f32.mxu0 %v7527_v28  ;;  %5627 = vmatpush3.bf16.msra.mxu0 %v5624_v39 }
 0x5b3   : > { %5607 = vmatpush3.bf16.msra.mxu1 %v5606_v63  ;;  %5629 = vmatprep.subr.bf16.mxu0 %v5628_v31 }
 0x5b4   : > { %5609 = vmatprep.subr.bf16.mxu1 %v5608_v20 }
 0x5b6   : > { %5631 = vmatpush3.bf16.msra.mxu0 %v5628_v31 }
 0x5b7   : > { %5611 = vmatpush3.bf16.msra.mxu1 %v5610_v50  ;;  %5633 = vmatprep.subr.bf16.mxu0 %v5632_v49 }
 0x5ba   : > { %5635 = vmatpush3.bf16.msra.mxu0 %v5632_v49 }
 0x5bb   : > { %5637 = vmatprep.subr.bf16.mxu0 %v5636_v42 }
 0x5be   : > { %5639 = vmatpush3.bf16.msra.mxu0 %v5636_v42 }
 0x5bf   : > { %5641 = vmatprep.subr.bf16.mxu0 %v5640_v21 }
 0x5c2   : > { %5643 = vmatpush3.bf16.msra.mxu0 %v5640_v21 }
 0x63c   : > { %v4738_v35 = vpop.f32.mrb[84].mxu1 }
 0x63d   : > { %v4739_v4 = vpop.f32.mrb[85].mxu1 }
 0x63e   : > { %v4740_v40 = vadd.f32 %v4739_v4, %v4738_v35 }
 0x640   : > { %v7305_v27 = vadd.f32 %v4740_v40, %v3276_v45 }
 0x648   : > { %v4676_v11 = vpop.f32.mrb[88].mxu0  ;;  %v4741_v37 = vpop.f32.mrb[86].mxu1 }
 0x649   : > { %v4677_v59 = vpop.f32.mrb[89].mxu0  ;;  %v4742_v53 = vpop.f32.mrb[87].mxu1 }
 0x64a   : > { %v4678_v6 = vadd.f32 %v4677_v59, %v4676_v11  ;;  %v4743_v33 = vadd.f32 %v4742_v53, %v4741_v37 }
 0x64c   : > { %v4679_v55 = vpop.f32.mrb[90].mxu0  ;;  %v4744_v18 = vpop.f32.mrb[88].mxu1  ;;  %v7309_v0 = vadd.f32 %v4743_v33, %v3281_v43  ;;  %v3286_v58 = vadd.f32 %v4678_v6, %v7301_v47 }
 0x64d   : > { %v4680_v17 = vpop.f32.mrb[91].mxu0  ;;  %v4745_v7 = vpop.f32.mrb[89].mxu1 }
 0x64e   : > { %v4681_v56 = vadd.f32 %v4680_v17, %v4679_v55  ;;  %v4746_v8 = vadd.f32 %v4745_v7, %v4744_v18 }
 0x650   : > { %v4682_v30 = vpop.f32.mrb[92].mxu0  ;;  %v4747_v29 = vpop.f32.mrb[90].mxu1  ;;  %v7312_v52 = vadd.f32 %v4746_v8, %v3286_v58  ;;  %v3291_v36 = vadd.f32 %v4681_v56, %v7301_v47 }
 0x651   : > { %v4683_v32 = vpop.f32.mrb[93].mxu0  ;;  %v4748_v39 = vpop.f32.mrb[91].mxu1 }
 0x652   : > { %v4684_v26 = vadd.f32 %v4683_v32, %v4682_v30  ;;  %v4749_v34 = vadd.f32 %v4748_v39, %v4747_v29 }
 0x654   : > { %v4685_v62 = vpop.f32.mrb[94].mxu0  ;;  %v4750_v9 = vpop.f32.mrb[92].mxu1  ;;  %v7315_v63 = vadd.f32 %v4749_v34, %v3291_v36  ;;  %v3296_v31 = vadd.f32 %v4684_v26, %v7301_v47 }
 0x655   : > { %v4686_v2 = vpop.f32.mrb[95].mxu0  ;;  %v4751_v14 = vpop.f32.mrb[93].mxu1 }
 0x656   : > { %v4687_v23 = vadd.f32 %v4686_v2, %v4685_v62  ;;  %v4752_v1 = vadd.f32 %v4751_v14, %v4750_v9 }
 0x658   : > { %v4688_v44 = vpop.f32.mrb[96].mxu0  ;;  %v7318_v20 = vadd.f32 %v4752_v1, %v3296_v31  ;;  %v3301_v49 = vadd.f32 %v4687_v23, %v7301_v47 }
 0x659   : > { %v4753_v5 = vpop.f32.mrb[94].mxu1  ;;  %v4689_v61 = vpop.f32.mrb[97].mxu0 }
 0x65a   : > { %v4690_v41 = vadd.f32 %v4689_v61, %v4688_v44  ;;  %v4754_v50 = vpop.f32.mrb[95].mxu1 }
 0x65b   : > { %v4755_v57 = vadd.f32 %v4754_v50, %v4753_v5 }
 0x65c   : > { %v4691_v19 = vpop.f32.mrb[98].mxu0  ;;  %v3306_v35 = vadd.f32 %v4690_v41, %v7301_v47 }
 0x65d   : > { %v4756_v42 = vpop.f32.mrb[96].mxu1  ;;  %v4692_v54 = vpop.f32.mrb[99].mxu0  ;;  %v7321_v15 = vadd.f32 %v4755_v57, %v3301_v49 }
 0x65e   : > { %v4693_v21 = vadd.f32 %v4692_v54, %v4691_v19  ;;  %v4757_v45 = vpop.f32.mrb[97].mxu1 }
 0x65f   : > { %v4758_v4 = vadd.f32 %v4757_v45, %v4756_v42 }
 0x660   : > { %v4694_v40 = vpop.f32.mrb[100].mxu0  ;;  %v3311_v6 = vadd.f32 %v4693_v21, %v7301_v47 }
 0x661   : > { %v4759_v11 = vpop.f32.mrb[98].mxu1  ;;  %v4695_v37 = vpop.f32.mrb[101].mxu0  ;;  %v7324_v59 = vadd.f32 %v4758_v4, %v3306_v35 }
 0x662   : > { %v4696_v53 = vadd.f32 %v4695_v37, %v4694_v40  ;;  %v4760_v43 = vpop.f32.mrb[99].mxu1 }
 0x663   : > { %v4761_v33 = vadd.f32 %v4760_v43, %v4759_v11 }
 0x664   : > { %v4697_v55 = vpop.f32.mrb[102].mxu0  ;;  %v3316_v8 = vadd.f32 %v4696_v53, %v7301_v47 }
 0x665   : > { %v4762_v18 = vpop.f32.mrb[100].mxu1  ;;  %v4698_v17 = vpop.f32.mrb[103].mxu0  ;;  %v7327_v7 = vadd.f32 %v4761_v33, %v3311_v6 }
 0x666   : > { %v4699_v58 = vadd.f32 %v4698_v17, %v4697_v55  ;;  %v4763_v56 = vpop.f32.mrb[101].mxu1 }
 0x667   : > { %v4764_v30 = vadd.f32 %v4763_v56, %v4762_v18 }
 0x668   : > { %v4700_v29 = vpop.f32.mrb[104].mxu0  ;;  %v3321_v62 = vadd.f32 %v4699_v58, %v7301_v47 }
 0x669   : > { %v4765_v32 = vpop.f32.mrb[102].mxu1  ;;  %v4701_v39 = vpop.f32.mrb[105].mxu0  ;;  %v7330_v36 = vadd.f32 %v4764_v30, %v3316_v8 }
 0x66a   : > { %v4702_v26 = vadd.f32 %v4701_v39, %v4700_v29  ;;  %v4766_v34 = vpop.f32.mrb[103].mxu1 }
 0x66b   : > { %v4767_v9 = vadd.f32 %v4766_v34, %v4765_v32 }
 0x66c   : > { %v4703_v2 = vpop.f32.mrb[106].mxu0  ;;  %v3326_v5 = vadd.f32 %v4702_v26, %v7301_v47 }
 0x66d   : > { %v4768_v14 = vpop.f32.mrb[104].mxu1  ;;  %v4704_v31 = vpop.f32.mrb[107].mxu0  ;;  %v7333_v23 = vadd.f32 %v4767_v9, %v3321_v62 }
 0x66e   : > { %v4705_v1 = vadd.f32 %v4704_v31, %v4703_v2  ;;  %v4769_v44 = vpop.f32.mrb[105].mxu1 }
 0x66f   : > { %v4770_v61 = vadd.f32 %v4769_v44, %v4768_v14 }
 0x670   : > { %v5132_v41 = vpop.f32.mrb[108].mxu0  ;;  %v3331_v21 = vadd.f32 %v4705_v1, %v7301_v47 }
 0x671   : > { %v4771_v50 = vpop.f32.mrb[106].mxu1  ;;  %v3531_v49 = vadd.f32 %v5132_v41, %v7309_v0  ;;  %v3525_v57 = vpop.f32.mrb[109].mxu0  ;;  %v7337_v19 = vadd.f32 %v4770_v61, %v3326_v5 }
 0x672   : > { %v4772_v42 = vpop.f32.mrb[107].mxu1  ;;  %v3526_v54 = vadd.f32 %v3525_v57, %v7305_v27 }
 0x673   : > { %v3597_v45 = vmul.f32 0.01, %v3531_v49  ;;  %v4773_v35 = vadd.f32 %v4772_v42, %v4771_v50  ;;  %vm3585_vm9 = vcmp.gt.f32.partialorder %v3531_v49, 0.0 }
 0x674   : > { %v3596_v4 = vmul.f32 0.01, %v3526_v54  ;;  %v5135_v40 = vpop.f32.mrb[110].mxu0  ;;  %vm3584_vm15 = vcmp.gt.f32.partialorder %v3526_v54, 0.0 }
 0x675   : > { %v3541_v11 = vadd.f32 %v5135_v40, %v7315_v63  ;;  %v3535_v37 = vpop.f32.mrb[111].mxu0  ;;  %v7342_v53 = vadd.f32 %v4773_v35, %v3331_v21  ;;  %v3609_v6 = vsel %vm3585_vm9, %v3531_v49, %v3597_v45 }
 0x676   : > { %v3536_v0 = vadd.f32 %v3535_v37, %v7312_v52  ;;  %v3608_v43 = vsel %vm3584_vm15, %v3526_v54, %v3596_v4  ;;  %v3659_v63 = vrot.slane %v3609_v6, 1  ;;  %v3623_v26 = vrot.slane %v3609_v6, 7 }
 0x677   : > { %vm3587_vm8 = vcmp.gt.f32.partialorder %v3541_v11, 0.0  ;;  %v3599_v33 = vmul.f32 0.01, %v3541_v11  ;;  %3812 = vmatprep.mubr.f32.mxu1 %v3608_v43 }
 0x678   : > { %v3598_v27 = vmul.f32 0.01, %v3536_v0  ;;  %v5138_v47 = vpop.f32.mrb[112].mxu0  ;;  %3813 = vmatmul.mubr.f32.vlgmr.msra.gmra.mrb[108].mxu1 %v7527_v28  ;;  %vm3586_vm12 = vcmp.gt.f32.partialorder %v3536_v0, 0.0 }
 0x679   : > { %v3611_v55 = vsel %vm3587_vm8, %v3541_v11, %v3599_v33  ;;  %v3551_v18 = vadd.f32 %v5138_v47, %v7321_v15  ;;  %v3545_v17 = vpop.f32.mrb[113].mxu0  ;;  %3816 = vmatprep.mubr.f32.mxu1 %v3609_v6 }
 0x67a   : > { %v3546_v58 = vadd.f32 %v3545_v17, %v7318_v20  ;;  %v3610_v56 = vsel %vm3586_vm12, %v3536_v0, %v3598_v27  ;;  %v3661_v52 = vrot.slane %v3611_v55, 1  ;;  %v3625_v8 = vrot.slane %v3611_v55, 7 }
 0x67b   : > { %vm3589_vm10 = vcmp.gt.f32.partialorder %v3551_v18, 0.0  ;;  %v3601_v30 = vmul.f32 0.01, %v3551_v18  ;;  %v3624_v29 = vrot.slane %v3610_v56, 7  ;;  %v3660_v32 = vrot.slane %v3610_v56, 1 }
 0x67c   : > { %vm3588_vm11 = vcmp.gt.f32.partialorder %v3546_v58, 0.0  ;;  %v3600_v39 = vmul.f32 0.01, %v3546_v58  ;;  %v5141_v34 = vpop.f32.mrb[114].mxu0  ;;  %3817 = vmatmul.mubr.f32.gmra.mrb[110].mxu1 %v7527_v28 }
 0x67d   : > { %v3613_v62 = vsel %vm3589_vm10, %v3551_v18, %v3601_v30  ;;  %v3561_v15 = vadd.f32 %v5141_v34, %v7327_v7  ;;  %v3555_v9 = vpop.f32.mrb[115].mxu0  ;;  %3820 = vmatprep.mubr.f32.mxu1 %v3610_v56  ;;  %v3679_v20 = vsel %vm827_vm1, %v3659_v63, %v3660_v32  ;;  %v3678_v2 = vsel %vm827_vm1, %v3660_v32, %v3661_v52 }
 0x67e   : > { %v3612_v14 = vsel %vm3588_vm11, %v3546_v58, %v3600_v39  ;;  %v3556_v31 = vadd.f32 %v3555_v9, %v7324_v59  ;;  %5181 = vmatmul.mubr.msk.f32.vlgmr.msra.gmra.mrb[120].mxu0 %vm561_vm2, %v3679_v20  ;;  %v3643_v1 = vsel %vm790_vm0, %v3623_v26, %v3624_v29  ;;  %v3663_v44 = vrot.slane %v3613_v62, 1 }
 0x67f   : > { %vm3591_vm4 = vcmp.gt.f32.partialorder %v3561_v15, 0.0  ;;  %v3603_v7 = vmul.f32 0.01, %v3561_v15  ;;  %5183 = vmatprep.mubr.f32.mxu0 %v3678_v2  ;;  %v3662_v5 = vrot.slane %v3612_v14, 1  ;;  %v3642_v61 = vsel %vm790_vm0, %v3624_v29, %v3625_v8 }
 0x680   : > { %vm3590_vm5 = vcmp.gt.f32.partialorder %v3556_v31, 0.0  ;;  %v3602_v41 = vmul.f32 0.01, %v3556_v31  ;;  %v5144_v50 = vpop.f32.mrb[116].mxu0  ;;  %4239 = vmatmul.mubr.msk.f32.gmra.mrb[112].mxu1 %vm514_vm3, %v3643_v1  ;;  %v3626_v59 = vrot.slane %v3612_v14, 7  ;;  %v3627_v12 = vrot.slane %v3613_v62, 7 }
 0x681   : > { %v3615_v49 = vsel %vm3591_vm4, %v3561_v15, %v3603_v7  ;;  %v3571_v57 = vadd.f32 %v5144_v50, %v7333_v23  ;;  %v3565_v42 = vpop.f32.mrb[117].mxu0  ;;  %3825 = vmatprep.mubr.f32.mxu1 %v3611_v55  ;;  %v3677_v54 = vsel %vm827_vm1, %v3661_v52, %v3662_v5  ;;  %v3676_v21 = vsel %vm827_vm1, %v3662_v5, %v3663_v44 }
 0x682   : > { %v3614_v45 = vsel %vm3590_vm5, %v3556_v31, %v3602_v41  ;;  %v3566_v35 = vadd.f32 %v3565_v42, %v7330_v36  ;;  %5184 = vmatmul.mubr.f32.gmra.mrb[122].mxu0 %v3677_v54  ;;  %v3665_v4 = vrot.slane %v3615_v49, 1  ;;  %v3641_v16 = vsel %vm790_vm0, %v3625_v8, %v3626_v59 }
 0x683   : > { %vm3593_vm2 = vcmp.gt.f32.partialorder %v3571_v57, 0.0  ;;  %v3605_v40 = vmul.f32 0.01, %v3571_v57  ;;  %5186 = vmatprep.mubr.f32.mxu0 %v3676_v21  ;;  %v3664_v23 = vrot.slane %v3614_v45, 1  ;;  %v3640_v11 = vsel %vm790_vm0, %v3626_v59, %v3627_v12 }
 0x684   : > { %vm3592_vm3 = vcmp.gt.f32.partialorder %v3566_v35, 0.0  ;;  %v3604_v37 = vmul.f32 0.01, %v3566_v35  ;;  %v5147_v0 = vpop.f32.mrb[118].mxu0  ;;  %3826 = vmatmul.mubr.f32.gmra.mrb[114].mxu1 %v3642_v61  ;;  %v3628_v43 = vrot.slane %v3614_v45, 7  ;;  %v3629_v6 = vrot.slane %v3615_v49, 7 }
 0x685   : > { %v3617_v33 = vsel %vm3593_vm2, %v3571_v57, %v3605_v40  ;;  %v3581_v36 = vadd.f32 %v5147_v0, %v7342_v53  ;;  %v3575_v27 = vpop.f32.mrb[119].mxu0  ;;  %3830 = vmatprep.mubr.f32.mxu1 %v3612_v14  ;;  %v3675_v47 = vsel %vm827_vm1, %v3663_v44, %v3664_v23  ;;  %v3674_v55 = vsel %vm827_vm1, %v3664_v23, %v3665_v4  ;;  %v7402_v61 = vld [vmem:[#allocation5 + $0x6] ss:$0 sm:$0xff] }
 0x686   : > { %v3616_v18 = vsel %vm3592_vm3, %v3566_v35, %v3604_v37  ;;  %v3576_v17 = vadd.f32 %v3575_v27, %v7337_v19  ;;  %5187 = vmatmul.mubr.f32.gmra.mrb[124].mxu0 %v3675_v47  ;;  %v3667_v63 = vrot.slane %v3617_v33, 1  ;;  %v3639_v58 = vsel %vm790_vm0, %v3627_v12, %v3628_v43 }
 0x687   : > { %5189 = vmatprep.mubr.f32.mxu0 %v3674_v55  ;;  %v3666_v56 = vrot.slane %v3616_v18, 1  ;;  %v3638_v53 = vsel %vm790_vm0, %v3628_v43, %v3629_v6  ;;  %v3630_v52 = vrot.slane %v3616_v18, 7  ;;  %v3631_v30 = vrot.slane %v3617_v33, 7 }
 0x688   : > { %vm3594_vm13 = vcmp.gt.f32.partialorder %v3576_v17, 0.0  ;;  %v3606_v8 = vmul.f32 0.01, %v3576_v17  ;;  %3831 = vmatmul.mubr.f32.gmra.mrb[116].mxu1 %v3641_v16  ;;  %v3607_v20 = vmul.f32 0.01, %v3581_v36 }
 0x689   : > { %3835 = vmatprep.mubr.f32.mxu1 %v3613_v62  ;;  %v3673_v29 = vsel %vm827_vm1, %v3665_v4, %v3666_v56  ;;  %v3672_v19 = vsel %vm827_vm1, %v3666_v56, %v3667_v63  ;;  %v3637_v32 = vsel %vm790_vm0, %v3629_v6, %v3630_v52  ;;  %v3636_v26 = vsel %vm790_vm0, %v3630_v52, %v3631_v30 }
 0x68a   : > { %v3618_v39 = vsel %vm3594_vm13, %v3576_v17, %v3606_v8  ;;  %5190 = vmatmul.mubr.f32.gmra.mrb[126].mxu0 %v3673_v29 }
 0x68b   : > { %v3632_v34 = vrot.slane %v3618_v39, 7  ;;  %v3668_v15 = vrot.slane %v3618_v39, 1  ;;  %5192 = vmatprep.mubr.f32.mxu0 %v3672_v19 }
 0x68c   : > { %3836 = vmatmul.mubr.f32.gmra.mrb[118].mxu1 %v3640_v11 }
 0x68d   : > { %3840 = vmatprep.mubr.f32.mxu1 %v3614_v45  ;;  %v3671_v62 = vsel %vm827_vm1, %v3667_v63, %v3668_v15  ;;  %v3635_v9 = vsel %vm790_vm0, %v3631_v30, %v3632_v34  ;;  %vm3595_vm1 = vcmp.gt.f32.partialorder %v3581_v36, 0.0 }
 0x68e   : > { %5193 = vmatmul.mubr.msk.f32.gmra.mrb[128].mxu0 %vm581_vm7, %v3671_v62  ;;  %v3619_v3 = vsel %vm3595_vm1, %v3581_v36, %v3607_v20 }
 0x68f   : > { %5195 = vmatprep.mubr.f32.mxu0 %v7527_v28 }
 0x690   : > { %3841 = vmatmul.mubr.f32.gmra.mrb[120].mxu1 %v3639_v58 }
 0x691   : > { %3845 = vmatprep.mubr.f32.mxu1 %v3615_v49 }
 0x692   : > { %5196 = vmatmul.mubr.f32.gmra.mrb[130].mxu0 %v7527_v28 }
 0x694   : > { %3846 = vmatmul.mubr.f32.gmra.mrb[122].mxu1 %v3638_v53 }
 0x695   : > { %3850 = vmatprep.mubr.f32.mxu1 %v3616_v18 }
 0x698   : > { %3851 = vmatmul.mubr.f32.gmra.mrb[124].mxu1 %v3637_v32 }
 0x699   : > { %3855 = vmatprep.mubr.f32.mxu1 %v3617_v33 }
 0x69c   : > { %3856 = vmatmul.mubr.f32.gmra.mrb[126].mxu1 %v3636_v26 }
 0x69d   : > { %3860 = vmatprep.mubr.f32.mxu1 %v3618_v39 }
 0x6a0   : > { %4240 = vmatmul.mubr.msk.f32.gmra.mrb[128].mxu1 %vm534_vm6, %v3635_v9 }
 0x6a1   : > { %3864 = vmatprep.mubr.f32.mxu1 %v3619_v3 }
 0x6a4   : > { %3865 = vmatmul.mubr.f32.gmra.mrb[130].mxu1 %v7527_v28 }
 0x74b   : > { %v4834_v24 = vpop.f32.mrb[108].mxu1 }
 0x74c   : > { %v4835_v2 = vpop.f32.mrb[109].mxu1 }
 0x74f   : > { %v4837_v14 = vpop.f32.mrb[110].mxu1 }
 0x750   : > { %v4838_v31 = vpop.f32.mrb[111].mxu1 }
 0x751   : > { %v5182_v1 = vpop.f32.mrb[120].mxu0 }
 0x752   : > { %v3935_v44 = vpop.f32.mrb[121].mxu0 }
 0x753   : > { %v4840_v7 = vpop.f32.mrb[112].mxu1 }
 0x754   : > { %v4841_v5 = vpop.f32.mrb[113].mxu1 }
 0x755   : > { %v4842_v41 = vadd.f32 %v4841_v5, %v4840_v7  ;;  %v5185_v50 = vpop.f32.mrb[122].mxu0 }
 0x756   : > { %v3943_v22 = vpop.f32.mrb[123].mxu0 }
 0x757   : > { %v3823_v59 = vadd.f32 %v4842_v41, %v7402_v61  ;;  %v4843_v12 = vpop.f32.mrb[114].mxu1 }
 0x758   : > { %v4844_v49 = vpop.f32.mrb[115].mxu1 }
 0x759   : > { %v3944_v28 = vadd.f32 %v3943_v22, %v3823_v59  ;;  %v4845_v57 = vadd.f32 %v4844_v49, %v4843_v12  ;;  %v5188_v42 = vpop.f32.mrb[124].mxu0 }
 0x75a   : > { %v3953_v54 = vpop.f32.mrb[125].mxu0 }
 0x75b   : > { %v3990_v21 = vadd.f32 %v3944_v28, %v7081_v51  ;;  %v3828_v45 = vadd.f32 %v4845_v57, %v7402_v61  ;;  %v4846_v35 = vpop.f32.mrb[116].mxu1 }
 0x75c   : > { %v4847_v4 = vpop.f32.mrb[117].mxu1 }
 0x75d   : > { %vm3998_vm0 = vcmp.gt.f32.partialorder %v3990_v21, 0.0  ;;  %v4006_v16 = vmul.f32 0.01, %v3990_v21  ;;  %v3949_v40 = vadd.f32 %v5185_v50, %v3828_v45  ;;  %v4848_v23 = vadd.f32 %v4847_v4, %v4846_v35  ;;  %v5191_v11 = vpop.f32.mrb[126].mxu0 }
 0x75e   : > { %v3963_v37 = vpop.f32.mrb[127].mxu0 }
 0x75f   : > { %v4014_v0 = vsel %vm3998_vm0, %v3990_v21, %v4006_v16  ;;  %v3991_v43 = vadd.f32 %v3949_v40, %v7078_v38  ;;  %v3833_v6 = vadd.f32 %v4848_v23, %v7402_v61  ;;  %v4849_v33 = vpop.f32.mrb[118].mxu1 }
 0x760   : > { %4022 = vst [vmem:[%s7412_s11] sm:$0xff] %v4014_v0  ;;  %v4850_v51 = vpop.f32.mrb[119].mxu1 }
 0x761   : > { %vm3999_vm6 = vcmp.gt.f32.partialorder %v3991_v43, 0.0  ;;  %v4007_v36 = vmul.f32 0.01, %v3991_v43  ;;  %v3954_v27 = vadd.f32 %v3953_v54, %v3833_v6  ;;  %v4851_v47 = vadd.f32 %v4850_v51, %v4849_v33  ;;  %v5194_v55 = vpop.f32.mrb[128].mxu0 }
 0x762   : > { %v3973_v18 = vpop.f32.mrb[129].mxu0 }
 0x763   : > { %v4015_v17 = vsel %vm3999_vm6, %v3991_v43, %v4007_v36  ;;  %v3992_v63 = vadd.f32 %v3954_v27, %v7111_v46  ;;  %v3838_v38 = vadd.f32 %v4851_v47, %v7402_v61  ;;  %v4852_v58 = vpop.f32.mrb[120].mxu1 }
 0x764   : > { %4023 = vst [vmem:[%s7412_s11 + $0x8] sm:$0xff] %v4015_v17  ;;  %v4853_v56 = vpop.f32.mrb[121].mxu1 }
 0x765   : > { %vm4000_vm7 = vcmp.gt.f32.partialorder %v3992_v63, 0.0  ;;  %v4008_v53 = vmul.f32 0.01, %v3992_v63  ;;  %v3959_v52 = vadd.f32 %v5188_v42, %v3838_v38  ;;  %v4854_v8 = vadd.f32 %v4853_v56, %v4852_v58  ;;  %v5197_v30 = vpop.f32.mrb[130].mxu0 }
 0x766   : > { %v3983_v29 = vpop.f32.mrb[131].mxu0 }
 0x767   : > { %v4016_v19 = vsel %vm4000_vm7, %v3992_v63, %v4008_v53  ;;  %v3993_v32 = vadd.f32 %v3959_v52, %v7119_v13  ;;  %v3843_v39 = vadd.f32 %v4854_v8, %v7402_v61  ;;  %v4855_v26 = vpop.f32.mrb[122].mxu1 }
 0x768   : > { %4024 = vst [vmem:[%s7412_s11 + $0x10] sm:$0xff] %v4016_v19  ;;  %v4856_v46 = vpop.f32.mrb[123].mxu1 }
 0x769   : > { %vm4001_vm14 = vcmp.gt.f32.partialorder %v3993_v32, 0.0  ;;  %v4009_v34 = vmul.f32 0.01, %v3993_v32  ;;  %v3964_v15 = vadd.f32 %v3963_v37, %v3843_v39  ;;  %v4857_v62 = vadd.f32 %v4856_v46, %v4855_v26 }
 0x76b   : > { %v4017_v9 = vsel %vm4001_vm14, %v3993_v32, %v4009_v34  ;;  %v3994_v20 = vadd.f32 %v3964_v15, %v7157_v60  ;;  %v3848_v3 = vadd.f32 %v4857_v62, %v7402_v61  ;;  %v4858_v24 = vpop.f32.mrb[124].mxu1 }
 0x76c   : > { %4025 = vst [vmem:[%s7412_s11 + $0x18] sm:$0xff] %v4017_v9  ;;  %v4859_v2 = vpop.f32.mrb[125].mxu1 }
 0x76d   : > { %vm4002_vm9 = vcmp.gt.f32.partialorder %v3994_v20, 0.0  ;;  %v4010_v13 = vmul.f32 0.01, %v3994_v20  ;;  %v3969_v14 = vadd.f32 %v5191_v11, %v3848_v3  ;;  %v4860_v31 = vadd.f32 %v4859_v2, %v4858_v24 }
 0x76f   : > { %v4018_v1 = vsel %vm4002_vm9, %v3994_v20, %v4010_v13  ;;  %v3995_v44 = vadd.f32 %v3969_v14, %v7154_v25  ;;  %v3853_v7 = vadd.f32 %v4860_v31, %v7402_v61  ;;  %v4861_v5 = vpop.f32.mrb[126].mxu1 }
 0x770   : > { %4026 = vst [vmem:[%s7412_s11 + $0x20] sm:$0xff] %v4018_v1  ;;  %v4862_v60 = vpop.f32.mrb[127].mxu1 }
 0x771   : > { %vm4003_vm15 = vcmp.gt.f32.partialorder %v3995_v44, 0.0  ;;  %v4011_v41 = vmul.f32 0.01, %v3995_v44  ;;  %v3974_v50 = vadd.f32 %v3973_v18, %v3853_v7  ;;  %v4863_v22 = vadd.f32 %v4862_v60, %v4861_v5 }
 0x773   : > { %v4019_v59 = vsel %vm4003_vm15, %v3995_v44, %v4011_v41  ;;  %v3996_v12 = vadd.f32 %v3974_v50, %v7180_v10  ;;  %v3858_v49 = vadd.f32 %v4863_v22, %v7402_v61  ;;  %v4864_v28 = vpop.f32.mrb[128].mxu1 }
 0x774   : > { %4027 = vst [vmem:[%s7412_s11 + $0x28] sm:$0xff] %v4019_v59  ;;  %v4865_v25 = vpop.f32.mrb[129].mxu1 }
 0x775   : > { %vm4004_vm8 = vcmp.gt.f32.partialorder %v3996_v12, 0.0  ;;  %v4012_v57 = vmul.f32 0.01, %v3996_v12  ;;  %v3979_v42 = vadd.f32 %v5194_v55, %v3858_v49 }
 0x777   : > { %v4020_v54 = vsel %vm4004_vm8, %v3996_v12, %v4012_v57  ;;  %v3997_v21 = vadd.f32 %v3979_v42, %v7200_v48  ;;  %v4867_v45 = vpop.f32.mrb[130].mxu1 }
 0x778   : > { %4028 = vst [vmem:[%s7412_s11 + $0x30] sm:$0xff] %v4020_v54  ;;  %v4868_v35 = vpop.f32.mrb[131].mxu1 }
 0x779   : > { %vm4005_vm12 = vcmp.gt.f32.partialorder %v3997_v21, 0.0  ;;  %v4013_v10 = vmul.f32 0.01, %v3997_v21 }
 0x77b   : > { %v4021_v61 = vsel %vm4005_vm12, %v3997_v21, %v4013_v10 }
 0x77c   : > { %4029 = vst [vmem:[%s7412_s11 + $0x38] sm:$0xff] %v4021_v61 }
 0x77d   : > { %5870 = shalt.err (!%p5867_p6)
}
 0x77e   : > { %s5871_s9 = scalar_lea.hbm %s7437_s24, 1024  ;;  %s5875_s14 = scalar_lea.hbm %s7495_s5, 2048 }
 0x77f   : > { %p5872_p7 = scmp.ne.s32.totalorder %s7437_s24, %s5871_s9  ;;  %p5876_p0 = scmp.lt.u32.totalorder %s7437_s24, %s7495_s5 }
 0x780   : > { %p5877_p1 = scmp.lt.u32.totalorder %s5875_s14, %s5871_s9  ;;  %p5879_p13 = scmp.lt.u32.totalorder %s5871_s9, %s7437_s24 }
 0x781   : > { %p5873_p9 = pnand %p5872_p7, %p7543_p8 }
 0x782   : > { %p5878_p4 = por %p5877_p1, %p5876_p0 }
 0x783   : > { %p5874_p12 = pneg %p5873_p9 }
 0x784   : > { %p5880_p10 = por %p5879_p13, %p5878_p4 }
 0x786   : > { %p5881_p11 = pnand %p5880_p10, %p5874_p12 }
 0x788   : > { %5884 = shalt.err (!%p5881_p11)
}
 0x789   : > { %s5957_s11 = smov 128   ;;  %s5958_s13 = smov 8  }
 0x78a   : > { %5652 = dma.vmem_to_hbm [thread:$0]  (%p7543_p8), %s7439_s8, 1024, %s7437_s24, %s7444_s21, %s5957_s11, %s5957_s11, %s5958_s13  }
 0x78b PF: > { %p5669_p2 = scmp.ge.s32.totalorder %s5943_s23, 2  ;;  %s4061_s16 = sand.u32 1, %s5923_s18  }
 0x78c   : > { %p7544_p3 = scmp.ne.s32.totalorder %s7513_s30, 0  ;;  %s4062_s17 = scalar_lea.sflag [#allocation4], %s4061_s16 }
 0x78e   : > { %p5662_p5 = pnand %p5669_p2, %p7544_p3 }
 0x790   : > { %5918 = dma.done.wait (!%p5662_p5), %s4062_s17, 1024  }
 0x791   : > { %5920 = vsyncadd (!%p5662_p5), %s4062_s17, 4294966272  ;;  %s20_s23 = sadd.s32 1, %s5943_s23   ;;  %s7545_s28 = sld [smem:[#allocation11_spill]] }
 0x792   : > { %p17_p6 = scmp.ge.s32.totalorder %s20_s23, 4   ;;  %s7546_s18 = smov %s5927_s19 }
 0x793   : > { %s7547_s19 = smov %s5931_s20  ;;  %s7548_s20 = smov %s6042_s6 }
 0x794   : > { %s7549_s21 = smov %s5939_s22  ;;  %19 = sbr.rel (!%p17_p6) target bundleno = 6 (0x6), region = 96 }
 0x797   : > { %s7550_s22 = smov %s7545_s28 }
 0x79b   :  { %4067 = vsyncpa [#allocation3], 1 }
 0x79c   :  { %4069 = vsyncpa [#allocation3 + $0x1], 1 }
 0x79d   :  { %4070 = vsyncpa [#allocation6], 1 }
 0x79e   :  { %4071 = vsyncpa [#allocation4], 1 }
 0x79f   :  { %4073 = vsyncpa [#allocation4 + $0x1], 1 }

</bundles_post_ra>
